<compile_context>
chip_gen: v5e
topology: v5e:2x2
jax: 0.10.0
libtpu: 0.0.40
codegen_flags: <defaults>
</compile_context>

<pallas_src>
import functools

import jax
import jax.numpy as jnp
from jax.experimental import pallas as pl
from jax.experimental.pallas import tpu as pltpu

_TB = 8  # batch tile (multiple of 8); raise (e.g. 64/128) for large batches.


# ----------------------------------------------------------------------------
# Fused kernel: conv1+sigmoid -> conv2+sigmoid -> linear, one batch tile per step
# ----------------------------------------------------------------------------
def _model1_kernel(p1_ref, w1_ref, b1_ref, w2_ref, b2_ref, wl_ref, bl_ref,
                   out_ref, h1p_ref, *, tb):
    f32 = jnp.float32

    def sigmoid(v):
        return pl.reciprocal(1.0 + jnp.exp(-v), approx=True)

    # ---- Conv1 + sigmoid as one dense MXU matmul over all 14 output columns.
    # p1 rows = (row_block(oh), b), lanes = ow*9 + (kh*3+kw); W1 is block-diagonal
    # with its 256 output lanes already in the parity-split padded layout below.
    h1 = sigmoid(jnp.dot(p1_ref[...], w1_ref[...], preferred_element_type=f32)
                 + b1_ref[...])                                   # [14*tb, 256]

    # ---- Zero-padded conv2 input buffer (VMEM scratch), parity-split layout:
    #   row  = block(ohp)*tb + b,  block(p) = (p % 2)*8 + p//2,  ohp = oh+1
    #   lane = block(owp)*16 + ci,                              owp = ow+1
    # blocks 0 / 15 (rows and lane-blocks) are the conv2 zero padding.
    h1p_ref[pl.ds(tb, 14 * tb), :] = h1
    zrow = jnp.zeros((tb, 256), f32)
    h1p_ref[pl.ds(0, tb), :] = zrow
    h1p_ref[pl.ds(15 * tb, tb), :] = zrow
    zlane = jnp.zeros((16 * tb, 16), f32)
    h1p_ref[:, pl.ds(0, 16)] = zlane
    h1p_ref[:, pl.ds(240, 16)] = zlane

    # ---- Conv2 + sigmoid: each of the 9 taps is one contiguous window of h1p
    # (7 consecutive row blocks, 112 consecutive lanes) fed straight to the MXU.
    acc2 = jnp.zeros((7 * tb, 224), f32)
    for kh in range(3):
        r0 = ((kh % 2) * 8 + kh // 2) * tb
        for kw in range(3):
            c0 = (kw % 2) * 128 + (kw // 2) * 16
            tap = kh * 3 + kw
            slab = h1p_ref[pl.ds(r0, 7 * tb), pl.ds(c0, 112)]     # [7*tb, 112]
            acc2 = acc2 + jnp.dot(slab, w2_ref[pl.ds(tap * 112, 112), :],
                                  preferred_element_type=f32)
    h2 = sigmoid(acc2 + b2_ref[...])                              # [7*tb, 224]
    # h2 rows = oh2*tb + b, lanes = ow2*32 + co

    # ---- Linear(1568 -> 10), classes padded to 128 lanes (lane-dense store).
    # The NCHW flatten is folded into the row order of wl_ref.
    acc3 = jnp.zeros((tb, 128), f32)
    for oh2 in range(7):
        acc3 = acc3 + jnp.dot(h2[oh2 * tb:(oh2 + 1) * tb, :],
                              wl_ref[pl.ds(oh2 * 224, 224), :],
                              preferred_element_type=f32)
    out_ref[...] = acc3 + bl_ref[...]                             # [tb, 128]


# ----------------------------------------------------------------------------
# One-time weight preparation (fold all transposes / flatten / padding here)
# ----------------------------------------------------------------------------
def prepare_params(params):
    w1, b1 = params["w1"], params["b1"]          # [16,1,3,3], [16]
    w2, b2 = params["w2"], params["b2"]          # [32,16,3,3], [32]
    wl, bl = params["wl"], params["bl"]          # [10,1568], [10]
    f32 = jnp.float32

    lane_blk = jnp.array([((ow + 1) % 2) * 8 + (ow + 1) // 2 for ow in range(14)])

    # Conv1: block-diagonal over ow, output lanes in the parity-split padded layout.
    w1t = w1.reshape(16, 9).T.astype(f32)                            # [k, co]
    blkdiag = jnp.einsum("ow,kc->okwc", jnp.eye(14, dtype=f32), w1t)  # [ow_in,k,ow_out,co]
    blkdiag = blkdiag.reshape(126, 14, 16)
    W1 = jnp.zeros((126, 16, 16), f32).at[:, lane_blk, :].set(blkdiag).reshape(126, 256)
    B1 = jnp.zeros((16, 16), f32).at[lane_blk, :].set(
        jnp.broadcast_to(b1.astype(f32), (14, 16))).reshape(1, 256)

    # Conv2: per-tap [112, 224] slabs, block-diagonal over ow2.
    w2t = jnp.transpose(w2, (2, 3, 1, 0)).reshape(9, 16, 32).astype(f32)   # [k, ci, co]
    W2 = jnp.einsum("ow,kic->koiwc", jnp.eye(7, dtype=f32), w2t).reshape(1008, 224)
    B2 = jnp.tile(b2.astype(f32), (7,)).reshape(1, 224)

    # Linear: fold the PyTorch NCHW flatten into the row order, pad classes to 128.
    WLr = jnp.transpose(wl.reshape(10, 32, 7, 7), (2, 3, 1, 0)).reshape(1568, 10)
    WL = jnp.zeros((1568, 128), f32).at[:, :10].set(WLr.astype(f32))
    BL = jnp.zeros((1, 128), f32).at[0, :10].set(bl.astype(f32))

    return {"W1": W1, "b1": B1, "W2": W2, "b2": B2, "WL": WL, "bl": BL}


# ----------------------------------------------------------------------------
# Wrapper: conv1 patch matrix (tiny, C_in=1) + the fused pallas_call
# ----------------------------------------------------------------------------
def _conv1_patches(x, tb):
    """x: [B, 28, 28] -> [n_tiles, 14*tb, 126]; rows = row_block(oh)*tb + b_local,
    lanes = ow*9 + (kh*3+kw)."""
    B = x.shape[0]
    xp = jnp.pad(x, ((0, 0), (1, 1), (1, 1)))
    patches = jnp.stack([xp[:, kh:kh + 28:2, kw:kw + 28:2]
                         for kh in range(3) for kw in range(3)], axis=-1)  # [B,14,14,9]
    p1 = patches.reshape(B, 14, 126)
    inv = [0] * 14
    for oh in range(14):
        inv[((oh + 1) % 2) * 8 + (oh + 1) // 2 - 1] = oh
    p1 = p1[:, jnp.array(inv), :]                       # oh -> parity row-blocks
    n_tiles = (B + tb - 1) // tb
    p1 = jnp.pad(p1, ((0, n_tiles * tb - B), (0, 0), (0, 0)))
    p1 = p1.reshape(n_tiles, tb, 14, 126).transpose(0, 2, 1, 3).reshape(n_tiles, 14 * tb, 126)
    return p1, n_tiles


def model1_forward(x, prepared, tb=_TB):
    assert tb % 8 == 0
    x = x.reshape(-1, 28, 28).astype(jnp.float32)
    B = x.shape[0]
    p1, n_tiles = _conv1_patches(x, tb)

    flops = 2 * n_tiles * tb * (14 * 126 * 256 + 9 * 7 * 112 * 224 + 7 * 224 * 128)
    transc = n_tiles * tb * (14 * 256 + 7 * 224)
    bytes_acc = 4 * (p1.size + 126 * 256 + 256 + 1008 * 224 + 224
                     + 1568 * 128 + 128 + n_tiles * tb * 128)

    out = pl.pallas_call(
        functools.partial(_model1_kernel, tb=tb),
        out_shape=jax.ShapeDtypeStruct((n_tiles * tb, 128), jnp.float32),
        grid=(n_tiles,),
        in_specs=[
            pl.BlockSpec((None, 14 * tb, 126), lambda i: (i, 0, 0)),   # conv1 patches
            pl.BlockSpec((126, 256), lambda i: (0, 0)),                # W1 (resident)
            pl.BlockSpec((1, 256), lambda i: (0, 0)),                  # b1
            pl.BlockSpec((1008, 224), lambda i: (0, 0)),               # W2
            pl.BlockSpec((1, 224), lambda i: (0, 0)),                  # b2
            pl.BlockSpec((1568, 128), lambda i: (0, 0)),               # WL
            pl.BlockSpec((1, 128), lambda i: (0, 0)),                  # bl
        ],
        out_specs=pl.BlockSpec((tb, 128), lambda i: (i, 0)),
        scratch_shapes=[pltpu.VMEM((16 * tb, 256), jnp.float32)],
        compiler_params=pltpu.CompilerParams(dimension_semantics=("parallel",)),
        cost_estimate=pl.CostEstimate(flops=flops, transcendentals=transc,
                                      bytes_accessed=bytes_acc),
    )(p1, prepared["W1"], prepared["b1"], prepared["W2"], prepared["b2"],
      prepared["WL"], prepared["bl"])

    return out[:B, :10]


# ----------------------------------------------------------------------------
# Pure-JAX reference (matches the PyTorch module) and setup
# ----------------------------------------------------------------------------
def reference_forward(x, params):
    x4 = x.reshape(-1, 1, 28, 28).astype(jnp.float32)
    dn = ("NCHW", "OIHW", "NCHW")
    h1 = jax.nn.sigmoid(
        jax.lax.conv_general_dilated(x4, params["w1"], (2, 2), ((1, 1), (1, 1)),
                                     dimension_numbers=dn)
        + params["b1"].reshape(1, 16, 1, 1))
    h2 = jax.nn.sigmoid(
        jax.lax.conv_general_dilated(h1, params["w2"], (2, 2), ((1, 1), (1, 1)),
                                     dimension_numbers=dn)
        + params["b2"].reshape(1, 32, 1, 1))
    flat = h2.reshape(h2.shape[0], -1)
    return flat @ params["wl"].T + params["bl"]


def init_params(key):
    k1, k2, k3, k4, k5, k6 = jax.random.split(key, 6)
    return {
        "w1": 0.1 * jax.random.normal(k1, (16, 1, 3, 3), jnp.float32),
        "b1": 0.1 * jax.random.normal(k2, (16,), jnp.float32),
        "w2": 0.1 * jax.random.normal(k3, (32, 16, 3, 3), jnp.float32),
        "b2": 0.1 * jax.random.normal(k4, (32,), jnp.float32),
        "wl": 0.1 * jax.random.normal(k5, (10, 7 * 7 * 32), jnp.float32),
        "bl": 0.1 * jax.random.normal(k6, (10,), jnp.float32),
    }


if __name__ == "__main__":
    key = jax.random.PRNGKey(0)
    pkey, xkey = jax.random.split(key)
    params = init_params(pkey)
    prepared = prepare_params(params)      # one-time weight folding

    B = 16                                 # small batch; 2 grid steps with TB=8
    x = jax.random.normal(xkey, (B, 1, 28, 28), jnp.float32)

    y = jax.jit(model1_forward)(x, prepared)
    jax.block_until_ready(y)

    assert y.shape == (B, 10)
    y_ref = reference_forward(x, params)
    assert jnp.allclose(y, y_ref, atol=5e-2, rtol=2e-2), \
        float(jnp.max(jnp.abs(y - y_ref)))
    print("KERNEL_OK")
</pallas_src>

<mosaic_0001>
module attributes {stable_mosaic.version = 11 : i64} {
  func.func @_model1_kernel(%arg0: i32, %arg1: memref<1x112x126xf32, #tpu.memory_space<vmem>>, %arg2: memref<126x256xf32, #tpu.memory_space<vmem>>, %arg3: memref<1x256xf32, #tpu.memory_space<vmem>>, %arg4: memref<1008x224xf32, #tpu.memory_space<vmem>>, %arg5: memref<1x224xf32, #tpu.memory_space<vmem>>, %arg6: memref<1568x128xf32, #tpu.memory_space<vmem>>, %arg7: memref<1x128xf32, #tpu.memory_space<vmem>>, %arg8: memref<8x128xf32, #tpu.memory_space<vmem>>, %arg9: memref<128x256xf32, #tpu.memory_space<vmem>>) attributes {dimension_semantics = [#tpu.dimension_semantics<parallel>], iteration_bounds = array<i64: 2>, scalar_prefetch = 0 : i64, scratch_operands = 1 : i64, tpu.core_type = #tpu.core_type<tc>, window_params = [{transform_indices = @transform_0, window_bounds = array<i64: 1, 112, 126>}, {pipeline_mode = #tpu.pipeline_mode<synchronous>, transform_indices = @transform_1, window_bounds = array<i64: 126, 256>}, {pipeline_mode = #tpu.pipeline_mode<synchronous>, transform_indices = @transform_2, window_bounds = array<i64: 1, 256>}, {pipeline_mode = #tpu.pipeline_mode<synchronous>, transform_indices = @transform_3, window_bounds = array<i64: 1008, 224>}, {pipeline_mode = #tpu.pipeline_mode<synchronous>, transform_indices = @transform_4, window_bounds = array<i64: 1, 224>}, {pipeline_mode = #tpu.pipeline_mode<synchronous>, transform_indices = @transform_5, window_bounds = array<i64: 1568, 128>}, {pipeline_mode = #tpu.pipeline_mode<synchronous>, transform_indices = @transform_6, window_bounds = array<i64: 1, 128>}, {transform_indices = @transform_7, window_bounds = array<i64: 8, 128>}]} {
    %c0 = arith.constant 0 : index
    %c0_0 = arith.constant 0 : index
    %c0_1 = arith.constant 0 : index
    %0 = vector.load %arg1[%c0, %c0_0, %c0_1] : memref<1x112x126xf32, #tpu.memory_space<vmem>>, vector<1x112x126xf32>
    %1 = vector.shape_cast %0 : vector<1x112x126xf32> to vector<112x126xf32>
    %c0_2 = arith.constant 0 : index
    %c0_3 = arith.constant 0 : index
    %2 = vector.load %arg2[%c0_2, %c0_3] : memref<126x256xf32, #tpu.memory_space<vmem>>, vector<126x256xf32>
    %cst = arith.constant dense<0.000000e+00> : vector<112x256xf32>
    %3 = tpu.matmul %1, %2, %cst {dimension_numbers = #tpu.dot_dimension_numbers<[1], [0], [0], [1], [0, 0, 1, 1], [], []>} : vector<112x126xf32>, vector<126x256xf32>, vector<112x256xf32> -> vector<112x256xf32>
    %c0_4 = arith.constant 0 : index
    %c0_5 = arith.constant 0 : index
    %4 = vector.load %arg3[%c0_4, %c0_5] : memref<1x256xf32, #tpu.memory_space<vmem>>, vector<1x256xf32>
    %5 = vector.broadcast %4 : vector<1x256xf32> to vector<112x256xf32>
    %6 = arith.addf %3, %5 : vector<112x256xf32>
    %cst_6 = arith.constant 0.000000e+00 : f32
    %7 = vector.broadcast %cst_6 : f32 to vector<112x256xf32>
    %8 = arith.subf %7, %6 : vector<112x256xf32>
    %9 = math.exp %8 : vector<112x256xf32>
    %cst_7 = arith.constant 1.000000e+00 : f32
    %10 = vector.broadcast %cst_7 : f32 to vector<112x256xf32>
    %11 = arith.addf %10, %9 : vector<112x256xf32>
    %12 = tpu.reciprocal %11 {approx = true} : vector<112x256xf32> -> vector<112x256xf32>
    %c8 = arith.constant 8 : index
    %c0_8 = arith.constant 0 : index
    %13 = vector.load %arg9[%c8, %c0_8] : memref<128x256xf32, #tpu.memory_space<vmem>>, vector<112x256xf32>
    tpu.vector_store %arg9[%c8, %c0_8], %12 {strides = array<i32>} : memref<128x256xf32, #tpu.memory_space<vmem>>, vector<112x256xf32>,
    %cst_9 = arith.constant 0.000000e+00 : f32
    %14 = vector.broadcast %cst_9 : f32 to vector<8x256xf32>
    %c0_10 = arith.constant 0 : index
    %c0_11 = arith.constant 0 : index
    %15 = vector.load %arg9[%c0_10, %c0_11] : memref<128x256xf32, #tpu.memory_space<vmem>>, vector<8x256xf32>
    tpu.vector_store %arg9[%c0_10, %c0_11], %14 {strides = array<i32>} : memref<128x256xf32, #tpu.memory_space<vmem>>, vector<8x256xf32>,
    %c120 = arith.constant 120 : index
    %c0_12 = arith.constant 0 : index
    %16 = vector.load %arg9[%c120, %c0_12] : memref<128x256xf32, #tpu.memory_space<vmem>>, vector<8x256xf32>
    tpu.vector_store %arg9[%c120, %c0_12], %14 {strides = array<i32>} : memref<128x256xf32, #tpu.memory_space<vmem>>, vector<8x256xf32>,
    %cst_13 = arith.constant 0.000000e+00 : f32
    %17 = vector.broadcast %cst_13 : f32 to vector<128x16xf32>
    %c0_14 = arith.constant 0 : index
    %c0_15 = arith.constant 0 : index
    %18 = vector.load %arg9[%c0_14, %c0_15] : memref<128x256xf32, #tpu.memory_space<vmem>>, vector<128x16xf32>
    tpu.vector_store %arg9[%c0_14, %c0_15], %17 {strides = array<i32>} : memref<128x256xf32, #tpu.memory_space<vmem>>, vector<128x16xf32>,
    %c0_16 = arith.constant 0 : index
    %c240 = arith.constant 240 : index
    %19 = vector.load %arg9[%c0_16, %c240] : memref<128x256xf32, #tpu.memory_space<vmem>>, vector<128x16xf32>
    tpu.vector_store %arg9[%c0_16, %c240], %17 {strides = array<i32>} : memref<128x256xf32, #tpu.memory_space<vmem>>, vector<128x16xf32>,
    %cst_17 = arith.constant 0.000000e+00 : f32
    %20 = vector.broadcast %cst_17 : f32 to vector<56x224xf32>
    %c0_18 = arith.constant 0 : index
    %c0_19 = arith.constant 0 : index
    %21 = vector.load %arg9[%c0_18, %c0_19] : memref<128x256xf32, #tpu.memory_space<vmem>>, vector<56x112xf32>
    %c0_20 = arith.constant 0 : index
    %c0_21 = arith.constant 0 : index
    %22 = vector.load %arg4[%c0_20, %c0_21] : memref<1008x224xf32, #tpu.memory_space<vmem>>, vector<112x224xf32>
    %cst_22 = arith.constant dense<0.000000e+00> : vector<56x224xf32>
    %23 = tpu.matmul %21, %22, %cst_22 {dimension_numbers = #tpu.dot_dimension_numbers<[1], [0], [0], [1], [0, 0, 1, 1], [], []>} : vector<56x112xf32>, vector<112x224xf32>, vector<56x224xf32> -> vector<56x224xf32>
    %24 = arith.addf %20, %23 : vector<56x224xf32>
    %c0_23 = arith.constant 0 : index
    %c128 = arith.constant 128 : index
    %25 = vector.load %arg9[%c0_23, %c128] : memref<128x256xf32, #tpu.memory_space<vmem>>, vector<56x112xf32>
    %c112 = arith.constant 112 : index
    %c0_24 = arith.constant 0 : index
    %26 = vector.load %arg4[%c112, %c0_24] : memref<1008x224xf32, #tpu.memory_space<vmem>>, vector<112x224xf32>
    %cst_25 = arith.constant dense<0.000000e+00> : vector<56x224xf32>
    %27 = tpu.matmul %25, %26, %cst_25 {dimension_numbers = #tpu.dot_dimension_numbers<[1], [0], [0], [1], [0, 0, 1, 1], [], []>} : vector<56x112xf32>, vector<112x224xf32>, vector<56x224xf32> -> vector<56x224xf32>
    %28 = arith.addf %24, %27 : vector<56x224xf32>
    %c0_26 = arith.constant 0 : index
    %c16 = arith.constant 16 : index
    %29 = vector.load %arg9[%c0_26, %c16] : memref<128x256xf32, #tpu.memory_space<vmem>>, vector<56x112xf32>
    %c224 = arith.constant 224 : index
    %c0_27 = arith.constant 0 : index
    %30 = vector.load %arg4[%c224, %c0_27] : memref<1008x224xf32, #tpu.memory_space<vmem>>, vector<112x224xf32>
    %cst_28 = arith.constant dense<0.000000e+00> : vector<56x224xf32>
    %31 = tpu.matmul %29, %30, %cst_28 {dimension_numbers = #tpu.dot_dimension_numbers<[1], [0], [0], [1], [0, 0, 1, 1], [], []>} : vector<56x112xf32>, vector<112x224xf32>, vector<56x224xf32> -> vector<56x224xf32>
    %32 = arith.addf %28, %31 : vector<56x224xf32>
    %c64 = arith.constant 64 : index
    %c0_29 = arith.constant 0 : index
    %33 = vector.load %arg9[%c64, %c0_29] : memref<128x256xf32, #tpu.memory_space<vmem>>, vector<56x112xf32>
    %c336 = arith.constant 336 : index
    %c0_30 = arith.constant 0 : index
    %34 = vector.load %arg4[%c336, %c0_30] : memref<1008x224xf32, #tpu.memory_space<vmem>>, vector<112x224xf32>
    %cst_31 = arith.constant dense<0.000000e+00> : vector<56x224xf32>
    %35 = tpu.matmul %33, %34, %cst_31 {dimension_numbers = #tpu.dot_dimension_numbers<[1], [0], [0], [1], [0, 0, 1, 1], [], []>} : vector<56x112xf32>, vector<112x224xf32>, vector<56x224xf32> -> vector<56x224xf32>
    %36 = arith.addf %32, %35 : vector<56x224xf32>
    %c64_32 = arith.constant 64 : index
    %c128_33 = arith.constant 128 : index
    %37 = vector.load %arg9[%c64_32, %c128_33] : memref<128x256xf32, #tpu.memory_space<vmem>>, vector<56x112xf32>
    %c448 = arith.constant 448 : index
    %c0_34 = arith.constant 0 : index
    %38 = vector.load %arg4[%c448, %c0_34] : memref<1008x224xf32, #tpu.memory_space<vmem>>, vector<112x224xf32>
    %cst_35 = arith.constant dense<0.000000e+00> : vector<56x224xf32>
    %39 = tpu.matmul %37, %38, %cst_35 {dimension_numbers = #tpu.dot_dimension_numbers<[1], [0], [0], [1], [0, 0, 1, 1], [], []>} : vector<56x112xf32>, vector<112x224xf32>, vector<56x224xf32> -> vector<56x224xf32>
    %40 = arith.addf %36, %39 : vector<56x224xf32>
    %c64_36 = arith.constant 64 : index
    %c16_37 = arith.constant 16 : index
    %41 = vector.load %arg9[%c64_36, %c16_37] : memref<128x256xf32, #tpu.memory_space<vmem>>, vector<56x112xf32>
    %c560 = arith.constant 560 : index
    %c0_38 = arith.constant 0 : index
    %42 = vector.load %arg4[%c560, %c0_38] : memref<1008x224xf32, #tpu.memory_space<vmem>>, vector<112x224xf32>
    %cst_39 = arith.constant dense<0.000000e+00> : vector<56x224xf32>
    %43 = tpu.matmul %41, %42, %cst_39 {dimension_numbers = #tpu.dot_dimension_numbers<[1], [0], [0], [1], [0, 0, 1, 1], [], []>} : vector<56x112xf32>, vector<112x224xf32>, vector<56x224xf32> -> vector<56x224xf32>
    %44 = arith.addf %40, %43 : vector<56x224xf32>
    %c8_40 = arith.constant 8 : index
    %c0_41 = arith.constant 0 : index
    %45 = vector.load %arg9[%c8_40, %c0_41] : memref<128x256xf32, #tpu.memory_space<vmem>>, vector<56x112xf32>
    %c672 = arith.constant 672 : index
    %c0_42 = arith.constant 0 : index
    %46 = vector.load %arg4[%c672, %c0_42] : memref<1008x224xf32, #tpu.memory_space<vmem>>, vector<112x224xf32>
    %cst_43 = arith.constant dense<0.000000e+00> : vector<56x224xf32>
    %47 = tpu.matmul %45, %46, %cst_43 {dimension_numbers = #tpu.dot_dimension_numbers<[1], [0], [0], [1], [0, 0, 1, 1], [], []>} : vector<56x112xf32>, vector<112x224xf32>, vector<56x224xf32> -> vector<56x224xf32>
    %48 = arith.addf %44, %47 : vector<56x224xf32>
    %c8_44 = arith.constant 8 : index
    %c128_45 = arith.constant 128 : index
    %49 = vector.load %arg9[%c8_44, %c128_45] : memref<128x256xf32, #tpu.memory_space<vmem>>, vector<56x112xf32>
    %c784 = arith.constant 784 : index
    %c0_46 = arith.constant 0 : index
    %50 = vector.load %arg4[%c784, %c0_46] : memref<1008x224xf32, #tpu.memory_space<vmem>>, vector<112x224xf32>
    %cst_47 = arith.constant dense<0.000000e+00> : vector<56x224xf32>
    %51 = tpu.matmul %49, %50, %cst_47 {dimension_numbers = #tpu.dot_dimension_numbers<[1], [0], [0], [1], [0, 0, 1, 1], [], []>} : vector<56x112xf32>, vector<112x224xf32>, vector<56x224xf32> -> vector<56x224xf32>
    %52 = arith.addf %48, %51 : vector<56x224xf32>
    %c8_48 = arith.constant 8 : index
    %c16_49 = arith.constant 16 : index
    %53 = vector.load %arg9[%c8_48, %c16_49] : memref<128x256xf32, #tpu.memory_space<vmem>>, vector<56x112xf32>
    %c896 = arith.constant 896 : index
    %c0_50 = arith.constant 0 : index
    %54 = vector.load %arg4[%c896, %c0_50] : memref<1008x224xf32, #tpu.memory_space<vmem>>, vector<112x224xf32>
    %cst_51 = arith.constant dense<0.000000e+00> : vector<56x224xf32>
    %55 = tpu.matmul %53, %54, %cst_51 {dimension_numbers = #tpu.dot_dimension_numbers<[1], [0], [0], [1], [0, 0, 1, 1], [], []>} : vector<56x112xf32>, vector<112x224xf32>, vector<56x224xf32> -> vector<56x224xf32>
    %56 = arith.addf %52, %55 : vector<56x224xf32>
    %c0_52 = arith.constant 0 : index
    %c0_53 = arith.constant 0 : index
    %57 = vector.load %arg5[%c0_52, %c0_53] : memref<1x224xf32, #tpu.memory_space<vmem>>, vector<1x224xf32>
    %58 = vector.broadcast %57 : vector<1x224xf32> to vector<56x224xf32>
    %59 = arith.addf %56, %58 : vector<56x224xf32>
    %cst_54 = arith.constant 0.000000e+00 : f32
    %60 = vector.broadcast %cst_54 : f32 to vector<56x224xf32>
    %61 = arith.subf %60, %59 : vector<56x224xf32>
    %62 = math.exp %61 : vector<56x224xf32>
    %cst_55 = arith.constant 1.000000e+00 : f32
    %63 = vector.broadcast %cst_55 : f32 to vector<56x224xf32>
    %64 = arith.addf %63, %62 : vector<56x224xf32>
    %65 = tpu.reciprocal %64 {approx = true} : vector<56x224xf32> -> vector<56x224xf32>
    %cst_56 = arith.constant 0.000000e+00 : f32
    %66 = vector.broadcast %cst_56 : f32 to vector<8x128xf32>
    %67 = vector.extract_strided_slice %65 {offsets = [0, 0], sizes = [8, 224], strides = [1, 1]} : vector<56x224xf32> to vector<8x224xf32>
    %c0_57 = arith.constant 0 : index
    %c0_58 = arith.constant 0 : index
    %68 = vector.load %arg6[%c0_57, %c0_58] : memref<1568x128xf32, #tpu.memory_space<vmem>>, vector<224x128xf32>
    %cst_59 = arith.constant dense<0.000000e+00> : vector<8x128xf32>
    %69 = tpu.matmul %67, %68, %cst_59 {dimension_numbers = #tpu.dot_dimension_numbers<[1], [0], [0], [1], [0, 0, 1, 1], [], []>} : vector<8x224xf32>, vector<224x128xf32>, vector<8x128xf32> -> vector<8x128xf32>
    %70 = arith.addf %66, %69 : vector<8x128xf32>
    %71 = vector.extract_strided_slice %65 {offsets = [8, 0], sizes = [8, 224], strides = [1, 1]} : vector<56x224xf32> to vector<8x224xf32>
    %c224_60 = arith.constant 224 : index
    %c0_61 = arith.constant 0 : index
    %72 = vector.load %arg6[%c224_60, %c0_61] : memref<1568x128xf32, #tpu.memory_space<vmem>>, vector<224x128xf32>
    %cst_62 = arith.constant dense<0.000000e+00> : vector<8x128xf32>
    %73 = tpu.matmul %71, %72, %cst_62 {dimension_numbers = #tpu.dot_dimension_numbers<[1], [0], [0], [1], [0, 0, 1, 1], [], []>} : vector<8x224xf32>, vector<224x128xf32>, vector<8x128xf32> -> vector<8x128xf32>
    %74 = arith.addf %70, %73 : vector<8x128xf32>
    %75 = vector.extract_strided_slice %65 {offsets = [16, 0], sizes = [8, 224], strides = [1, 1]} : vector<56x224xf32> to vector<8x224xf32>
    %c448_63 = arith.constant 448 : index
    %c0_64 = arith.constant 0 : index
    %76 = vector.load %arg6[%c448_63, %c0_64] : memref<1568x128xf32, #tpu.memory_space<vmem>>, vector<224x128xf32>
    %cst_65 = arith.constant dense<0.000000e+00> : vector<8x128xf32>
    %77 = tpu.matmul %75, %76, %cst_65 {dimension_numbers = #tpu.dot_dimension_numbers<[1], [0], [0], [1], [0, 0, 1, 1], [], []>} : vector<8x224xf32>, vector<224x128xf32>, vector<8x128xf32> -> vector<8x128xf32>
    %78 = arith.addf %74, %77 : vector<8x128xf32>
    %79 = vector.extract_strided_slice %65 {offsets = [24, 0], sizes = [8, 224], strides = [1, 1]} : vector<56x224xf32> to vector<8x224xf32>
    %c672_66 = arith.constant 672 : index
    %c0_67 = arith.constant 0 : index
    %80 = vector.load %arg6[%c672_66, %c0_67] : memref<1568x128xf32, #tpu.memory_space<vmem>>, vector<224x128xf32>
    %cst_68 = arith.constant dense<0.000000e+00> : vector<8x128xf32>
    %81 = tpu.matmul %79, %80, %cst_68 {dimension_numbers = #tpu.dot_dimension_numbers<[1], [0], [0], [1], [0, 0, 1, 1], [], []>} : vector<8x224xf32>, vector<224x128xf32>, vector<8x128xf32> -> vector<8x128xf32>
    %82 = arith.addf %78, %81 : vector<8x128xf32>
    %83 = vector.extract_strided_slice %65 {offsets = [32, 0], sizes = [8, 224], strides = [1, 1]} : vector<56x224xf32> to vector<8x224xf32>
    %c896_69 = arith.constant 896 : index
    %c0_70 = arith.constant 0 : index
    %84 = vector.load %arg6[%c896_69, %c0_70] : memref<1568x128xf32, #tpu.memory_space<vmem>>, vector<224x128xf32>
    %cst_71 = arith.constant dense<0.000000e+00> : vector<8x128xf32>
    %85 = tpu.matmul %83, %84, %cst_71 {dimension_numbers = #tpu.dot_dimension_numbers<[1], [0], [0], [1], [0, 0, 1, 1], [], []>} : vector<8x224xf32>, vector<224x128xf32>, vector<8x128xf32> -> vector<8x128xf32>
    %86 = arith.addf %82, %85 : vector<8x128xf32>
    %87 = vector.extract_strided_slice %65 {offsets = [40, 0], sizes = [8, 224], strides = [1, 1]} : vector<56x224xf32> to vector<8x224xf32>
    %c1120 = arith.constant 1120 : index
    %c0_72 = arith.constant 0 : index
    %88 = vector.load %arg6[%c1120, %c0_72] : memref<1568x128xf32, #tpu.memory_space<vmem>>, vector<224x128xf32>
    %cst_73 = arith.constant dense<0.000000e+00> : vector<8x128xf32>
    %89 = tpu.matmul %87, %88, %cst_73 {dimension_numbers = #tpu.dot_dimension_numbers<[1], [0], [0], [1], [0, 0, 1, 1], [], []>} : vector<8x224xf32>, vector<224x128xf32>, vector<8x128xf32> -> vector<8x128xf32>
    %90 = arith.addf %86, %89 : vector<8x128xf32>
    %91 = vector.extract_strided_slice %65 {offsets = [48, 0], sizes = [8, 224], strides = [1, 1]} : vector<56x224xf32> to vector<8x224xf32>
    %c1344 = arith.constant 1344 : index
    %c0_74 = arith.constant 0 : index
    %92 = vector.load %arg6[%c1344, %c0_74] : memref<1568x128xf32, #tpu.memory_space<vmem>>, vector<224x128xf32>
    %cst_75 = arith.constant dense<0.000000e+00> : vector<8x128xf32>
    %93 = tpu.matmul %91, %92, %cst_75 {dimension_numbers = #tpu.dot_dimension_numbers<[1], [0], [0], [1], [0, 0, 1, 1], [], []>} : vector<8x224xf32>, vector<224x128xf32>, vector<8x128xf32> -> vector<8x128xf32>
    %94 = arith.addf %90, %93 : vector<8x128xf32>
    %c0_76 = arith.constant 0 : index
    %c0_77 = arith.constant 0 : index
    %95 = vector.load %arg7[%c0_76, %c0_77] : memref<1x128xf32, #tpu.memory_space<vmem>>, vector<1x128xf32>
    %96 = vector.broadcast %95 : vector<1x128xf32> to vector<8x128xf32>
    %97 = arith.addf %94, %96 : vector<8x128xf32>
    %c0_78 = arith.constant 0 : index
    %c0_79 = arith.constant 0 : index
    %98 = vector.load %arg8[%c0_78, %c0_79] : memref<8x128xf32, #tpu.memory_space<vmem>>, vector<8x128xf32>
    tpu.vector_store %arg8[%c0_78, %c0_79], %97 {strides = array<i32>} : memref<8x128xf32, #tpu.memory_space<vmem>>, vector<8x128xf32>,
    return
  }
  func.func @transform_0(%arg0: i32) -> (i32, i32, i32) {
    %c0_i32 = arith.constant 0 : i32
    %c0_i32_0 = arith.constant 0 : i32
    %c0_i32_1 = arith.constant 0 : i32
    return %arg0, %c0_i32, %c0_i32_0 : i32, i32, i32
  }
  func.func @transform_1(%arg0: i32) -> (i32, i32) {
    %c0_i32 = arith.constant 0 : i32
    %c0_i32_0 = arith.constant 0 : i32
    %c0_i32_1 = arith.constant 0 : i32
    return %c0_i32, %c0_i32_0 : i32, i32
  }
  func.func @transform_2(%arg0: i32) -> (i32, i32) {
    %c0_i32 = arith.constant 0 : i32
    %c0_i32_0 = arith.constant 0 : i32
    %c0_i32_1 = arith.constant 0 : i32
    return %c0_i32, %c0_i32_0 : i32, i32
  }
  func.func @transform_3(%arg0: i32) -> (i32, i32) {
    %c0_i32 = arith.constant 0 : i32
    %c0_i32_0 = arith.constant 0 : i32
    %c0_i32_1 = arith.constant 0 : i32
    return %c0_i32, %c0_i32_0 : i32, i32
  }
  func.func @transform_4(%arg0: i32) -> (i32, i32) {
    %c0_i32 = arith.constant 0 : i32
    %c0_i32_0 = arith.constant 0 : i32
    %c0_i32_1 = arith.constant 0 : i32
    return %c0_i32, %c0_i32_0 : i32, i32
  }
  func.func @transform_5(%arg0: i32) -> (i32, i32) {
    %c0_i32 = arith.constant 0 : i32
    %c0_i32_0 = arith.constant 0 : i32
    %c0_i32_1 = arith.constant 0 : i32
    return %c0_i32, %c0_i32_0 : i32, i32
  }
  func.func @transform_6(%arg0: i32) -> (i32, i32) {
    %c0_i32 = arith.constant 0 : i32
    %c0_i32_0 = arith.constant 0 : i32
    %c0_i32_1 = arith.constant 0 : i32
    return %c0_i32, %c0_i32_0 : i32, i32
  }
  func.func @transform_7(%arg0: i32) -> (i32, i32) {
    %c0_i32 = arith.constant 0 : i32
    %c0_i32_0 = arith.constant 0 : i32
    return %arg0, %c0_i32 : i32, i32
  }
}

</mosaic_0001>

<bundles_post_ra>
// kernel: model1_forward.1
= control target key start
LH: loop header
LB: loop body
LE: loop exit
PB: predicated region body
PF: predicated region fallthrough
CT: control target
= control target key end

     0   :  { %12 = vsyncpa [#allocation4], 0  ;;  %s5357_s0 = inlined_call_operand.vmem [shape: f32[2,112,126], index: 0, kind: input, shape index: {}]   ;;  %s5358_s1 = inlined_call_operand.vmem [shape: f32[126,256], index: 1, kind: input, shape index: {}]   ;;  %s5359_s2 = inlined_call_operand.vmem [shape: f32[1,256], index: 2, kind: input, shape index: {}]   ;;  %s5360_s3 = inlined_call_operand.vmem [shape: f32[1008,224], index: 3, kind: input, shape index: {}]   ;;  %s5361_s4 = inlined_call_operand.vmem [shape: f32[1,224], index: 4, kind: input, shape index: {}]   ;;  %s5362_s5 = inlined_call_operand.vmem [shape: f32[1568,128], index: 5, kind: input, shape index: {}]   ;;  %s5363_s6 = inlined_call_operand.vmem [shape: f32[1,128], index: 6, kind: input, shape index: {}]   ;;  %s5364_s7 = inlined_call_operand.hbm [shape: f32[16,128], index: 7, kind: output, shape index: {}]  }
   0x1   :  { %14 = vsyncpa [#allocation4 + $0x1], 0  ;;  %s3173_s24 = smov 0   ;;  %s3175_s25 = smov 0  }
   0x2   :  { %s3177_s26 = smov 0   ;;  %s3179_s27 = smov 0  }
   0x3 LB: > { %s3194_s28 = sadd.s32 4294967295, %s3129_s27   ;;  %s2664_s29 = sadd.s32 4294967294, %s3129_s27   ;;  %s3129_s27 = sphi %s3179_s27, %s5370_s27   ;;  %s3125_s26 = sphi %s3177_s26, %s5369_s26   ;;  %s3121_s25 = sphi %s3175_s25, %s5368_s25   ;;  %s3117_s24 = sphi %s3173_s24, %s5367_s24  }
   0x4   : > { %s3198_s30 = sadd.s32 1, %s3129_s27   ;;  %s179_s8 = sadd.s32 1, %s3125_s26 }
   0x5   : > { %s176_s9 = ssub.s32 %s3129_s27, %s3198_s30  ;;  %p189_p0 = scmp.ne.s32.totalorder %s3125_s26, %s3121_s25 }
   0x6   : > { %p177_p1 = scmp.eq.s32.totalorder %s176_s9, 0  ;;  %p190_p2 = scmp.eq.s32.totalorder %s3194_s28, 1 }
   0x7   : > { %p195_p3 = scmp.ne.s32.totalorder %s3121_s25, %s3117_s24  ;;  %p196_p4 = scmp.eq.s32.totalorder %s2664_s29, 1 }
   0x8   : > { %s3209_s10 = scalar_select %p177_p1, %s3125_s26, %s179_s8  }
   0x9   : > { %p3211_p5 = por %p190_p2, %p189_p0  ;;  %p3215_p6 = por %p196_p4, %p195_p3 }
   0xa   : > { %p2667_p7 = scmp.ge.s32.totalorder %s3129_s27, 1  ;;  %p240_p8 = scmp.lt.s32.totalorder %s3129_s27, 3 }
   0xc   : > { %p241_p9 = pnand %p2667_p7, %p240_p8 }
   0xd   : > { %p272_p10 = scmp.lt.s32.totalorder (!%p241_p9), %s3194_s28, 1  ;;  %s3132_s8 = smov (!%p241_p9), 112  }
   0xe   : > { %244 = sbr.rel (%p241_p9) target bundleno = 859 (0x35b), region = 48  ;;  %s269_s17 = sand.u32 (!%p241_p9), 1, %s3121_s25  }
   0xf   : > { %s2668_s18 = sshll.u32 (!%p241_p9), %s269_s17, 3  ;;  %s2834_s19 = sshll.u32 (!%p241_p9), %s3194_s28, 3 }
  0x10   : > { %s2600_s22 = scalar_lea.hbm (!%p241_p9), %s5364_s7, %s2834_s19 }
  0x11   : > { %s2604_s13 = sshll.u32 (!%p241_p9), %s2600_s22, 4  ;;  %s2605_s13 = int_to_ptr.hbm [resolvable:$true] %s2604_s13 }
  0x13   : > { %v321_v0 = vld [vmem:[%s5358_s1 + $0xf0] sm:$0x3f]  ;;  %vm372_vm0 = vcmask 1045504   ;;  %v322_v1 = vld [vmem:[%s5358_s1 + $0xf8] sm:$0x3f]  ;;  %v319_v2 = vld [vmem:[%s5358_s1 + $0xe0] sm:$0xff] }
  0x14   : > { %2670 = vmatpush.msk.msra.mxu0 %vm372_vm0, %v321_v0  ;;  %2685 = vmatpush.msk.msra.mxu1 %vm372_vm0, %v322_v1  ;;  %v320_v3 = vld [vmem:[%s5358_s1 + $0xe8] sm:$0xff]  ;;  %v317_v4 = vld [vmem:[%s5358_s1 + $0xd0] sm:$0xff]  ;;  %v318_v5 = vld [vmem:[%s5358_s1 + $0xd8] sm:$0xff]  ;;  %s273_s15 = scalar_select %p272_p10, %s3194_s28, 1  ;;  %vm329_vm1 = vcmask 1031168   ;;  %vm669_vm2 = vcmask 130048  }
  0x15   : > { %v315_v6 = vld [vmem:[%s5358_s1 + $0xc0] sm:$0xff]  ;;  %v316_v7 = vld [vmem:[%s5358_s1 + $0xc8] sm:$0xff]  ;;  %v313_v8 = vld [vmem:[%s5358_s1 + $0xb0] sm:$0xff]  ;;  %v3131_v62 = vmov 0.0   ;;  %vm686_vm3 = vcmask 1048448   ;;  %vm773_vm4 = vcmask 916480  }
  0x16   : > { %380 = vmatpush.msra.mxu0 %v319_v2  ;;  %439 = vmatpush.msra.mxu1 %v320_v3  ;;  %v314_v9 = vld [vmem:[%s5358_s1 + $0xb8] sm:$0xff]  ;;  %v311_v10 = vld [vmem:[%s5358_s1 + $0xa0] sm:$0xff]  ;;  %v312_v11 = vld [vmem:[%s5358_s1 + $0xa8] sm:$0xff]  ;;  %s2851_s29 = smul.u32 112, %s273_s15  ;;  %665 = vst [vmem:[#allocation2] sm:$0xff] %v3131_v62  ;;  %vm2136_vm5 = vcmask 785408  }
  0x17   : > { %v309_v12 = vld [vmem:[%s5358_s1 + $0x90] sm:$0xff]  ;;  %v310_v13 = vld [vmem:[%s5358_s1 + $0x98] sm:$0xff]  ;;  %v307_v14 = vld [vmem:[%s5358_s1 + $0x80] sm:$0xff]  ;;  %666 = vst [vmem:[#allocation2 + $0x8] sm:$0xff] %v3131_v62  ;;  %s2590_s28 = scalar_lea.sflag [#allocation4], %s269_s17  ;;  %s3087_s15 = scalar_lea.hbm %s5364_s7, 16 }
  0x18   : > { %381 = vmatpush.msra.mxu0 %v317_v4  ;;  %440 = vmatpush.msra.mxu1 %v318_v5  ;;  %v308_v15 = vld [vmem:[%s5358_s1 + $0x88] sm:$0xff]  ;;  %v305_v16 = vld [vmem:[%s5358_s1 + $0x70] sm:$0xff]  ;;  %v306_v17 = vld [vmem:[%s5358_s1 + $0x78] sm:$0xff]  ;;  %s3316_s21 = scalar_lea.vmem %s5357_s0, %s2851_s29  ;;  %670 = vst.msk [vmem:[#allocation2] sm:$0xff] %vm669_vm2, %v3131_v62 }
  0x19   : > { %v303_v18 = vld [vmem:[%s5358_s1 + $0x60] sm:$0xff]  ;;  %v304_v19 = vld [vmem:[%s5358_s1 + $0x68] sm:$0xff]  ;;  %v301_v20 = vld [vmem:[%s5358_s1 + $0x50] sm:$0xff]  ;;  %687 = vst.msk [vmem:[#allocation2 + $0x8] sm:$0xff] %vm686_vm3, %v3131_v62 }
  0x1a   : > { %382 = vmatpush.msra.mxu0 %v315_v6  ;;  %441 = vmatpush.msra.mxu1 %v316_v7  ;;  %v302_v21 = vld [vmem:[%s5358_s1 + $0x58] sm:$0xff]  ;;  %v299_v22 = vld [vmem:[%s5358_s1 + $0x40] sm:$0xff]  ;;  %v300_v23 = vld [vmem:[%s5358_s1 + $0x48] sm:$0xff] }
  0x1b   : > { %v297_v24 = vld [vmem:[%s5358_s1 + $0x30] sm:$0xff]  ;;  %v298_v25 = vld [vmem:[%s5358_s1 + $0x38] sm:$0xff]  ;;  %v295_v26 = vld [vmem:[%s5358_s1 + $0x20] sm:$0xff] }
  0x1c   : > { %383 = vmatpush.msra.mxu0 %v313_v8  ;;  %442 = vmatpush.msra.mxu1 %v314_v9  ;;  %v296_v27 = vld [vmem:[%s5358_s1 + $0x28] sm:$0xff]  ;;  %v293_v28 = vld [vmem:[%s5358_s1 + $0x10] sm:$0xff]  ;;  %v294_v29 = vld [vmem:[%s5358_s1 + $0x18] sm:$0xff] }
  0x1d   : > { %v291_v30 = vld [vmem:[%s5358_s1] sm:$0xff]  ;;  %v292_v31 = vld [vmem:[%s5358_s1 + $0x8] sm:$0xff]  ;;  %v279_v34 = vld [vmem:[%s3316_s21 + $0x10] sm:$0xff] }
  0x1e   : > { %384 = vmatpush.msra.mxu0 %v311_v10  ;;  %443 = vmatpush.msra.mxu1 %v312_v11  ;;  %v277_v32 = vld [vmem:[%s3316_s21] sm:$0xff]  ;;  %v278_v33 = vld [vmem:[%s3316_s21 + $0x8] sm:$0xff]  ;;  %v280_v35 = vld [vmem:[%s3316_s21 + $0x18] sm:$0xff] }
  0x1f   : > { %v281_v36 = vld [vmem:[%s3316_s21 + $0x20] sm:$0xff]  ;;  %v282_v37 = vld [vmem:[%s3316_s21 + $0x28] sm:$0xff]  ;;  %v283_v38 = vld [vmem:[%s3316_s21 + $0x30] sm:$0xff] }
  0x20   : > { %385 = vmatpush.msra.mxu0 %v309_v12  ;;  %444 = vmatpush.msra.mxu1 %v310_v13  ;;  %v284_v39 = vld [vmem:[%s3316_s21 + $0x38] sm:$0xff]  ;;  %v285_v40 = vld [vmem:[%s3316_s21 + $0x40] sm:$0xff]  ;;  %v286_v41 = vld [vmem:[%s3316_s21 + $0x48] sm:$0xff] }
  0x21   : > { %v771_v42 = vld [vmem:[%s5360_s3 + $0x1b0] sm:$0xff]  ;;  %v772_v43 = vld [vmem:[%s5360_s3 + $0x1b8] sm:$0xff]  ;;  %v769_v44 = vld [vmem:[%s5360_s3 + $0x1a0] sm:$0xff] }
  0x22   : > { %386 = vmatpush.msra.mxu0 %v307_v14  ;;  %445 = vmatpush.msra.mxu1 %v308_v15  ;;  %v770_v45 = vld [vmem:[%s5360_s3 + $0x1a8] sm:$0xff]  ;;  %v287_v46 = vld [vmem:[%s3316_s21 + $0x50] sm:$0xff]  ;;  %v288_v47 = vld [vmem:[%s3316_s21 + $0x58] sm:$0xff] }
  0x23   : > { %797 = vmatpush.msra.mxu2 %v771_v42  ;;  %835 = vmatpush.msra.mxu3 %v772_v43  ;;  %v289_v48 = vld [vmem:[%s3316_s21 + $0x60] sm:$0xff]  ;;  %v767_v49 = vld [vmem:[%s5360_s3 + $0x190] sm:$0xff]  ;;  %v768_v50 = vld [vmem:[%s5360_s3 + $0x198] sm:$0xff] }
  0x24   : > { %387 = vmatpush.msra.mxu0 %v305_v16  ;;  %446 = vmatpush.msra.mxu1 %v306_v17  ;;  %v765_v51 = vld [vmem:[%s5360_s3 + $0x180] sm:$0xff]  ;;  %v766_v52 = vld [vmem:[%s5360_s3 + $0x188] sm:$0xff]  ;;  %v763_v53 = vld [vmem:[%s5360_s3 + $0x170] sm:$0xff] }
  0x25   : > { %798 = vmatpush.msra.mxu2 %v769_v44  ;;  %836 = vmatpush.msra.mxu3 %v770_v45  ;;  %v764_v54 = vld [vmem:[%s5360_s3 + $0x178] sm:$0xff]  ;;  %v290_v55 = vld [vmem:[%s3316_s21 + $0x68] sm:$0xff]  ;;  %v761_v56 = vld [vmem:[%s5360_s3 + $0x160] sm:$0xff]  ;;  %s3081_s21 = sshra.s32 %s2605_s13, 4  ;;  %s3082_s21 = int_to_ptr.hbm [resolvable:$true] %s3081_s21 }
  0x26   : > { %388 = vmatpush.msra.mxu0 %v303_v18  ;;  %447 = vmatpush.msra.mxu1 %v304_v19  ;;  %v762_v57 = vld [vmem:[%s5360_s3 + $0x168] sm:$0xff]  ;;  %v759_v58 = vld [vmem:[%s5360_s3 + $0x150] sm:$0xff]  ;;  %v760_v59 = vld [vmem:[%s5360_s3 + $0x158] sm:$0xff]  ;;  %s3083_s14 = scalar_lea.hbm %s3082_s21, 8  ;;  %p3088_p0 = scmp.lt.s32.totalorder %s3082_s21, %s5364_s7 }
  0x27   : > { %799 = vmatpush.msra.mxu2 %v767_v49  ;;  %837 = vmatpush.msra.mxu3 %v768_v50  ;;  %v757_v60 = vld [vmem:[%s5360_s3 + $0x140] sm:$0xff]  ;;  %v758_v61 = vld [vmem:[%s5360_s3 + $0x148] sm:$0xff]  ;;  %v755_v63 = vld [vmem:[%s5360_s3 + $0x130] sm:$0xff]  ;;  %p3084_p11 = scmp.ne.s32.totalorder %s3082_s21, %s3083_s14  ;;  %p3089_p1 = scmp.lt.s32.totalorder %s3087_s15, %s3083_s14 }
  0x28   : > { %389 = vmatpush.msra.mxu0 %v301_v20  ;;  %448 = vmatpush.msra.mxu1 %v302_v21  ;;  %v756_v0 = vld [vmem:[%s5360_s3 + $0x138] sm:$0xff]  ;;  %v753_v1 = vld [vmem:[%s5360_s3 + $0x120] sm:$0xff]  ;;  %v754_v2 = vld [vmem:[%s5360_s3 + $0x128] sm:$0xff] }
  0x29   : > { %800 = vmatpush.msra.mxu2 %v765_v51  ;;  %838 = vmatpush.msra.mxu3 %v766_v52  ;;  %v751_v3 = vld [vmem:[%s5360_s3 + $0x110] sm:$0xff]  ;;  %v752_v4 = vld [vmem:[%s5360_s3 + $0x118] sm:$0xff]  ;;  %v749_v5 = vld [vmem:[%s5360_s3 + $0x100] sm:$0xff]  ;;  %p3085_p12 = pnand %p3084_p11, %p3211_p5  ;;  %p3090_p2 = por %p3089_p1, %p3088_p0 }
  0x2a   : > { %390 = vmatpush.msra.mxu0 %v299_v22  ;;  %449 = vmatpush.msra.mxu1 %v300_v23  ;;  %v750_v6 = vld [vmem:[%s5360_s3 + $0x108] sm:$0xff]  ;;  %v747_v7 = vld [vmem:[%s5360_s3 + $0xf0] sm:$0xff]  ;;  %v748_v8 = vld [vmem:[%s5360_s3 + $0xf8] sm:$0xff] }
  0x2b   : > { %801 = vmatpush.msra.mxu2 %v763_v53  ;;  %839 = vmatpush.msra.mxu3 %v764_v54  ;;  %v3450_v9 = vld [vmem:[#allocation2] sm:$0xff]  ;;  %v746_v11 = vld [vmem:[%s5360_s3 + $0xe8] sm:$0xff]  ;;  %v737_v49 = vld [vmem:[%s5360_s3 + $0xd8] sm:$0xff]  ;;  %p3086_p13 = pneg %p3085_p12 }
  0x2c   : > { %391 = vmatpush.msra.mxu0 %v297_v24  ;;  %450 = vmatpush.msra.mxu1 %v298_v25  ;;  %v745_v10 = vld [vmem:[%s5360_s3 + $0xe0] sm:$0xff]  ;;  %v738_v13 = vld [vmem:[#allocation2 + $0x8] sm:$0xff] }
  0x2d   : > { %802 = vmatpush.msra.mxu2 %v761_v56  ;;  %840 = vmatpush.msra.mxu3 %v762_v57  ;;  %v323_v12 = vld [vmem:[%s5359_s2] sm:$0x3]  ;;  %v735_v57 = vld [vmem:[%s5360_s3 + $0xc8] sm:$0xff]  ;;  %p3091_p3 = pnand %p3090_p2, %p3086_p13 }
  0x2e   : > { %392 = vmatpush.msra.mxu0 %v295_v26  ;;  %451 = vmatpush.msra.mxu1 %v296_v27  ;;  %v3465_v14 = vperm.slane %v323_v12, 0  ;;  %v3467_v15 = vperm.slane %v323_v12, 1  ;;  %v734_v56 = vld [vmem:[%s5360_s3 + $0xc0] sm:$0xff] }
  0x2f   : > { %803 = vmatpush.msra.mxu2 %v759_v58  ;;  %841 = vmatpush.msra.mxu3 %v760_v59 }
  0x30   : > { %393 = vmatpush.msra.mxu0 %v293_v28  ;;  %452 = vmatpush.msra.mxu1 %v294_v29 }
  0x31   : > { %804 = vmatpush.msra.mxu2 %v757_v60  ;;  %842 = vmatpush.msra.mxu3 %v758_v61  ;;  %v732_v60 = vld [vmem:[%s5360_s3 + $0xb0] sm:$0xff]  ;;  %v733_v61 = vld [vmem:[%s5360_s3 + $0xb8] sm:$0xff] }
  0x32   : > { %394 = vmatpush.msra.mxu0 %v291_v30  ;;  %453 = vmatpush.msra.mxu1 %v292_v31 }
  0x33   : > { %2671 = vmatmul.msk.f32.vlgmr.msra.gmra.mxu0 %vm329_vm1, %v277_v32  ;;  %2686 = vmatmul.msk.f32.vlgmr.msra.gmra.mxu1 %vm329_vm1, %v277_v32 }
  0x34   : > { %805 = vmatpush.msra.mxu2 %v755_v63  ;;  %843 = vmatpush.msra.mxu3 %v756_v0 }
  0x35   : > { %996 = vrot.lane.b32.xlu0 %v3450_v9, %s3132_s8 }
  0x36   : > { %806 = vmatpush.msra.mxu2 %v753_v1  ;;  %844 = vmatpush.msra.mxu3 %v754_v2  ;;  %v730_v2 = vld [vmem:[%s5360_s3 + $0xa0] sm:$0xff] }
  0x38   : > { %807 = vmatpush.msra.mxu2 %v751_v3  ;;  %845 = vmatpush.msra.mxu3 %v752_v4  ;;  %v731_v3 = vld [vmem:[%s5360_s3 + $0xa8] sm:$0xff] }
  0x3a   : > { %808 = vmatpush.msra.mxu2 %v749_v5  ;;  %846 = vmatpush.msra.mxu3 %v750_v6 }
  0x3b   : > { %2672 = vmatmul.msk.f32.gmra.mxu0 %vm329_vm1, %v278_v33  ;;  %2687 = vmatmul.msk.f32.gmra.mxu1 %vm329_vm1, %v278_v33 }
  0x3c   : > { %809 = vmatpush.msra.mxu2 %v747_v7  ;;  %847 = vmatpush.msra.mxu3 %v748_v8  ;;  %v728_v8 = vld [vmem:[%s5360_s3 + $0x90] sm:$0xff] }
  0x3e   : > { %810 = vmatpush.msra.mxu2 %v745_v10  ;;  %848 = vmatpush.msra.mxu3 %v746_v11  ;;  %v729_v10 = vld [vmem:[%s5360_s3 + $0x98] sm:$0xff] }
  0x3f   : > { %2700 = vmatmul.msk.f32.vlgmr.msra.gmra.mxu2 %vm773_vm4, %v738_v13  ;;  %2707 = vmatmul.msk.f32.vlgmr.msra.gmra.mxu3 %vm773_vm4, %v738_v13 }
  0x40   : > { %932 = vmatpush.msrb.mxu3 %v737_v49  ;;  %v717_v49 = vld [vmem:[%s5360_s3 + $0x38] sm:$0xff] }
  0x42   : > { %933 = vmatpush.msrb.mxu3 %v735_v57 }
  0x43   : > { %2673 = vmatmul.msk.f32.gmra.mxu0 %vm329_vm1, %v279_v34  ;;  %2688 = vmatmul.msk.f32.gmra.mxu1 %vm329_vm1, %v279_v34 }
  0x44   : > { %934 = vmatpush.msrb.mxu3 %v733_v61 }
  0x46   : > { %935 = vmatpush.msrb.mxu3 %v731_v3  ;;  %v713_v3 = vld [vmem:[%s5360_s3 + $0x18] sm:$0xff] }
  0x48   : > { %936 = vmatpush.msrb.mxu3 %v729_v10 }
  0x4b   : > { %2674 = vmatmul.msk.f32.gmra.mxu0 %vm329_vm1, %v280_v35  ;;  %2689 = vmatmul.msk.f32.gmra.mxu1 %vm329_vm1, %v280_v35 }
  0x53   : > { %2675 = vmatmul.msk.f32.gmra.mxu0 %vm329_vm1, %v281_v36  ;;  %2690 = vmatmul.msk.f32.gmra.mxu1 %vm329_vm1, %v281_v36 }
  0x5b   : > { %2676 = vmatmul.msk.f32.gmra.mxu0 %vm329_vm1, %v282_v37  ;;  %2691 = vmatmul.msk.f32.gmra.mxu1 %vm329_vm1, %v282_v37 }
  0x63   : > { %2677 = vmatmul.msk.f32.gmra.mxu0 %vm329_vm1, %v283_v38  ;;  %2692 = vmatmul.msk.f32.gmra.mxu1 %vm329_vm1, %v283_v38 }
  0x6b   : > { %2678 = vmatmul.msk.f32.gmra.mxu0 %vm329_vm1, %v284_v39  ;;  %2693 = vmatmul.msk.f32.gmra.mxu1 %vm329_vm1, %v284_v39 }
  0x73   : > { %2679 = vmatmul.msk.f32.gmra.mxu0 %vm329_vm1, %v285_v40  ;;  %2694 = vmatmul.msk.f32.gmra.mxu1 %vm329_vm1, %v285_v40 }
  0x7b   : > { %2680 = vmatmul.msk.f32.gmra.mxu0 %vm329_vm1, %v286_v41  ;;  %2695 = vmatmul.msk.f32.gmra.mxu1 %vm329_vm1, %v286_v41 }
  0x83   : > { %2681 = vmatmul.msk.f32.gmra.mxu0 %vm329_vm1, %v287_v46  ;;  %2696 = vmatmul.msk.f32.gmra.mxu1 %vm329_vm1, %v287_v46 }
  0x8b   : > { %2682 = vmatmul.msk.f32.gmra.mxu0 %vm329_vm1, %v288_v47  ;;  %2697 = vmatmul.msk.f32.gmra.mxu1 %vm329_vm1, %v288_v47 }
  0x93   : > { %2683 = vmatmul.msk.f32.gmra.mxu0 %vm329_vm1, %v289_v48  ;;  %2698 = vmatmul.msk.f32.gmra.mxu1 %vm329_vm1, %v289_v48  ;;  %v736_v48 = vld [vmem:[%s5360_s3 + $0xd0] sm:$0xff] }
  0x94   : > { %894 = vmatpush.msrb.mxu2 %v736_v48  ;;  %v716_v48 = vld [vmem:[%s5360_s3 + $0x30] sm:$0xff] }
  0x96   : > { %895 = vmatpush.msrb.mxu2 %v734_v56  ;;  %v715_v56 = vld [vmem:[%s5360_s3 + $0x28] sm:$0xff] }
  0x98   : > { %896 = vmatpush.msrb.mxu2 %v732_v60 }
  0x9a   : > { %897 = vmatpush.msrb.mxu2 %v730_v2 }
  0x9b   : > { %2684 = vmatmul.msk.f32.gmra.mxu0 %vm329_vm1, %v290_v55  ;;  %2699 = vmatmul.msk.f32.gmra.mxu1 %vm329_vm1, %v290_v55 }
  0x9c   : > { %898 = vmatpush.msrb.mxu2 %v728_v8 }
  0xb0   : > { %v396_v16 = vpop.f32.mrf.mxu0  ;;  %v455_v17 = vpop.f32.mrf.mxu1 }
  0xb1   : > { %v397_v18 = vadd.f32 %v396_v16, %v3465_v14  ;;  %v456_v19 = vadd.f32 %v455_v17, %v3467_v15 }
  0xb3   : > { %v497_v20 = vsub.f32 0.0, %v397_v18  ;;  %v498_v21 = vsub.f32 0.0, %v456_v19 }
  0xb5   : > { %v525_v22 = vmul.f32 1.442695, %v497_v20  ;;  %v527_v23 = vmul.f32 1.442695, %v498_v21  ;;  %v726_v20 = vld [vmem:[%s5360_s3 + $0x80] sm:$0xff]  ;;  %v727_v21 = vld [vmem:[%s5360_s3 + $0x88] sm:$0xff] }
  0xb6   : > { %899 = vmatpush.msrb.mxu2 %v726_v20  ;;  %937 = vmatpush.msrb.mxu3 %v727_v21  ;;  %v1146_v20 = vld [vmem:[%s5360_s3 + $0x368] sm:$0xff] }
  0xb7   : > { %2894 = vpow2.f32 %v525_v22 }
  0xb8   : > { %2896 = vpow2.f32 %v527_v23  ;;  %v399_v24 = vpop.f32.mrf.mxu0  ;;  %v458_v25 = vpop.f32.mrf.mxu1 }
  0xb9   : > { %v400_v26 = vadd.f32 %v399_v24, %v3465_v14  ;;  %v459_v27 = vadd.f32 %v458_v25, %v3467_v15  ;;  %v724_v24 = vld [vmem:[%s5360_s3 + $0x70] sm:$0xff]  ;;  %v725_v25 = vld [vmem:[%s5360_s3 + $0x78] sm:$0xff] }
  0xba   : > { %900 = vmatpush.msrb.mxu2 %v724_v24  ;;  %938 = vmatpush.msrb.mxu3 %v725_v25 }
  0xbb   : > { %v499_v28 = vsub.f32 0.0, %v400_v26  ;;  %v500_v29 = vsub.f32 0.0, %v459_v27 }
  0xbd   : > { %v2895_v30 = vpop.eup %2894  ;;  %v529_v31 = vmul.f32 1.442695, %v499_v28  ;;  %v531_v34 = vmul.f32 1.442695, %v500_v29  ;;  %v722_v29 = vld [vmem:[%s5360_s3 + $0x60] sm:$0xff] }
  0xbe   : > { %v2897_v32 = vpop.eup %2896  ;;  %v581_v33 = vadd.f32 1.0, %v2895_v30  ;;  %v723_v30 = vld [vmem:[%s5360_s3 + $0x68] sm:$0xff]  ;;  %901 = vmatpush.msrb.mxu2 %v722_v29 }
  0xbf   : > { %v582_v35 = vadd.f32 1.0, %v2897_v32  ;;  %2898 = vpow2.f32 %v529_v31  ;;  %939 = vmatpush.msrb.mxu3 %v723_v30 }
  0xc0   : > { %2900 = vrcp.f32 %v581_v33  ;;  %v402_v36 = vpop.f32.mrf.mxu0  ;;  %v461_v37 = vpop.f32.mrf.mxu1 }
  0xc1   : > { %2902 = vrcp.f32 %v582_v35  ;;  %v403_v38 = vadd.f32 %v402_v36, %v3465_v14  ;;  %v462_v39 = vadd.f32 %v461_v37, %v3467_v15  ;;  %v720_v35 = vld [vmem:[%s5360_s3 + $0x50] sm:$0xff]  ;;  %v721_v36 = vld [vmem:[%s5360_s3 + $0x58] sm:$0xff] }
  0xc2   : > { %2904 = vpow2.f32 %v531_v34  ;;  %902 = vmatpush.msrb.mxu2 %v720_v35  ;;  %940 = vmatpush.msrb.mxu3 %v721_v36 }
  0xc3   : > { %v501_v40 = vsub.f32 0.0, %v403_v38  ;;  %v502_v41 = vsub.f32 0.0, %v462_v39 }
  0xc5   : > { %v2899_v42 = vpop.eup %2898  ;;  %v533_v43 = vmul.f32 1.442695, %v501_v40  ;;  %v535_v44 = vmul.f32 1.442695, %v502_v41 }
  0xc6   : > { %v2901_v45 = vpop.eup %2900  ;;  %v583_v46 = vadd.f32 1.0, %v2899_v42 }
  0xc7   : > { %v2903_v47 = vpop.eup %2902  ;;  %637 = vst [vmem:[#allocation2 + $0x10] sm:$0xff] %v2901_v45  ;;  %2906 = vpow2.f32 %v533_v43  ;;  %v718_v43 = vld [vmem:[%s5360_s3 + $0x40] sm:$0xff] }
  0xc8   : > { %v2905_v50 = vpop.eup %2904  ;;  %671 = vst.msk [vmem:[#allocation2 + $0x10] sm:$0xff] %vm669_vm2, %v3131_v62  ;;  %2908 = vrcp.f32 %v583_v46  ;;  %v405_v51 = vpop.f32.mrf.mxu0  ;;  %903 = vmatpush.msrb.mxu2 %v718_v43 }
  0xc9   : > { %v464_v52 = vpop.f32.mrf.mxu1  ;;  %638 = vst [vmem:[#allocation2 + $0x18] sm:$0xff] %v2903_v47  ;;  %v584_v53 = vadd.f32 1.0, %v2905_v50  ;;  %2910 = vpow2.f32 %v535_v44  ;;  %v406_v54 = vadd.f32 %v405_v51, %v3465_v14  ;;  %v719_v44 = vld [vmem:[%s5360_s3 + $0x48] sm:$0xff] }
  0xca   : > { %v465_v55 = vadd.f32 %v464_v52, %v3467_v15  ;;  %688 = vst.msk [vmem:[#allocation2 + $0x18] sm:$0xff] %vm686_vm3, %v3131_v62  ;;  %941 = vmatpush.msrb.mxu3 %v719_v44  ;;  %904 = vmatpush.msrb.mxu2 %v716_v48 }
  0xcb   : > { %2912 = vrcp.f32 %v584_v53  ;;  %v503_v58 = vsub.f32 0.0, %v406_v54  ;;  %v714_v53 = vld [vmem:[%s5360_s3 + $0x20] sm:$0xff] }
  0xcc   : > { %v504_v59 = vsub.f32 0.0, %v465_v55  ;;  %942 = vmatpush.msrb.mxu3 %v717_v49  ;;  %905 = vmatpush.msrb.mxu2 %v714_v53  ;;  %v1140_v53 = vld [vmem:[%s5360_s3 + $0x338] sm:$0xff] }
  0xcd   : > { %v2907_v63 = vpop.eup %2906  ;;  %v537_v0 = vmul.f32 1.442695, %v503_v58 }
  0xce   : > { %v539_v1 = vmul.f32 1.442695, %v504_v59  ;;  %v2909_v4 = vpop.eup %2908  ;;  %v585_v5 = vadd.f32 1.0, %v2907_v63  ;;  %v712_v59 = vld [vmem:[%s5360_s3 + $0x10] sm:$0xff]  ;;  %943 = vmatpush.msrb.mxu3 %v715_v56  ;;  %v993_v56 = vld [vmem:[%s5360_s3 + $0x288] sm:$0xff] }
  0xcf   : > { %v2911_v6 = vpop.eup %2910  ;;  %639 = vst [vmem:[#allocation2 + $0x20] sm:$0xff] %v2909_v4  ;;  %2914 = vpow2.f32 %v537_v0  ;;  %v3505_v7 = vld [vmem:[#allocation2 + $0x10] sm:$0xff]  ;;  %v1148_v0 = vld [vmem:[%s5360_s3 + $0x378] sm:$0xff]  ;;  %v710_v4 = vld [vmem:[%s5360_s3] sm:$0xff]  ;;  %906 = vmatpush.msrb.mxu2 %v712_v59 }
  0xd0   : > { %672 = vst.msk [vmem:[#allocation2 + $0x20] sm:$0xff] %vm669_vm2, %v3131_v62  ;;  %2916 = vrcp.f32 %v585_v5  ;;  %v586_v11 = vadd.f32 1.0, %v2911_v6  ;;  %v408_v12 = vpop.f32.mrf.mxu0  ;;  %998 = vrot.lane.b32.xlu0 %v3505_v7, %s3132_s8  ;;  %1210 = vmatpush.msrb.mxu1 %v1148_v0  ;;  %v711_v6 = vld [vmem:[%s5360_s3 + $0x8] sm:$0xff]  ;;  %v990_v59 = vld [vmem:[%s5360_s3 + $0x270] sm:$0xff]  ;;  %v988_v0 = vld [vmem:[%s5360_s3 + $0x260] sm:$0xff] }
  0xd1   : > { %v467_v13 = vpop.f32.mrf.mxu1  ;;  %v2913_v16 = vpop.eup %2912  ;;  %2918 = vpow2.f32 %v539_v1  ;;  %v409_v17 = vadd.f32 %v408_v12, %v3465_v14  ;;  %v739_v19 = vld [vmem:[#allocation2 + $0x18] sm:$0xff]  ;;  %944 = vmatpush.msrb.mxu3 %v713_v3  ;;  %907 = vmatpush.msrb.mxu2 %v710_v4  ;;  %v1147_v4 = vld [vmem:[%s5360_s3 + $0x370] sm:$0xff] }
  0xd2   : > { %v468_v18 = vadd.f32 %v467_v13, %v3467_v15  ;;  %640 = vst [vmem:[#allocation2 + $0x28] sm:$0xff] %v2913_v16  ;;  %2920 = vrcp.f32 %v586_v11  ;;  %2701 = vmatmul.msk.f32.gmra.mxu2 %vm773_vm4, %v739_v19  ;;  %2708 = vmatmul.msk.f32.gmra.mxu3 %vm773_vm4, %v739_v19 }
  0xd3   : > { %689 = vst.msk [vmem:[#allocation2 + $0x28] sm:$0xff] %vm686_vm3, %v3131_v62  ;;  %v505_v22 = vsub.f32 0.0, %v409_v17  ;;  %945 = vmatpush.msrb.mxu3 %v711_v6  ;;  %1211 = vmatpush.msrb.mxu1 %v1146_v20  ;;  %v983_v20 = vld [vmem:[%s5360_s3 + $0x238] sm:$0xff] }
  0xd4   : > { %v506_v23 = vsub.f32 0.0, %v468_v18  ;;  %1172 = vmatpush.msrb.mxu0 %v1147_v4 }
  0xd5   : > { %v2915_v26 = vpop.eup %2914  ;;  %v541_v27 = vmul.f32 1.442695, %v505_v22 }
  0xd6   : > { %v543_v28 = vmul.f32 1.442695, %v506_v23  ;;  %v2917_v31 = vpop.eup %2916  ;;  %v587_v32 = vadd.f32 1.0, %v2915_v26 }
  0xd7   : > { %v2919_v33 = vpop.eup %2918  ;;  %641 = vst [vmem:[#allocation2 + $0x30] sm:$0xff] %v2917_v31  ;;  %2922 = vpow2.f32 %v541_v27  ;;  %v3541_v34 = vld [vmem:[#allocation2 + $0x20] sm:$0xff]  ;;  %v1144_v31 = vld [vmem:[%s5360_s3 + $0x358] sm:$0xff] }
  0xd8   : > { %v2921_v37 = vpop.eup %2920  ;;  %673 = vst.msk [vmem:[#allocation2 + $0x30] sm:$0xff] %vm669_vm2, %v3131_v62  ;;  %2924 = vrcp.f32 %v587_v32  ;;  %v588_v38 = vadd.f32 1.0, %v2919_v33  ;;  %v411_v39 = vpop.f32.mrf.mxu0  ;;  %1000 = vrot.lane.b32.xlu1 %v3541_v34, %s3132_s8  ;;  %1212 = vmatpush.msrb.mxu1 %v1144_v31 }
  0xd9   : > { %v470_v40 = vpop.f32.mrf.mxu1  ;;  %642 = vst [vmem:[#allocation2 + $0x38] sm:$0xff] %v2921_v37  ;;  %2926 = vpow2.f32 %v543_v28  ;;  %v412_v41 = vadd.f32 %v411_v39, %v3465_v14 }
  0xda   : > { %v471_v42 = vadd.f32 %v470_v40, %v3467_v15  ;;  %690 = vst.msk [vmem:[#allocation2 + $0x38] sm:$0xff] %vm686_vm3, %v3131_v62  ;;  %2928 = vrcp.f32 %v588_v38  ;;  %v740_v45 = vld [vmem:[#allocation2 + $0x28] sm:$0xff] }
  0xdb   : > { %v507_v46 = vsub.f32 0.0, %v412_v41  ;;  %2702 = vmatmul.msk.f32.gmra.mxu2 %vm773_vm4, %v740_v45  ;;  %2709 = vmatmul.msk.f32.gmra.mxu3 %vm773_vm4, %v740_v45 }
  0xdc   : > { %v508_v47 = vsub.f32 0.0, %v471_v42  ;;  %v1142_v42 = vld [vmem:[%s5360_s3 + $0x348] sm:$0xff] }
  0xdd   : > { %v2923_v50 = vpop.eup %2922  ;;  %v545_v51 = vmul.f32 1.442695, %v507_v46  ;;  %1213 = vmatpush.msrb.mxu1 %v1142_v42  ;;  %v1132_v42 = vld [vmem:[%s5360_s3 + $0x2f8] sm:$0xff] }
  0xde   : > { %v547_v52 = vmul.f32 1.442695, %v508_v47  ;;  %v2925_v54 = vpop.eup %2924  ;;  %v589_v55 = vadd.f32 1.0, %v2923_v50  ;;  %v994_v50 = vld [vmem:[%s5360_s3 + $0x290] sm:$0xff] }
  0xdf   : > { %v2927_v57 = vpop.eup %2926  ;;  %643 = vst [vmem:[#allocation2 + $0x40] sm:$0xff] %v2925_v54  ;;  %2930 = vpow2.f32 %v545_v51  ;;  %v3577_v58 = vld [vmem:[#allocation2 + $0x30] sm:$0xff]  ;;  %v995_v51 = vld [vmem:[%s5360_s3 + $0x298] sm:$0xff]  ;;  %1026 = vmatpush.msra.mxu2 %v994_v50  ;;  %1214 = vmatpush.msrb.mxu1 %v1140_v53 }
  0xe0   : > { %v2929_v60 = vpop.eup %2928  ;;  %674 = vst.msk [vmem:[#allocation2 + $0x40] sm:$0xff] %vm669_vm2, %v3131_v62  ;;  %2932 = vrcp.f32 %v589_v55  ;;  %v590_v61 = vadd.f32 1.0, %v2927_v57  ;;  %v414_v63 = vpop.f32.mrf.mxu0  ;;  %1002 = vrot.lane.b32.xlu1 %v3577_v58, %s3132_s8  ;;  %1064 = vmatpush.msra.mxu3 %v995_v51  ;;  %v992_v55 = vld [vmem:[%s5360_s3 + $0x280] sm:$0xff]  ;;  %v1130_v51 = vld [vmem:[%s5360_s3 + $0x2e8] sm:$0xff] }
  0xe1   : > { %644 = vst [vmem:[#allocation2 + $0x48] sm:$0xff] %v2929_v60  ;;  %2934 = vpow2.f32 %v547_v52  ;;  %v415_v1 = vadd.f32 %v414_v63, %v3465_v14  ;;  %v741_v2 = vld [vmem:[#allocation2 + $0x38] sm:$0xff]  ;;  %1027 = vmatpush.msra.mxu2 %v992_v55  ;;  %v1133_v55 = vld [vmem:[%s5360_s3 + $0x300] sm:$0xff] }
  0xe2   : > { %691 = vst.msk [vmem:[#allocation2 + $0x48] sm:$0xff] %vm686_vm3, %v3131_v62  ;;  %2936 = vrcp.f32 %v590_v61  ;;  %1065 = vmatpush.msra.mxu3 %v993_v56  ;;  %v991_v60 = vld [vmem:[%s5360_s3 + $0x278] sm:$0xff] }
  0xe3   : > { %v509_v5 = vsub.f32 0.0, %v415_v1  ;;  %2703 = vmatmul.msk.f32.gmra.mxu2 %vm773_vm4, %v741_v2  ;;  %2710 = vmatmul.msk.f32.gmra.mxu3 %vm773_vm4, %v741_v2 }
  0xe4   : > { %1028 = vmatpush.msra.mxu2 %v990_v59  ;;  %1066 = vmatpush.msra.mxu3 %v991_v60  ;;  %v970_v59 = vld [vmem:[%s5360_s3 + $0x1d0] sm:$0xff]  ;;  %v971_v60 = vld [vmem:[%s5360_s3 + $0x1d8] sm:$0xff] }
  0xe5   : > { %v2931_v8 = vpop.eup %2930  ;;  %v549_v10 = vmul.f32 1.442695, %v509_v5  ;;  %v986_v5 = vld [vmem:[%s5360_s3 + $0x250] sm:$0xff] }
  0xe6   : > { %v2933_v11 = vpop.eup %2932  ;;  %v591_v12 = vadd.f32 1.0, %v2931_v8  ;;  %1029 = vmatpush.msra.mxu2 %v988_v0  ;;  %v1138_v8 = vld [vmem:[%s5360_s3 + $0x328] sm:$0xff] }
  0xe7   : > { %v2935_v13 = vpop.eup %2934  ;;  %645 = vst [vmem:[#allocation2 + $0x50] sm:$0xff] %v2933_v11  ;;  %2938 = vpow2.f32 %v549_v10  ;;  %v3603_v16 = vld [vmem:[#allocation2 + $0x40] sm:$0xff]  ;;  %v987_v10 = vld [vmem:[%s5360_s3 + $0x258] sm:$0xff]  ;;  %1215 = vmatpush.msrb.mxu1 %v1138_v8  ;;  %v969_v0 = vld [vmem:[%s5360_s3 + $0x1c8] sm:$0xff] }
  0xe8   : > { %v2937_v17 = vpop.eup %2936  ;;  %675 = vst.msk [vmem:[#allocation2 + $0x50] sm:$0xff] %vm669_vm2, %v3131_v62  ;;  %2940 = vrcp.f32 %v591_v12  ;;  %v592_v18 = vadd.f32 1.0, %v2935_v13  ;;  %v417_v19 = vpop.f32.mrf.mxu0  ;;  %1004 = vrot.lane.b32.xlu2 %v3603_v16, %s3132_s8  ;;  %1030 = vmatpush.msra.mxu2 %v986_v5  ;;  %v984_v12 = vld [vmem:[%s5360_s3 + $0x240] sm:$0xff]  ;;  %v985_v13 = vld [vmem:[%s5360_s3 + $0x248] sm:$0xff] }
  0xe9   : > { %646 = vst [vmem:[#allocation2 + $0x58] sm:$0xff] %v2937_v17  ;;  %v418_v21 = vadd.f32 %v417_v19, %v3465_v14  ;;  %v742_v22 = vld [vmem:[#allocation2 + $0x48] sm:$0xff]  ;;  %v1145_v17 = vld [vmem:[%s5360_s3 + $0x360] sm:$0xff]  ;;  %v982_v19 = vld [vmem:[%s5360_s3 + $0x230] sm:$0xff] }
  0xea   : > { %692 = vst.msk [vmem:[#allocation2 + $0x58] sm:$0xff] %vm686_vm3, %v3131_v62  ;;  %2942 = vrcp.f32 %v592_v18  ;;  %1173 = vmatpush.msrb.mxu0 %v1145_v17  ;;  %1031 = vmatpush.msra.mxu2 %v984_v12  ;;  %v1122_v17 = vld [vmem:[%s5360_s3 + $0x2a8] sm:$0xff] }
  0xeb   : > { %v511_v23 = vsub.f32 0.0, %v418_v21  ;;  %2704 = vmatmul.msk.f32.gmra.mxu2 %vm773_vm4, %v742_v22  ;;  %2711 = vmatmul.msk.f32.gmra.mxu3 %vm773_vm4, %v742_v22  ;;  %v1143_v21 = vld [vmem:[%s5360_s3 + $0x350] sm:$0xff] }
  0xec   : > { %1174 = vmatpush.msrb.mxu0 %v1143_v21  ;;  %1032 = vmatpush.msra.mxu2 %v982_v19 }
  0xed   : > { %v2939_v24 = vpop.eup %2938  ;;  %v553_v25 = vmul.f32 1.442695, %v511_v23 }
  0xee   : > { %v2941_v26 = vpop.eup %2940  ;;  %v593_v27 = vadd.f32 1.0, %v2939_v24  ;;  %v1141_v24 = vld [vmem:[%s5360_s3 + $0x340] sm:$0xff] }
  0xef   : > { %647 = vst [vmem:[#allocation2 + $0x60] sm:$0xff] %v2941_v26  ;;  %2944 = vpow2.f32 %v553_v25  ;;  %v3617_v28 = vld [vmem:[#allocation2 + $0x50] sm:$0xff]  ;;  %1175 = vmatpush.msrb.mxu0 %v1141_v24 }
  0xf0   : > { %v2943_v29 = vpop.eup %2942  ;;  %676 = vst.msk [vmem:[#allocation2 + $0x60] sm:$0xff] %vm669_vm2, %v3131_v62  ;;  %2946 = vrcp.f32 %v593_v27  ;;  %v420_v30 = vpop.f32.mrf.mxu0  ;;  %1006 = vrot.lane.b32.xlu2 %v3617_v28, %s3132_s8  ;;  %v981_v27 = vld [vmem:[%s5360_s3 + $0x228] sm:$0xff] }
  0xf1   : > { %648 = vst [vmem:[#allocation2 + $0x68] sm:$0xff] %v2943_v29  ;;  %v421_v32 = vadd.f32 %v420_v30, %v3465_v14  ;;  %v743_v33 = vld [vmem:[#allocation2 + $0x58] sm:$0xff]  ;;  %v978_v30 = vld [vmem:[%s5360_s3 + $0x210] sm:$0xff] }
  0xf2   : > { %693 = vst.msk [vmem:[#allocation2 + $0x68] sm:$0xff] %vm686_vm3, %v3131_v62 }
  0xf3   : > { %v513_v35 = vsub.f32 0.0, %v421_v32  ;;  %2705 = vmatmul.msk.f32.gmra.mxu2 %vm773_vm4, %v743_v33  ;;  %2712 = vmatmul.msk.f32.gmra.mxu3 %vm773_vm4, %v743_v33  ;;  %v1136_v32 = vld [vmem:[%s5360_s3 + $0x318] sm:$0xff] }
  0xf4   : > { %1216 = vmatpush.msrb.mxu1 %v1136_v32 }
  0xf5   : > { %v2945_v36 = vpop.eup %2944  ;;  %v557_v37 = vmul.f32 1.442695, %v513_v35  ;;  %v1134_v35 = vld [vmem:[%s5360_s3 + $0x308] sm:$0xff] }
  0xf6   : > { %v2947_v38 = vpop.eup %2946  ;;  %v595_v39 = vadd.f32 1.0, %v2945_v36  ;;  %v979_v36 = vld [vmem:[%s5360_s3 + $0x218] sm:$0xff]  ;;  %1217 = vmatpush.msrb.mxu1 %v1134_v35 }
  0xf7   : > { %649 = vst [vmem:[#allocation2 + $0x70] sm:$0xff] %v2947_v38  ;;  %2948 = vpow2.f32 %v557_v37  ;;  %v3631_v40 = vld [vmem:[#allocation2 + $0x60] sm:$0xff]  ;;  %v1139_v37 = vld [vmem:[%s5360_s3 + $0x330] sm:$0xff]  ;;  %v1433_v35 = vld [vmem:[%s5360_s3 + $0x538] sm:$0xff] }
  0xf8   : > { %677 = vst.msk [vmem:[#allocation2 + $0x70] sm:$0xff] %vm669_vm2, %v3131_v62  ;;  %2950 = vrcp.f32 %v595_v39  ;;  %v423_v41 = vpop.f32.mrf.mxu0  ;;  %1008 = vrot.lane.b32.xlu0 %v3631_v40, %s3132_s8  ;;  %1176 = vmatpush.msrb.mxu0 %v1139_v37  ;;  %v976_v38 = vld [vmem:[%s5360_s3 + $0x200] sm:$0xff]  ;;  %v1292_v37 = vld [vmem:[%s5360_s3 + $0x448] sm:$0xff] }
  0xf9   : > { %v424_v43 = vadd.f32 %v423_v41, %v3465_v14  ;;  %v744_v44 = vld [vmem:[#allocation2 + $0x68] sm:$0xff]  ;;  %v1137_v39 = vld [vmem:[%s5360_s3 + $0x320] sm:$0xff]  ;;  %1218 = vmatpush.msrb.mxu1 %v1132_v42  ;;  %v997_v42 = vpop.permute.xlu0 %996 }
  0xfa   : > { %1177 = vmatpush.msrb.mxu0 %v1137_v39 }
  0xfb   : > { %v515_v45 = vsub.f32 0.0, %v424_v43  ;;  %2706 = vmatmul.msk.f32.gmra.mxu2 %vm773_vm4, %v744_v44  ;;  %2713 = vmatmul.msk.f32.gmra.mxu3 %vm773_vm4, %v744_v44  ;;  %v977_v43 = vld [vmem:[%s5360_s3 + $0x208] sm:$0xff]  ;;  %v974_v44 = vld [vmem:[%s5360_s3 + $0x1f0] sm:$0xff] }
  0xfc   : > { %1219 = vmatpush.msrb.mxu1 %v1130_v51  ;;  %v1287_v51 = vld [vmem:[%s5360_s3 + $0x420] sm:$0xff] }
  0xfd   : > { %v2949_v46 = vpop.eup %2948  ;;  %v561_v47 = vmul.f32 1.442695, %v515_v45  ;;  %v1135_v45 = vld [vmem:[%s5360_s3 + $0x310] sm:$0xff] }
  0xfe   : > { %v2951_v48 = vpop.eup %2950  ;;  %v597_v49 = vadd.f32 1.0, %v2949_v46  ;;  %1178 = vmatpush.msrb.mxu0 %v1135_v45 }
  0xff   : > { %651 = vst [vmem:[#allocation2 + $0x80] sm:$0xff] %v2951_v48  ;;  %2952 = vpow2.f32 %v561_v47  ;;  %v975_v48 = vld [vmem:[%s5360_s3 + $0x1f8] sm:$0xff] }
 0x100   : > { %678 = vst.msk [vmem:[#allocation2 + $0x80] sm:$0xff] %vm669_vm2, %v3131_v62  ;;  %2954 = vrcp.f32 %v597_v49  ;;  %v426_v52 = vpop.f32.mrf.mxu0  ;;  %1179 = vmatpush.msrb.mxu0 %v1133_v55  ;;  %v1432_v55 = vld [vmem:[%s5360_s3 + $0x530] sm:$0xff] }
 0x101   : > { %v427_v54 = vadd.f32 %v426_v52, %v3465_v14  ;;  %v972_v52 = vld [vmem:[%s5360_s3 + $0x1e0] sm:$0xff] }
 0x103   : > { %v517_v57 = vsub.f32 0.0, %v427_v54  ;;  %2714 = vmatmul.msk.f32.vlgmr.msrb.gmra.mxu2 %vm773_vm4, %v3450_v9  ;;  %2721 = vmatmul.msk.f32.vlgmr.msrb.gmra.mxu3 %vm773_vm4, %v3450_v9  ;;  %v989_v9 = vld [vmem:[%s5360_s3 + $0x268] sm:$0xff] }
 0x104   : > { %1067 = vmatpush.msra.mxu3 %v989_v9  ;;  %v973_v54 = vld [vmem:[%s5360_s3 + $0x1e8] sm:$0xff]  ;;  %v1128_v9 = vld [vmem:[%s5360_s3 + $0x2d8] sm:$0xff] }
 0x105   : > { %v2953_v61 = vpop.eup %2952  ;;  %v565_v63 = vmul.f32 1.442695, %v517_v57  ;;  %1220 = vmatpush.msrb.mxu1 %v1128_v9 }
 0x106   : > { %v2955_v1 = vpop.eup %2954  ;;  %v599_v2 = vadd.f32 1.0, %v2953_v61  ;;  %1068 = vmatpush.msra.mxu3 %v987_v10  ;;  %v1131_v61 = vld [vmem:[%s5360_s3 + $0x2f0] sm:$0xff] }
 0x107   : > { %653 = vst [vmem:[#allocation2 + $0x90] sm:$0xff] %v2955_v1  ;;  %2956 = vpow2.f32 %v565_v63  ;;  %v3677_v3 = vld [vmem:[#allocation2 + $0x80] sm:$0xff]  ;;  %1180 = vmatpush.msrb.mxu0 %v1131_v61  ;;  %v1127_v10 = vld [vmem:[%s5360_s3 + $0x2d0] sm:$0xff] }
 0x108   : > { %679 = vst.msk [vmem:[#allocation2 + $0x90] sm:$0xff] %vm669_vm2, %v3131_v62  ;;  %2958 = vrcp.f32 %v599_v2  ;;  %v429_v6 = vpop.f32.mrf.mxu0  ;;  %1434 = vrot.lane.b32.xlu1 %v3677_v3, %s3132_s8  ;;  %1069 = vmatpush.msra.mxu3 %v985_v13  ;;  %v1129_v1 = vld [vmem:[%s5360_s3 + $0x2e0] sm:$0xff]  ;;  %v1126_v2 = vld [vmem:[%s5360_s3 + $0x2c8] sm:$0xff] }
 0x109   : > { %v430_v11 = vadd.f32 %v429_v6, %v3465_v14  ;;  %1181 = vmatpush.msrb.mxu0 %v1129_v1  ;;  %1221 = vmatpush.msrb.mxu1 %v1126_v2  ;;  %v1125_v13 = vld [vmem:[%s5360_s3 + $0x2c0] sm:$0xff]  ;;  %v1281_v1 = vld [vmem:[%s5360_s3 + $0x3f0] sm:$0xff]  ;;  %v1282_v2 = vld [vmem:[%s5360_s3 + $0x3f8] sm:$0xff] }
 0x10a   : > { %1070 = vmatpush.msra.mxu3 %v983_v20  ;;  %v1121_v20 = vld [vmem:[%s5360_s3 + $0x2a0] sm:$0xff] }
 0x10b   : > { %v519_v18 = vsub.f32 0.0, %v430_v11  ;;  %2715 = vmatmul.msk.f32.gmra.mxu2 %vm773_vm4, %v3505_v7  ;;  %2722 = vmatmul.msk.f32.gmra.mxu3 %vm773_vm4, %v3505_v7  ;;  %v980_v7 = vld [vmem:[%s5360_s3 + $0x220] sm:$0xff]  ;;  %v1124_v11 = vld [vmem:[%s5360_s3 + $0x2b8] sm:$0xff] }
 0x10c   : > { %1033 = vmatpush.msra.mxu2 %v980_v7  ;;  %1071 = vmatpush.msra.mxu3 %v981_v27  ;;  %v473_v7 = vpop.f32.mrf.mxu1  ;;  %v1283_v61 = vld [vmem:[%s5360_s3 + $0x400] sm:$0xff] }
 0x10d   : > { %v2957_v22 = vpop.eup %2956  ;;  %v569_v23 = vmul.f32 1.442695, %v519_v18  ;;  %1182 = vmatpush.msrb.mxu0 %v1127_v10  ;;  %1222 = vmatpush.msrb.mxu1 %v1124_v11  ;;  %v1123_v18 = vld [vmem:[%s5360_s3 + $0x2b0] sm:$0xff]  ;;  %v474_v24 = vadd.f32 %v473_v7, %v3467_v15  ;;  %v1280_v10 = vld [vmem:[%s5360_s3 + $0x3e8] sm:$0xff] }
 0x10e   : > { %v2959_v25 = vpop.eup %2958  ;;  %v601_v26 = vadd.f32 1.0, %v2957_v22  ;;  %1034 = vmatpush.msra.mxu2 %v978_v30  ;;  %1072 = vmatpush.msra.mxu3 %v979_v36  ;;  %v1291_v36 = vld [vmem:[%s5360_s3 + $0x440] sm:$0xff]  ;;  %v1424_v7 = vld [vmem:[%s5360_s3 + $0x4f0] sm:$0xff] }
 0x10f   : > { %655 = vst [vmem:[#allocation2 + $0xa0] sm:$0xff] %v2959_v25  ;;  %2960 = vpow2.f32 %v569_v23  ;;  %v3727_v29 = vld [vmem:[#allocation2 + $0x90] sm:$0xff]  ;;  %1183 = vmatpush.msrb.mxu0 %v1125_v13  ;;  %1223 = vmatpush.msrb.mxu1 %v1122_v17  ;;  %v510_v25 = vsub.f32 0.0, %v474_v24  ;;  %v1426_v17 = vld [vmem:[%s5360_s3 + $0x500] sm:$0xff] }
 0x110   : > { %680 = vst.msk [vmem:[#allocation2 + $0xa0] sm:$0xff] %vm669_vm2, %v3131_v62  ;;  %2962 = vrcp.f32 %v601_v26  ;;  %v432_v31 = vpop.f32.mrf.mxu0  ;;  %1436 = vrot.lane.b32.xlu2 %v3727_v29, %s3132_s8  ;;  %1035 = vmatpush.msra.mxu2 %v976_v38  ;;  %v1275_v24 = vld [vmem:[%s5360_s3 + $0x3c0] sm:$0xff] }
 0x111   : > { %v433_v33 = vadd.f32 %v432_v31, %v3465_v14  ;;  %1073 = vmatpush.msra.mxu3 %v977_v43  ;;  %2749 = vmatmul.msk.f32.vlgmr.msrb.gmra.mxu1 %vm773_vm4, %v3677_v3  ;;  %v551_v30 = vmul.f32 1.442695, %v510_v25 }
 0x112   : > { %1036 = vmatpush.msra.mxu2 %v974_v44  ;;  %1184 = vmatpush.msrb.mxu0 %v1123_v18  ;;  %v1277_v18 = vld [vmem:[%s5360_s3 + $0x3d0] sm:$0xff] }
 0x113   : > { %v521_v41 = vsub.f32 0.0, %v433_v33  ;;  %2716 = vmatmul.msk.f32.gmra.mxu2 %vm773_vm4, %v3541_v34  ;;  %2723 = vmatmul.msk.f32.gmra.mxu3 %vm773_vm4, %v3541_v34  ;;  %v1294_v33 = vld [vmem:[%s5360_s3 + $0x458] sm:$0xff] }
 0x114   : > { %1074 = vmatpush.msra.mxu3 %v975_v48  ;;  %1037 = vmatpush.msra.mxu2 %v972_v52  ;;  %v1290_v48 = vld [vmem:[%s5360_s3 + $0x438] sm:$0xff]  ;;  %v1288_v52 = vld [vmem:[%s5360_s3 + $0x428] sm:$0xff] }
 0x115   : > { %v2961_v46 = vpop.eup %2960  ;;  %v573_v47 = vmul.f32 1.442695, %v521_v41  ;;  %1185 = vmatpush.msrb.mxu0 %v1121_v20  ;;  %1502 = vmatpush.msra.mxu1 %v1433_v35  ;;  %v3982_v20 = vpop.f32.mrf.mxu2  ;;  %v1420_v35 = vld [vmem:[%s5360_s3 + $0x4d0] sm:$0xff] }
 0x116   : > { %v2963_v49 = vpop.eup %2962  ;;  %v603_v50 = vadd.f32 1.0, %v2961_v46  ;;  %1075 = vmatpush.msra.mxu3 %v973_v54  ;;  %1038 = vmatpush.msra.mxu2 %v970_v59 }
 0x117   : > { %657 = vst [vmem:[#allocation2 + $0xb0] sm:$0xff] %v2963_v49  ;;  %2964 = vpow2.f32 %v573_v47  ;;  %v3780_v53 = vld [vmem:[#allocation2 + $0xa0] sm:$0xff]  ;;  %2742 = vmatmul.msk.f32.vlgmr.msrb.gmra.mxu0 %vm773_vm4, %v3677_v3  ;;  %v476_v3 = vpop.f32.mrf.mxu1  ;;  %v1289_v47 = vld [vmem:[%s5360_s3 + $0x430] sm:$0xff] }
 0x118   : > { %681 = vst.msk [vmem:[#allocation2 + $0xb0] sm:$0xff] %vm669_vm2, %v3131_v62  ;;  %2966 = vrcp.f32 %v603_v50  ;;  %v435_v56 = vpop.f32.mrf.mxu0  ;;  %1438 = vrot.lane.b32.xlu0 %v3780_v53, %s3132_s8  ;;  %1076 = vmatpush.msra.mxu3 %v971_v60  ;;  %v477_v31 = vadd.f32 %v476_v3, %v3467_v15  ;;  %v1430_v60 = vld [vmem:[%s5360_s3 + $0x520] sm:$0xff] }
 0x119   : > { %v436_v57 = vadd.f32 %v435_v56, %v3465_v14  ;;  %v968_v14 = vld [vmem:[%s5360_s3 + $0x1c0] sm:$0xff]  ;;  %2750 = vmatmul.msk.f32.gmra.mxu1 %vm773_vm4, %v3727_v29  ;;  %v1285_v56 = vld [vmem:[%s5360_s3 + $0x410] sm:$0xff]  ;;  %1464 = vmatpush.msra.mxu0 %v1432_v55 }
 0x11a   : > { %1039 = vmatpush.msra.mxu2 %v968_v14  ;;  %1077 = vmatpush.msra.mxu3 %v969_v0  ;;  %v512_v32 = vsub.f32 0.0, %v477_v31  ;;  %v1422_v31 = vld [vmem:[%s5360_s3 + $0x4e0] sm:$0xff] }
 0x11b   : > { %v523_v63 = vsub.f32 0.0, %v436_v57  ;;  %2717 = vmatmul.msk.f32.gmra.mxu2 %vm773_vm4, %v3577_v58  ;;  %2724 = vmatmul.msk.f32.gmra.mxu3 %vm773_vm4, %v3577_v58  ;;  %v1286_v57 = vld [vmem:[%s5360_s3 + $0x418] sm:$0xff] }
 0x11c   : > { %1356 = vmatpush.msrb.mxu3 %v1294_v33  ;;  %v555_v41 = vmul.f32 1.442695, %v512_v32  ;;  %1465 = vmatpush.msra.mxu0 %v1430_v60  ;;  %v1273_v33 = vld [vmem:[%s5360_s3 + $0x3b0] sm:$0xff] }
 0x11d   : > { %v2965_v4 = vpop.eup %2964  ;;  %v577_v5 = vmul.f32 1.442695, %v523_v63  ;;  %v1284_v63 = vld [vmem:[%s5360_s3 + $0x408] sm:$0xff] }
 0x11e   : > { %v2967_v6 = vpop.eup %2966  ;;  %v605_v8 = vadd.f32 1.0, %v2965_v4  ;;  %1357 = vmatpush.msrb.mxu3 %v1292_v37  ;;  %v1428_v4 = vld [vmem:[%s5360_s3 + $0x510] sm:$0xff] }
 0x11f   : > { %659 = vst [vmem:[#allocation2 + $0xc0] sm:$0xff] %v2967_v6  ;;  %2968 = vpow2.f32 %v577_v5  ;;  %v3827_v12 = vld [vmem:[#allocation2 + $0xb0] sm:$0xff]  ;;  %2743 = vmatmul.msk.f32.gmra.mxu0 %vm773_vm4, %v3727_v29  ;;  %v479_v44 = vpop.f32.mrf.mxu1  ;;  %v1427_v6 = vld [vmem:[%s5360_s3 + $0x508] sm:$0xff] }
 0x120   : > { %682 = vst.msk [vmem:[#allocation2 + $0xc0] sm:$0xff] %vm669_vm2, %v3131_v62  ;;  %2970 = vrcp.f32 %v605_v8  ;;  %1440 = vrot.lane.b32.xlu1 %v3827_v12, %s3132_s8  ;;  %v1293_v29 = vld [vmem:[%s5360_s3 + $0x450] sm:$0xff]  ;;  %v480_v45 = vadd.f32 %v479_v44, %v3467_v15  ;;  %1358 = vmatpush.msrb.mxu3 %v1290_v48  ;;  %v1279_v8 = vld [vmem:[%s5360_s3 + $0x3e0] sm:$0xff] }
 0x121   : > { %2751 = vmatmul.msk.f32.gmra.mxu1 %vm773_vm4, %v3780_v53  ;;  %1318 = vmatpush.msrb.mxu2 %v1293_v29  ;;  %v1274_v29 = vld [vmem:[%s5360_s3 + $0x3b8] sm:$0xff] }
 0x122   : > { %v514_v46 = vsub.f32 0.0, %v480_v45  ;;  %1359 = vmatpush.msrb.mxu3 %v1288_v52  ;;  %1466 = vmatpush.msra.mxu0 %v1428_v4  ;;  %v1418_v45 = vld [vmem:[%s5360_s3 + $0x4c0] sm:$0xff]  ;;  %v1411_v4 = vld [vmem:[%s5360_s3 + $0x488] sm:$0xff] }
 0x123   : > { %2718 = vmatmul.msk.f32.gmra.mxu2 %vm773_vm4, %v3603_v16  ;;  %2725 = vmatmul.msk.f32.gmra.mxu3 %vm773_vm4, %v3603_v16 }
 0x124   : > { %1319 = vmatpush.msrb.mxu2 %v1291_v36  ;;  %v559_v50 = vmul.f32 1.442695, %v514_v46  ;;  %1360 = vmatpush.msrb.mxu3 %v1286_v57  ;;  %v1419_v46 = vld [vmem:[%s5360_s3 + $0x4c8] sm:$0xff]  ;;  %v1414_v57 = vld [vmem:[%s5360_s3 + $0x4a0] sm:$0xff] }
 0x125   : > { %v2969_v19 = vpop.eup %2968  ;;  %1467 = vmatpush.msra.mxu0 %v1426_v17 }
 0x126   : > { %v2971_v21 = vpop.eup %2970  ;;  %v607_v22 = vadd.f32 1.0, %v2969_v19  ;;  %1320 = vmatpush.msrb.mxu2 %v1289_v47  ;;  %1361 = vmatpush.msrb.mxu3 %v1284_v63  ;;  %v1269_v47 = vld [vmem:[%s5360_s3 + $0x390] sm:$0xff] }
 0x127   : > { %661 = vst [vmem:[#allocation2 + $0xd0] sm:$0xff] %v2971_v21  ;;  %v3851_v23 = vld [vmem:[#allocation2 + $0xc0] sm:$0xff]  ;;  %2744 = vmatmul.msk.f32.gmra.mxu0 %vm773_vm4, %v3780_v53  ;;  %v482_v14 = vpop.f32.mrf.mxu1  ;;  %v1278_v21 = vld [vmem:[%s5360_s3 + $0x3d8] sm:$0xff] }
 0x128   : > { %683 = vst.msk [vmem:[#allocation2 + $0xd0] sm:$0xff] %vm669_vm2, %v3131_v62  ;;  %2972 = vrcp.f32 %v607_v22  ;;  %1442 = vrot.lane.b32.xlu2 %v3851_v23, %s3132_s8  ;;  %1321 = vmatpush.msrb.mxu2 %v1287_v51  ;;  %v483_v0 = vadd.f32 %v482_v14, %v3467_v15  ;;  %v1425_v22 = vld [vmem:[%s5360_s3 + $0x4f8] sm:$0xff]  ;;  %v1412_v14 = vld [vmem:[%s5360_s3 + $0x490] sm:$0xff] }
 0x129   : > { %2974 = vpow2.f32 %v551_v30  ;;  %2752 = vmatmul.msk.f32.gmra.mxu1 %vm773_vm4, %v3827_v12  ;;  %1362 = vmatpush.msrb.mxu3 %v1282_v2  ;;  %v1423_v30 = vld [vmem:[%s5360_s3 + $0x4e8] sm:$0xff] }
 0x12a   : > { %2976 = vpow2.f32 %v555_v41  ;;  %1322 = vmatpush.msrb.mxu2 %v1285_v56  ;;  %v516_v9 = vsub.f32 0.0, %v483_v0  ;;  %1468 = vmatpush.msra.mxu0 %v1424_v7  ;;  %v1421_v41 = vld [vmem:[%s5360_s3 + $0x4d8] sm:$0xff]  ;;  %v1268_v56 = vld [vmem:[%s5360_s3 + $0x388] sm:$0xff] }
 0x12b   : > { %2719 = vmatmul.msk.f32.gmra.mxu2 %vm773_vm4, %v3617_v28  ;;  %2726 = vmatmul.msk.f32.gmra.mxu3 %vm773_vm4, %v3617_v28 }
 0x12c   : > { %1323 = vmatpush.msrb.mxu2 %v1283_v61  ;;  %v563_v13 = vmul.f32 1.442695, %v516_v9  ;;  %1363 = vmatpush.msrb.mxu3 %v1280_v10  ;;  %v1413_v9 = vld [vmem:[%s5360_s3 + $0x498] sm:$0xff] }
 0x12d   : > { %1469 = vmatpush.msra.mxu0 %v1422_v31 }
 0x12e   : > { %v2973_v26 = vpop.eup %2972  ;;  %1324 = vmatpush.msrb.mxu2 %v1281_v1  ;;  %1364 = vmatpush.msrb.mxu3 %v1278_v21  ;;  %v1410_v1 = vld [vmem:[%s5360_s3 + $0x480] sm:$0xff] }
 0x12f   : > { %663 = vst [vmem:[#allocation2 + $0xe0] sm:$0xff] %v2973_v26  ;;  %v3866_v27 = vld [vmem:[#allocation2 + $0xd0] sm:$0xff]  ;;  %v2975_v38 = vpop.eup %2974  ;;  %2745 = vmatmul.msk.f32.gmra.mxu0 %vm773_vm4, %v3827_v12  ;;  %v485_v25 = vpop.f32.mrf.mxu1  ;;  %v1276_v26 = vld [vmem:[%s5360_s3 + $0x3c8] sm:$0xff] }
 0x130   : > { %684 = vst.msk [vmem:[#allocation2 + $0xe0] sm:$0xff] %vm669_vm2, %v3131_v62  ;;  %1444 = vrot.lane.b32.xlu0 %v3866_v27, %s3132_s8  ;;  %v594_v43 = vadd.f32 1.0, %v2975_v38  ;;  %v2977_v49 = vpop.eup %2976  ;;  %1325 = vmatpush.msrb.mxu2 %v1279_v8  ;;  %v486_v3 = vadd.f32 %v485_v25, %v3467_v15 }
 0x131   : > { %v596_v54 = vadd.f32 1.0, %v2977_v49  ;;  %2753 = vmatmul.msk.f32.gmra.mxu1 %vm773_vm4, %v3851_v23  ;;  %1365 = vmatpush.msrb.mxu3 %v1276_v26  ;;  %v1416_v49 = vld [vmem:[%s5360_s3 + $0x4b0] sm:$0xff] }
 0x132   : > { %2978 = vrcp.f32 %v594_v43  ;;  %1326 = vmatpush.msrb.mxu2 %v1277_v18  ;;  %v518_v32 = vsub.f32 0.0, %v486_v3  ;;  %1470 = vmatpush.msra.mxu0 %v1420_v35  ;;  %v1585_v35 = vld [vmem:[%s5360_s3 + $0x610] sm:$0xff] }
 0x133   : > { %2720 = vmatmul.msk.f32.gmra.mxu2 %vm773_vm4, %v3631_v40  ;;  %2727 = vmatmul.msk.f32.gmra.mxu3 %vm773_vm4, %v3631_v40  ;;  %2980 = vpow2.f32 %v559_v50 }
 0x134   : > { %2982 = vrcp.f32 %v596_v54  ;;  %1327 = vmatpush.msrb.mxu2 %v1275_v24  ;;  %v567_v37 = vmul.f32 1.442695, %v518_v32  ;;  %1366 = vmatpush.msrb.mxu3 %v1274_v29  ;;  %v1267_v54 = vld [vmem:[%s5360_s3 + $0x380] sm:$0xff] }
 0x135   : > { %1471 = vmatpush.msra.mxu0 %v1418_v45 }
 0x136   : > { %1328 = vmatpush.msrb.mxu2 %v1273_v33 }
 0x137   : > { %v3896_v39 = vld [vmem:[#allocation2 + $0xe0] sm:$0xff]  ;;  %2746 = vmatmul.msk.f32.gmra.mxu0 %vm773_vm4, %v3851_v23  ;;  %v3992_v23 = vpop.f32.mrf.mxu3  ;;  %v488_v48 = vpop.f32.mrf.mxu1 }
 0x138   : > { %1446 = vrot.lane.b32.xlu1 %v3896_v39, %s3132_s8  ;;  %1874 = vrot.lane.b32.xlu0 %v3541_v34, %s3132_s8  ;;  %v1431_v34 = vld [vmem:[%s5360_s3 + $0x528] sm:$0xff]  ;;  %v2979_v53 = vpop.eup %2978  ;;  %v489_v50 = vadd.f32 %v488_v48, %v3467_v15 }
 0x139   : > { %1503 = vmatpush.msra.mxu1 %v1431_v34  ;;  %650 = vst [vmem:[#allocation2 + $0x78] sm:$0xff] %v2979_v53  ;;  %v2981_v5 = vpop.eup %2980  ;;  %v1270_v34 = vld [vmem:[%s5360_s3 + $0x398] sm:$0xff]  ;;  %1472 = vmatpush.msra.mxu0 %v1416_v49  ;;  %v1730_v48 = vld [vmem:[%s5360_s3 + $0x6e8] sm:$0xff] }
 0x13a   : > { %694 = vst.msk [vmem:[#allocation2 + $0x78] sm:$0xff] %vm686_vm3, %v3131_v62  ;;  %v2983_v11 = vpop.eup %2982  ;;  %v598_v12 = vadd.f32 1.0, %v2981_v5  ;;  %2754 = vmatmul.msk.f32.gmra.mxu1 %vm773_vm4, %v3866_v27  ;;  %v1417_v53 = vld [vmem:[%s5360_s3 + $0x4b8] sm:$0xff]  ;;  %v1580_v49 = vld [vmem:[%s5360_s3 + $0x5e8] sm:$0xff] }
 0x13b   : > { %2728 = vmatmul.msk.f32.vlgmr.msra.gmra.mxu2 %vm773_vm4, %v997_v42  ;;  %2735 = vmatmul.msk.f32.vlgmr.msra.gmra.mxu3 %vm773_vm4, %v997_v42  ;;  %652 = vst [vmem:[#allocation2 + $0x88] sm:$0xff] %v2983_v11  ;;  %v1271_v42 = vld [vmem:[%s5360_s3 + $0x3a0] sm:$0xff] }
 0x13c   : > { %695 = vst.msk [vmem:[#allocation2 + $0x88] sm:$0xff] %vm686_vm3, %v3131_v62  ;;  %2984 = vrcp.f32 %v598_v12  ;;  %1329 = vmatpush.msrb.mxu2 %v1271_v42  ;;  %1473 = vmatpush.msra.mxu0 %v1414_v57  ;;  %v4108_v12 = vld [vmem:[#allocation2 + $0x10] sm:$0xff] }
 0x13d   : > { %2986 = vpow2.f32 %v563_v13  ;;  %1872 = vrot.lane.b32.xlu2 %v4108_v12, %s3132_s8  ;;  %v1577_v57 = vld [vmem:[%s5360_s3 + $0x5d0] sm:$0xff] }
 0x13e   : > { %2988 = vpow2.f32 %v567_v37  ;;  %1330 = vmatpush.msrb.mxu2 %v1269_v47  ;;  %1474 = vmatpush.msra.mxu0 %v1412_v14  ;;  %v1582_v47 = vld [vmem:[%s5360_s3 + $0x5f8] sm:$0xff]  ;;  %v1573_v14 = vld [vmem:[%s5360_s3 + $0x5b0] sm:$0xff] }
 0x13f   : > { %2747 = vmatmul.msk.f32.gmra.mxu0 %vm773_vm4, %v3866_v27  ;;  %v1272_v27 = vld [vmem:[%s5360_s3 + $0x3a8] sm:$0xff]  ;;  %v491_v2 = vpop.f32.mrf.mxu1 }
 0x140   : > { %1876 = vrot.lane.b32.xlu1 %v3577_v58, %s3132_s8  ;;  %v1429_v58 = vld [vmem:[%s5360_s3 + $0x518] sm:$0xff]  ;;  %1367 = vmatpush.msrb.mxu3 %v1272_v27  ;;  %v492_v5 = vadd.f32 %v491_v2, %v3467_v15 }
 0x141   : > { %1504 = vmatpush.msra.mxu1 %v1429_v58  ;;  %v1415_v58 = vld [vmem:[%s5360_s3 + $0x4a8] sm:$0xff]  ;;  %1331 = vmatpush.msrb.mxu2 %v1267_v54 }
 0x142   : > { %v999_v59 = vpop.permute.xlu0 %998  ;;  %v2985_v36 = vpop.eup %2984  ;;  %1368 = vmatpush.msrb.mxu3 %v1270_v34  ;;  %2755 = vmatmul.msk.f32.gmra.mxu1 %vm773_vm4, %v3896_v39  ;;  %v522_v11 = vsub.f32 0.0, %v492_v5  ;;  %v1579_v34 = vld [vmem:[%s5360_s3 + $0x5e0] sm:$0xff]  ;;  %v1724_v5 = vld [vmem:[%s5360_s3 + $0x6b8] sm:$0xff] }
 0x143   : > { %2729 = vmatmul.msk.f32.gmra.mxu2 %vm773_vm4, %v999_v59  ;;  %2736 = vmatmul.msk.f32.gmra.mxu3 %vm773_vm4, %v999_v59  ;;  %v2987_v38 = vpop.eup %2986  ;;  %654 = vst [vmem:[#allocation2 + $0x98] sm:$0xff] %v2985_v36  ;;  %v1005_v55 = vpop.permute.xlu2 %1004  ;;  %v520_v59 = vsub.f32 0.0, %v489_v50  ;;  %v1732_v36 = vld [vmem:[%s5360_s3 + $0x6f8] sm:$0xff] }
 0x144   : > { %1505 = vmatpush.msra.mxu1 %v1427_v6  ;;  %696 = vst.msk [vmem:[#allocation2 + $0x98] sm:$0xff] %vm686_vm3, %v3131_v62  ;;  %v600_v44 = vadd.f32 1.0, %v2987_v38  ;;  %v2989_v60 = vpop.eup %2988  ;;  %1369 = vmatpush.msrb.mxu3 %v1268_v56  ;;  %v1408_v6 = vld [vmem:[%s5360_s3 + $0x470] sm:$0xff]  ;;  %v575_v18 = vmul.f32 1.442695, %v522_v11  ;;  %v1260_v38 = vld [vmem:[#allocation2 + $0x88] sm:$0xff] }
 0x145   : > { %v571_v61 = vmul.f32 1.442695, %v520_v59  ;;  %v602_v63 = vadd.f32 1.0, %v2989_v60  ;;  %1880 = vrot.lane.b32.xlu0 %v3617_v28, %s3132_s8  ;;  %1475 = vmatpush.msra.mxu0 %v1410_v1  ;;  %v1406_v28 = vld [vmem:[%s5360_s3 + $0x460] sm:$0xff]  ;;  %v1578_v59 = vld [vmem:[%s5360_s3 + $0x5d8] sm:$0xff]  ;;  %v1726_v1 = vld [vmem:[%s5360_s3 + $0x6c8] sm:$0xff] }
 0x146   : > { %1506 = vmatpush.msra.mxu1 %v1425_v22  ;;  %2990 = vrcp.f32 %v600_v44  ;;  %1878 = vrot.lane.b32.xlu2 %v3603_v16, %s3132_s8  ;;  %v1586_v16 = vld [vmem:[%s5360_s3 + $0x618] sm:$0xff]  ;;  %v1584_v44 = vld [vmem:[%s5360_s3 + $0x608] sm:$0xff]  ;;  %v1575_v60 = vld [vmem:[%s5360_s3 + $0x5c0] sm:$0xff] }
 0x147   : > { %2992 = vpow2.f32 %v571_v61  ;;  %2748 = vmatmul.msk.f32.gmra.mxu0 %vm773_vm4, %v3896_v39  ;;  %v1409_v39 = vld [vmem:[%s5360_s3 + $0x478] sm:$0xff]  ;;  %v494_v22 = vpop.f32.mrf.mxu1  ;;  %1648 = vmatpush.msra.mxu3 %v1586_v16  ;;  %v1576_v61 = vld [vmem:[%s5360_s3 + $0x5c8] sm:$0xff] }
 0x148   : > { %1507 = vmatpush.msra.mxu1 %v1423_v30  ;;  %2994 = vrcp.f32 %v602_v63  ;;  %1882 = vrot.lane.b32.xlu1 %v3631_v40, %s3132_s8  ;;  %v1407_v40 = vld [vmem:[%s5360_s3 + $0x468] sm:$0xff]  ;;  %v495_v7 = vadd.f32 %v494_v22, %v3467_v15  ;;  %v1566_v16 = vld [vmem:[%s5360_s3 + $0x578] sm:$0xff] }
 0x149   : > { %1476 = vmatpush.msra.mxu0 %v1408_v6  ;;  %2996 = vpow2.f32 %v575_v18  ;;  %1610 = vmatpush.msra.mxu2 %v1585_v35  ;;  %v1572_v11 = vld [vmem:[%s5360_s3 + $0x5a8] sm:$0xff]  ;;  %v1570_v18 = vld [vmem:[%s5360_s3 + $0x598] sm:$0xff]  ;;  %v1717_v35 = vld [vmem:[%s5360_s3 + $0x680] sm:$0xff] }
 0x14a   : > { %v1001_v19 = vpop.permute.xlu1 %1000  ;;  %1508 = vmatpush.msra.mxu1 %v1421_v41  ;;  %v524_v26 = vsub.f32 0.0, %v495_v7  ;;  %1649 = vmatpush.msra.mxu3 %v1584_v44  ;;  %v1567_v7 = vld [vmem:[%s5360_s3 + $0x580] sm:$0xff] }
 0x14b   : > { %2730 = vmatmul.msk.f32.gmra.mxu2 %vm773_vm4, %v1001_v19  ;;  %2737 = vmatmul.msk.f32.gmra.mxu3 %vm773_vm4, %v1001_v19  ;;  %v1007_v17 = vpop.permute.xlu2 %1006  ;;  %v1261_v50 = vld [vmem:[#allocation2 + $0x98] sm:$0xff] }
 0x14c   : > { %1509 = vmatpush.msra.mxu1 %v1419_v46  ;;  %v2991_v0 = vpop.eup %2990  ;;  %1477 = vmatpush.msra.mxu0 %v1406_v28  ;;  %v579_v3 = vmul.f32 1.442695, %v524_v26  ;;  %v1581_v46 = vld [vmem:[%s5360_s3 + $0x5f0] sm:$0xff]  ;;  %v1568_v26 = vld [vmem:[%s5360_s3 + $0x588] sm:$0xff] }
 0x14d   : > { %656 = vst [vmem:[#allocation2 + $0xa8] sm:$0xff] %v2991_v0  ;;  %v2993_v13 = vpop.eup %2992  ;;  %1650 = vmatpush.msra.mxu3 %v1582_v47  ;;  %v1574_v0 = vld [vmem:[%s5360_s3 + $0x5b8] sm:$0xff]  ;;  %v1723_v28 = vld [vmem:[%s5360_s3 + $0x6b0] sm:$0xff] }
 0x14e   : > { %1510 = vmatpush.msra.mxu1 %v1417_v53  ;;  %697 = vst.msk [vmem:[#allocation2 + $0xa8] sm:$0xff] %vm686_vm3, %v3131_v62  ;;  %v2995_v19 = vpop.eup %2994  ;;  %v604_v21 = vadd.f32 1.0, %v2993_v13  ;;  %v1731_v53 = vld [vmem:[%s5360_s3 + $0x6f0] sm:$0xff]  ;;  %v1562_v47 = vld [vmem:[%s5360_s3 + $0x558] sm:$0xff] }
 0x14f   : > { %658 = vst [vmem:[#allocation2 + $0xb8] sm:$0xff] %v2995_v19  ;;  %v2997_v30 = vpop.eup %2996  ;;  %1651 = vmatpush.msra.mxu3 %v1580_v49  ;;  %1756 = vmatpush.msrb.mxu0 %v1731_v53  ;;  %v4235_v13 = vld [vmem:[#allocation2 + $0x70] sm:$0xff]  ;;  %v1721_v19 = vld [vmem:[%s5360_s3 + $0x6a0] sm:$0xff] }
 0x150   : > { %1511 = vmatpush.msra.mxu1 %v1415_v58  ;;  %698 = vst.msk [vmem:[#allocation2 + $0xb8] sm:$0xff] %vm686_vm3, %v3131_v62  ;;  %2998 = vrcp.f32 %v604_v21  ;;  %v606_v32 = vadd.f32 1.0, %v2997_v30  ;;  %v1729_v58 = vld [vmem:[%s5360_s3 + $0x6e0] sm:$0xff]  ;;  %v1722_v21 = vld [vmem:[%s5360_s3 + $0x6a8] sm:$0xff]  ;;  %1884 = vrot.lane.b32.xlu2 %v4235_v13, %s3132_s8  ;;  %s271_s8 = scalar_lea.vmem [#allocation3], %s2668_s18 }
 0x151   : > { %3000 = vpow2.f32 %v579_v3  ;;  %1652 = vmatpush.msra.mxu3 %v1578_v59  ;;  %1757 = vmatpush.msrb.mxu0 %v1729_v58  ;;  %v1713_v49 = vld [vmem:[%s5360_s3 + $0x660] sm:$0xff]  ;;  %v1710_v59 = vld [vmem:[%s5360_s3 + $0x648] sm:$0xff]  ;;  %s2602_s29 = sshll.u32 %s271_s8, 4  ;;  %s2603_s29 = int_to_ptr.vmem [resolvable:$true] %s2602_s29 }
 0x152   : > { %v1003_v43 = vpop.permute.xlu1 %1002  ;;  %1512 = vmatpush.msra.mxu1 %v1413_v9  ;;  %3002 = vrcp.f32 %v606_v32  ;;  %v1727_v9 = vld [vmem:[%s5360_s3 + $0x6d0] sm:$0xff]  ;;  %v1720_v32 = vld [vmem:[%s5360_s3 + $0x698] sm:$0xff] }
 0x153   : > { %2731 = vmatmul.msk.f32.gmra.mxu2 %vm773_vm4, %v1003_v43  ;;  %2738 = vmatmul.msk.f32.gmra.mxu3 %vm773_vm4, %v1003_v43  ;;  %v1583_v43 = vld [vmem:[%s5360_s3 + $0x600] sm:$0xff] }
 0x154   : > { %1513 = vmatpush.msra.mxu1 %v1411_v4  ;;  %1611 = vmatpush.msra.mxu2 %v1583_v43  ;;  %v1725_v4 = vld [vmem:[%s5360_s3 + $0x6c0] sm:$0xff] }
 0x155   : > { %v4054_v51 = vpop.f32.mrf.mxu2  ;;  %v4056_v52 = vpop.f32.mrf.mxu3  ;;  %1653 = vmatpush.msra.mxu3 %v1576_v61  ;;  %v1262_v2 = vld [vmem:[#allocation2 + $0xa8] sm:$0xff]  ;;  %1758 = vmatpush.msrb.mxu0 %v1727_v9  ;;  %v1708_v9 = vld [vmem:[%s5360_s3 + $0x638] sm:$0xff] }
 0x156   : > { %1514 = vmatpush.msra.mxu1 %v1409_v39  ;;  %v2999_v31 = vpop.eup %2998  ;;  %1612 = vmatpush.msra.mxu2 %v1581_v46  ;;  %v1571_v39 = vld [vmem:[%s5360_s3 + $0x5a0] sm:$0xff]  ;;  %v1561_v46 = vld [vmem:[%s5360_s3 + $0x550] sm:$0xff] }
 0x157   : > { %660 = vst [vmem:[#allocation2 + $0xc8] sm:$0xff] %v2999_v31  ;;  %v3001_v37 = vpop.eup %3000  ;;  %1654 = vmatpush.msra.mxu3 %v1574_v0  ;;  %1759 = vmatpush.msrb.mxu0 %v1725_v4  ;;  %v1719_v31 = vld [vmem:[%s5360_s3 + $0x690] sm:$0xff] }
 0x158   : > { %1515 = vmatpush.msra.mxu1 %v1407_v40  ;;  %699 = vst.msk [vmem:[#allocation2 + $0xc8] sm:$0xff] %vm686_vm3, %v3131_v62  ;;  %v3003_v41 = vpop.eup %3002  ;;  %v608_v42 = vadd.f32 1.0, %v3001_v37  ;;  %1613 = vmatpush.msra.mxu2 %v1579_v34  ;;  %v1563_v37 = vld [vmem:[%s5360_s3 + $0x560] sm:$0xff]  ;;  %v1707_v0 = vld [vmem:[%s5360_s3 + $0x630] sm:$0xff] }
 0x159   : > { %662 = vst [vmem:[#allocation2 + $0xd8] sm:$0xff] %v3003_v41  ;;  %1655 = vmatpush.msra.mxu3 %v1572_v11  ;;  %1760 = vmatpush.msrb.mxu0 %v1723_v28  ;;  %v1715_v41 = vld [vmem:[%s5360_s3 + $0x670] sm:$0xff] }
 0x15a   : > { %1794 = vmatpush.msrb.mxu1 %v1732_v36  ;;  %700 = vst.msk [vmem:[#allocation2 + $0xd8] sm:$0xff] %vm686_vm3, %v3131_v62  ;;  %3004 = vrcp.f32 %v608_v42  ;;  %1614 = vmatpush.msra.mxu2 %v1577_v57  ;;  %v1718_v36 = vld [vmem:[%s5360_s3 + $0x688] sm:$0xff]  ;;  %v1716_v42 = vld [vmem:[%s5360_s3 + $0x678] sm:$0xff]  ;;  %v1709_v57 = vld [vmem:[%s5360_s3 + $0x640] sm:$0xff] }
 0x15b   : > { %2732 = vmatmul.msk.f32.gmra.mxu2 %vm773_vm4, %v1005_v55  ;;  %2739 = vmatmul.msk.f32.gmra.mxu3 %vm773_vm4, %v1005_v55  ;;  %v1728_v55 = vld [vmem:[%s5360_s3 + $0x6d8] sm:$0xff] }
 0x15c   : > { %1795 = vmatpush.msrb.mxu1 %v1730_v48  ;;  %1615 = vmatpush.msra.mxu2 %v1575_v60 }
 0x15d   : > { %1656 = vmatpush.msra.mxu3 %v1570_v18  ;;  %1761 = vmatpush.msrb.mxu0 %v1721_v19 }
 0x15e   : > { %v4099_v8 = vpop.f32.mrf.mxu2  ;;  %v4101_v10 = vpop.f32.mrf.mxu3  ;;  %1796 = vmatpush.msrb.mxu1 %v1728_v55  ;;  %1616 = vmatpush.msra.mxu2 %v1573_v14  ;;  %v1711_v55 = vld [vmem:[%s5360_s3 + $0x650] sm:$0xff] }
 0x15f   : > { %1657 = vmatpush.msra.mxu3 %v1568_v26  ;;  %1762 = vmatpush.msrb.mxu0 %v1719_v31  ;;  %v1264_v53 = vld [vmem:[#allocation2 + $0xc8] sm:$0xff] }
 0x160   : > { %v3005_v54 = vpop.eup %3004  ;;  %1797 = vmatpush.msrb.mxu1 %v1726_v1  ;;  %1617 = vmatpush.msra.mxu2 %v1571_v39 }
 0x161   : > { %664 = vst [vmem:[#allocation2 + $0xe8] sm:$0xff] %v3005_v54  ;;  %1658 = vmatpush.msra.mxu3 %v1566_v16  ;;  %1763 = vmatpush.msrb.mxu0 %v1717_v35  ;;  %v1560_v54 = vld [vmem:[%s5360_s3 + $0x548] sm:$0xff]  ;;  %v1265_v1 = vld [vmem:[#allocation2 + $0xd8] sm:$0xff]  ;;  %v3062_v16 = vld [vmem:[#allocation2 + $0x20] sm:$0xff] }
 0x162   : > { %701 = vst.msk [vmem:[#allocation2 + $0xe8] sm:$0xff] %vm686_vm3, %v3131_v62  ;;  %1798 = vmatpush.msrb.mxu1 %v1724_v5 }
 0x163   : > { %2733 = vmatmul.msk.f32.gmra.mxu2 %vm773_vm4, %v1007_v17  ;;  %2740 = vmatmul.msk.f32.gmra.mxu3 %vm773_vm4, %v1007_v17  ;;  %v1569_v17 = vld [vmem:[%s5360_s3 + $0x590] sm:$0xff] }
 0x164   : > { %1618 = vmatpush.msra.mxu2 %v1569_v17  ;;  %1799 = vmatpush.msrb.mxu1 %v1722_v21  ;;  %v1870_v21 = vld [vmem:[%s5360_s3 + $0x7d0] sm:$0xff] }
 0x165   : > { %1764 = vmatpush.msrb.mxu0 %v1715_v41 }
 0x166   : > { %v4123_v24 = vpop.f32.mrf.mxu2  ;;  %v4125_v25 = vpop.f32.mrf.mxu3  ;;  %1619 = vmatpush.msra.mxu2 %v1567_v7  ;;  %1800 = vmatpush.msrb.mxu1 %v1720_v32  ;;  %v1867_v7 = vld [vmem:[%s5360_s3 + $0x7b8] sm:$0xff] }
 0x167   : > { %1765 = vmatpush.msrb.mxu0 %v1713_v49  ;;  %v1699_v49 = vld [vmem:[#allocation2 + $0x28] sm:$0xff] }
 0x168   : > { %1801 = vmatpush.msrb.mxu1 %v1718_v36 }
 0x169   : > { %1766 = vmatpush.msrb.mxu0 %v1711_v55  ;;  %v1266_v11 = vld [vmem:[#allocation2 + $0xe8] sm:$0xff] }
 0x16a   : > { %v1009_v33 = vpop.permute.xlu0 %1008  ;;  %v1437_v6 = vpop.permute.xlu2 %1436  ;;  %1802 = vmatpush.msrb.mxu1 %v1716_v42 }
 0x16b   : > { %2734 = vmatmul.msk.f32.gmra.mxu2 %vm773_vm4, %v1009_v33  ;;  %2741 = vmatmul.msk.f32.gmra.mxu3 %vm773_vm4, %v1009_v33  ;;  %v1263_v33 = vld [vmem:[#allocation2 + $0xb8] sm:$0xff] }
 0x16c   : > { %1767 = vmatpush.msrb.mxu0 %v1709_v57  ;;  %v1852_v57 = vld [vmem:[%s5360_s3 + $0x740] sm:$0xff] }
 0x16e   : > { %v4133_v15 = vpop.f32.mrf.mxu2  ;;  %v4135_v29 = vpop.f32.mrf.mxu3  ;;  %1768 = vmatpush.msrb.mxu0 %v1707_v0  ;;  %v1700_v0 = vld [vmem:[#allocation2 + $0x38] sm:$0xff] }
 0x173   : > { %2756 = vmatmul.msk.f32.vlgmr.msrb.gmra.mxu2 %vm773_vm4, %v1260_v38  ;;  %2763 = vmatmul.msk.f32.vlgmr.msrb.gmra.mxu3 %vm773_vm4, %v1260_v38  ;;  %v1564_v38 = vld [vmem:[%s5360_s3 + $0x568] sm:$0xff] }
 0x174   : > { %1659 = vmatpush.msra.mxu3 %v1564_v38  ;;  %v1861_v38 = vld [vmem:[%s5360_s3 + $0x788] sm:$0xff] }
 0x176   : > { %v4156_v27 = vpop.f32.mrf.mxu2  ;;  %v4158_v45 = vpop.f32.mrf.mxu3  ;;  %1660 = vmatpush.msra.mxu3 %v1562_v47 }
 0x178   : > { %1661 = vmatpush.msra.mxu3 %v1560_v54  ;;  %v1855_v54 = vld [vmem:[%s5360_s3 + $0x758] sm:$0xff] }
 0x17a   : > { %v1435_v56 = vpop.permute.xlu1 %1434 }
 0x17b   : > { %2757 = vmatmul.msk.f32.gmra.mxu2 %vm773_vm4, %v1261_v50  ;;  %2764 = vmatmul.msk.f32.gmra.mxu3 %vm773_vm4, %v1261_v50  ;;  %v1714_v50 = vld [vmem:[%s5360_s3 + $0x668] sm:$0xff] }
 0x17c   : > { %2770 = vmatmul.msk.f32.vlgmr.msra.gmra.mxu0 %vm773_vm4, %v1435_v56  ;;  %2777 = vmatmul.msk.f32.vlgmr.msra.gmra.mxu1 %vm773_vm4, %v1435_v56  ;;  %v1712_v56 = vld [vmem:[%s5360_s3 + $0x658] sm:$0xff] }
 0x17d   : > { %1803 = vmatpush.msrb.mxu1 %v1714_v50  ;;  %v1856_v50 = vld [vmem:[%s5360_s3 + $0x760] sm:$0xff] }
 0x17e   : > { %v4202_v63 = vpop.f32.mrf.mxu2  ;;  %v4204_v62 = vpop.f32.mrf.mxu3 }
 0x17f   : > { %1804 = vmatpush.msrb.mxu1 %v1712_v56 }
 0x181   : > { %1805 = vmatpush.msrb.mxu1 %v1710_v59  ;;  %v1853_v59 = vld [vmem:[%s5360_s3 + $0x748] sm:$0xff] }
 0x183   : > { %2758 = vmatmul.msk.f32.gmra.mxu2 %vm773_vm4, %v1262_v2  ;;  %2765 = vmatmul.msk.f32.gmra.mxu3 %vm773_vm4, %v1262_v2  ;;  %v1443_v2 = vpop.permute.xlu2 %1442 }
 0x184   : > { %2771 = vmatmul.msk.f32.gmra.mxu0 %vm773_vm4, %v1437_v6  ;;  %2778 = vmatmul.msk.f32.gmra.mxu1 %vm773_vm4, %v1437_v6 }
 0x185   : > { %1806 = vmatpush.msrb.mxu1 %v1708_v9  ;;  %v1850_v9 = vld [vmem:[%s5360_s3 + $0x730] sm:$0xff] }
 0x186   : > { %v909_v40 = vpop.f32.mrf.mxu2  ;;  %v947_v22 = vpop.f32.mrf.mxu3 }
 0x187   : > { %v4260_v30 = vadd.f32 %v909_v40, %v3982_v20  ;;  %v4263_v3 = vadd.f32 %v947_v22, %v3992_v23  ;;  %v1565_v23 = vld [vmem:[%s5360_s3 + $0x570] sm:$0xff] }
 0x188   : > { %1620 = vmatpush.msra.mxu2 %v1565_v23  ;;  %v1866_v22 = vld [vmem:[%s5360_s3 + $0x7b0] sm:$0xff]  ;;  %v1698_v23 = vld [vmem:[#allocation2 + $0x18] sm:$0xff] }
 0x18a   : > { %v1439_v20 = vpop.permute.xlu0 %1438  ;;  %1621 = vmatpush.msra.mxu2 %v1563_v37  ;;  %v1860_v37 = vld [vmem:[%s5360_s3 + $0x780] sm:$0xff] }
 0x18b   : > { %2759 = vmatmul.msk.f32.gmra.mxu2 %vm773_vm4, %v1263_v33  ;;  %2766 = vmatmul.msk.f32.gmra.mxu3 %vm773_vm4, %v1263_v33  ;;  %v1864_v33 = vld [vmem:[%s5360_s3 + $0x7a0] sm:$0xff] }
 0x18c   : > { %2772 = vmatmul.msk.f32.gmra.mxu0 %vm773_vm4, %v1439_v20  ;;  %2779 = vmatmul.msk.f32.gmra.mxu1 %vm773_vm4, %v1439_v20  ;;  %v1865_v20 = vld [vmem:[%s5360_s3 + $0x7a8] sm:$0xff] }
 0x18d   : > { %1622 = vmatpush.msra.mxu2 %v1561_v46 }
 0x18e   : > { %v912_v43 = vpop.f32.mrf.mxu2  ;;  %v950_v44 = vpop.f32.mrf.mxu3 }
 0x18f   : > { %v4306_v48 = vadd.f32 %v912_v43, %v4054_v51  ;;  %v4309_v34 = vadd.f32 %v950_v44, %v4056_v52  ;;  %v1559_v52 = vld [vmem:[%s5360_s3 + $0x540] sm:$0xff]  ;;  %v4423_v36 = vpop.f32.mrf.mxu1  ;;  %v1858_v43 = vld [vmem:[%s5360_s3 + $0x770] sm:$0xff]  ;;  %v1859_v44 = vld [vmem:[%s5360_s3 + $0x778] sm:$0xff] }
 0x190   : > { %1623 = vmatpush.msra.mxu2 %v1559_v52  ;;  %v1854_v52 = vld [vmem:[%s5360_s3 + $0x750] sm:$0xff] }
 0x192   : > { %v1441_v51 = vpop.permute.xlu1 %1440  ;;  %2837 = vmatpush.msrb.mxu2 %v1870_v21 }
 0x193   : > { %2760 = vmatmul.msk.f32.gmra.mxu2 %vm773_vm4, %v1264_v53  ;;  %2767 = vmatmul.msk.f32.gmra.mxu3 %vm773_vm4, %v1264_v53  ;;  %v1857_v53 = vld [vmem:[%s5360_s3 + $0x768] sm:$0xff] }
 0x194   : > { %2773 = vmatmul.msk.f32.gmra.mxu0 %vm773_vm4, %v1441_v51  ;;  %2780 = vmatmul.msk.f32.gmra.mxu1 %vm773_vm4, %v1441_v51  ;;  %v4421_v35 = vpop.f32.mrf.mxu0 }
 0x196   : > { %v915_v58 = vpop.f32.mrf.mxu2  ;;  %v953_v60 = vpop.f32.mrf.mxu3 }
 0x197   : > { %v4340_v61 = vadd.f32 %v915_v58, %v4099_v8  ;;  %v4343_v14 = vadd.f32 %v953_v60, %v4101_v10  ;;  %v1705_v8 = vld [vmem:[%s5360_s3 + $0x620] sm:$0xff]  ;;  %v1706_v10 = vld [vmem:[%s5360_s3 + $0x628] sm:$0xff]  ;;  %v4455_v51 = vpop.f32.mrf.mxu1 }
 0x198   : > { %1769 = vmatpush.msrb.mxu0 %v1705_v8  ;;  %1807 = vmatpush.msrb.mxu1 %v1706_v10 }
 0x19a   : > { %1902 = vmatpush.msra.mxu1 %v1870_v21  ;;  %v1845_v21 = vld [vmem:[%s5360_s3 + $0x708] sm:$0xff] }
 0x19b   : > { %2761 = vmatmul.msk.f32.gmra.mxu2 %vm773_vm4, %v1265_v1  ;;  %2768 = vmatmul.msk.f32.gmra.mxu3 %vm773_vm4, %v1265_v1  ;;  %v1851_v1 = vld [vmem:[%s5360_s3 + $0x738] sm:$0xff] }
 0x19c   : > { %2774 = vmatmul.msk.f32.gmra.mxu0 %vm773_vm4, %v1443_v2  ;;  %2781 = vmatmul.msk.f32.gmra.mxu1 %vm773_vm4, %v1443_v2  ;;  %v1849_v2 = vld [vmem:[%s5360_s3 + $0x728] sm:$0xff] }
 0x19e   : > { %v918_v4 = vpop.f32.mrf.mxu2  ;;  %v956_v5 = vpop.f32.mrf.mxu3 }
 0x19f   : > { %v4362_v6 = vadd.f32 %v918_v4, %v4123_v24  ;;  %v4365_v39 = vadd.f32 %v956_v5, %v4125_v25  ;;  %v1871_v25 = vld [vmem:[%s5360_s3 + $0x7d8] sm:$0xff]  ;;  %v4493_v10 = vpop.f32.mrf.mxu1 }
 0x1a0   : > { %1940 = vmatpush.msrb.mxu3 %v1871_v25  ;;  %v1844_v25 = vld [vmem:[%s5360_s3 + $0x700] sm:$0xff] }
 0x1a2   : > { %v1445_v28 = vpop.permute.xlu0 %1444 }
 0x1a3   : > { %2762 = vmatmul.msk.f32.gmra.mxu2 %vm773_vm4, %v1266_v11  ;;  %2769 = vmatmul.msk.f32.gmra.mxu3 %vm773_vm4, %v1266_v11  ;;  %v1846_v11 = vld [vmem:[%s5360_s3 + $0x710] sm:$0xff] }
 0x1a4   : > { %2775 = vmatmul.msk.f32.gmra.mxu0 %vm773_vm4, %v1445_v28  ;;  %2782 = vmatmul.msk.f32.gmra.mxu1 %vm773_vm4, %v1445_v28  ;;  %v1847_v28 = vld [vmem:[%s5360_s3 + $0x718] sm:$0xff] }
 0x1a6   : > { %v921_v17 = vpop.f32.mrf.mxu2  ;;  %v959_v18 = vpop.f32.mrf.mxu3 }
 0x1a7   : > { %v4372_v19 = vadd.f32 %v921_v17, %v4133_v15  ;;  %v4375_v24 = vadd.f32 %v959_v18, %v4135_v29  ;;  %v1868_v15 = vld [vmem:[%s5360_s3 + $0x7c0] sm:$0xff]  ;;  %v1869_v29 = vld [vmem:[%s5360_s3 + $0x7c8] sm:$0xff] }
 0x1a8   : > { %2838 = vmatpush.msrb.mxu2 %v1868_v15  ;;  %1941 = vmatpush.msrb.mxu3 %v1869_v29  ;;  %v1701_v18 = vld [vmem:[#allocation2 + $0x48] sm:$0xff] }
 0x1a9   : > { %1903 = vmatpush.msra.mxu1 %v1868_v15 }
 0x1aa   : > { %v1447_v40 = vpop.permute.xlu1 %1446  ;;  %2839 = vmatpush.msrb.mxu2 %v1866_v22  ;;  %1942 = vmatpush.msrb.mxu3 %v1867_v7 }
 0x1ab   : > { %2784 = vmatmul.msk.f32.vlgmr.msra.gmra.mxu2 %vm773_vm4, %v4108_v12  ;;  %2791 = vmatmul.msk.f32.vlgmr.msra.gmra.mxu3 %vm773_vm4, %v4108_v12 }
 0x1ac   : > { %2776 = vmatmul.msk.f32.gmra.mxu0 %vm773_vm4, %v1447_v40  ;;  %2783 = vmatmul.msk.f32.gmra.mxu1 %vm773_vm4, %v1447_v40  ;;  %v3065_v40 = vld [vmem:[#allocation2 + $0x50] sm:$0xff] }
 0x1ad   : > { %1904 = vmatpush.msra.mxu1 %v1866_v22  ;;  %2840 = vmatpush.msrb.mxu2 %v1864_v33 }
 0x1ae   : > { %v924_v26 = vpop.f32.mrf.mxu2  ;;  %v962_v31 = vpop.f32.mrf.mxu3  ;;  %1943 = vmatpush.msrb.mxu3 %v1865_v20  ;;  %v3066_v20 = vld [vmem:[#allocation2 + $0x60] sm:$0xff] }
 0x1af   : > { %v4402_v32 = vadd.f32 %v924_v26, %v4156_v27  ;;  %v4405_v12 = vadd.f32 %v962_v31, %v4158_v45  ;;  %v1862_v27 = vld [vmem:[%s5360_s3 + $0x790] sm:$0xff]  ;;  %v1863_v45 = vld [vmem:[%s5360_s3 + $0x798] sm:$0xff]  ;;  %1905 = vmatpush.msra.mxu1 %v1864_v33  ;;  %v4520_v26 = vpop.f32.mrf.mxu1 }
 0x1b0   : > { %2841 = vmatpush.msrb.mxu2 %v1862_v27  ;;  %1944 = vmatpush.msrb.mxu3 %v1863_v45  ;;  %v1702_v33 = vld [vmem:[#allocation2 + $0x58] sm:$0xff] }
 0x1b1   : > { %1906 = vmatpush.msra.mxu1 %v1862_v27 }
 0x1b2   : > { %2842 = vmatpush.msrb.mxu2 %v1860_v37  ;;  %1945 = vmatpush.msrb.mxu3 %v1861_v38 }
 0x1b3   : > { %2785 = vmatmul.msk.f32.gmra.mxu2 %vm773_vm4, %v3062_v16  ;;  %2792 = vmatmul.msk.f32.gmra.mxu3 %vm773_vm4, %v3062_v16 }
 0x1b4   : > { %2798 = vmatmul.msk.f32.vlgmr.msrb.gmra.mxu0 %vm773_vm4, %v1698_v23  ;;  %2805 = vmatmul.msk.f32.vlgmr.msrb.gmra.mxu1 %vm773_vm4, %v1698_v23  ;;  %v1873_v23 = vpop.permute.xlu2 %1872 }
 0x1b5   : > { %1907 = vmatpush.msra.mxu1 %v1860_v37  ;;  %2843 = vmatpush.msrb.mxu2 %v1858_v43  ;;  %v1703_v37 = vld [vmem:[#allocation2 + $0x68] sm:$0xff] }
 0x1b6   : > { %v927_v41 = vpop.f32.mrf.mxu2  ;;  %v965_v42 = vpop.f32.mrf.mxu3  ;;  %1946 = vmatpush.msrb.mxu3 %v1859_v44 }
 0x1b7   : > { %v4440_v46 = vadd.f32 %v927_v41, %v4202_v63  ;;  %v4443_v47 = vadd.f32 %v965_v42, %v4204_v62  ;;  %1908 = vmatpush.msra.mxu1 %v1858_v43  ;;  %v3063_v63 = vld [vmem:[#allocation2 + $0x30] sm:$0xff]  ;;  %v4453_v62 = vpop.f32.mrf.mxu0  ;;  %2844 = vmatpush.msrb.mxu2 %v1856_v50  ;;  %v1237_v41 = vpop.f32.mrf.mxu1 }
 0x1b8   : > { %1947 = vmatpush.msrb.mxu3 %v1857_v53  ;;  %v1875_v42 = vpop.permute.xlu0 %1874 }
 0x1b9   : > { %1909 = vmatpush.msra.mxu1 %v1856_v50  ;;  %2845 = vmatpush.msrb.mxu2 %v1854_v52 }
 0x1ba   : > { %1948 = vmatpush.msrb.mxu3 %v1855_v54  ;;  %v1877_v54 = vpop.permute.xlu1 %1876 }
 0x1bb   : > { %2786 = vmatmul.msk.f32.gmra.mxu2 %vm773_vm4, %v3063_v63  ;;  %2793 = vmatmul.msk.f32.gmra.mxu3 %vm773_vm4, %v3063_v63  ;;  %v1704_v63 = vld [vmem:[#allocation2 + $0x78] sm:$0xff] }
 0x1bc   : > { %2799 = vmatmul.msk.f32.gmra.mxu0 %vm773_vm4, %v1699_v49  ;;  %2806 = vmatmul.msk.f32.gmra.mxu1 %vm773_vm4, %v1699_v49  ;;  %v1879_v49 = vpop.permute.xlu2 %1878 }
 0x1bd   : > { %1910 = vmatpush.msra.mxu1 %v1854_v52  ;;  %2846 = vmatpush.msrb.mxu2 %v1852_v57 }
 0x1be   : > { %v1041_v55 = vpop.f32.mrf.mxu2  ;;  %v1079_v56 = vpop.f32.mrf.mxu3  ;;  %1949 = vmatpush.msrb.mxu3 %v1853_v59 }
 0x1bf   : > { %v4472_v58 = vadd.f32 %v1041_v55, %v4260_v30  ;;  %v4475_v60 = vadd.f32 %v1079_v56, %v4263_v3  ;;  %1911 = vmatpush.msra.mxu1 %v1852_v57  ;;  %v3064_v30 = vld [vmem:[#allocation2 + $0x40] sm:$0xff]  ;;  %v1193_v8 = vpop.f32.mrf.mxu0  ;;  %2847 = vmatpush.msrb.mxu2 %v1850_v9  ;;  %v1240_v52 = vpop.f32.mrf.mxu1 }
 0x1c0   : > { %v1848_v3 = vld [vmem:[%s5360_s3 + $0x720] sm:$0xff]  ;;  %1950 = vmatpush.msrb.mxu3 %v1851_v1  ;;  %v1881_v57 = vpop.permute.xlu0 %1880 }
 0x1c1   : > { %1912 = vmatpush.msra.mxu1 %v1850_v9  ;;  %2848 = vmatpush.msrb.mxu2 %v1848_v3 }
 0x1c2   : > { %1951 = vmatpush.msrb.mxu3 %v1849_v2 }
 0x1c3   : > { %2787 = vmatmul.msk.f32.gmra.mxu2 %vm773_vm4, %v3064_v30  ;;  %2794 = vmatmul.msk.f32.gmra.mxu3 %vm773_vm4, %v3064_v30 }
 0x1c4   : > { %2800 = vmatmul.msk.f32.gmra.mxu0 %vm773_vm4, %v1700_v0  ;;  %2807 = vmatmul.msk.f32.gmra.mxu1 %vm773_vm4, %v1700_v0 }
 0x1c5   : > { %1913 = vmatpush.msra.mxu1 %v1848_v3  ;;  %2849 = vmatpush.msrb.mxu2 %v1846_v11 }
 0x1c6   : > { %v4495_v4 = vpop.f32.mrf.mxu2  ;;  %v1082_v5 = vpop.f32.mrf.mxu3  ;;  %1952 = vmatpush.msrb.mxu3 %v1847_v28  ;;  %v1247_v28 = vadd.f32 %v4423_v36, %v4475_v60 }
 0x1c7   : > { %v4504_v17 = vadd.f32 %v1082_v5, %v4309_v34  ;;  %1914 = vmatpush.msra.mxu1 %v1846_v11  ;;  %2850 = vmatpush.msrb.mxu2 %v1844_v25  ;;  %v1196_v7 = vpop.f32.mrf.mxu0  ;;  %v1243_v1 = vpop.f32.mrf.mxu1  ;;  %v1246_v11 = vadd.f32 %v4421_v35, %v4472_v58 }
 0x1c8   : > { %1953 = vmatpush.msrb.mxu3 %v1845_v21  ;;  %v1885_v21 = vpop.permute.xlu2 %1884 }
 0x1c9   : > { %1915 = vmatpush.msra.mxu1 %v1844_v25  ;;  %v1249_v36 = vadd.f32 %v4455_v51, %v4504_v17 }
 0x1cb   : > { %2788 = vmatmul.msk.f32.gmra.mxu2 %vm773_vm4, %v3065_v40  ;;  %2795 = vmatmul.msk.f32.gmra.mxu3 %vm773_vm4, %v3065_v40  ;;  %v1102_v40 = vadd.f32 %v4495_v4, %v4306_v48 }
 0x1cc   : > { %2801 = vmatmul.msk.f32.gmra.mxu0 %vm773_vm4, %v1701_v18  ;;  %2808 = vmatmul.msk.f32.gmra.mxu1 %vm773_vm4, %v1701_v18 }
 0x1cd   : > { %v1248_v35 = vadd.f32 %v4453_v62, %v1102_v40  ;;  %v2120_v40 = vld [vmem:[%s5362_s5 + $0x140] sm:$0xff] }
 0x1ce   : > { %v1047_v34 = vpop.f32.mrf.mxu2  ;;  %v1085_v15 = vpop.f32.mrf.mxu3 }
 0x1cf   : > { %v1104_v29 = vadd.f32 %v1047_v34, %v4340_v61  ;;  %v4518_v22 = vadd.f32 %v1085_v15, %v4343_v14  ;;  %v1199_v38 = vpop.f32.mrf.mxu0 }
 0x1d1   : > { %v4522_v31 = vadd.f32 %v1193_v8, %v1104_v29 }
 0x1d3   : > { %2789 = vmatmul.msk.f32.gmra.mxu2 %vm773_vm4, %v3066_v20  ;;  %2796 = vmatmul.msk.f32.gmra.mxu3 %vm773_vm4, %v3066_v20 }
 0x1d4   : > { %2802 = vmatmul.msk.f32.gmra.mxu0 %vm773_vm4, %v1702_v33  ;;  %2809 = vmatmul.msk.f32.gmra.mxu1 %vm773_vm4, %v1702_v33 }
 0x1d6   : > { %v1050_v61 = vpop.f32.mrf.mxu2  ;;  %v1088_v27 = vpop.f32.mrf.mxu3 }
 0x1d7   : > { %v1106_v14 = vadd.f32 %v1050_v61, %v4362_v6  ;;  %v4530_v45 = vadd.f32 %v1088_v27, %v4365_v39  ;;  %v1251_v27 = vadd.f32 %v4493_v10, %v4518_v22 }
 0x1d9   : > { %v4532_v16 = vadd.f32 %v1196_v7, %v1106_v14 }
 0x1db   : > { %2790 = vmatmul.msk.f32.gmra.mxu2 %vm773_vm4, %v4235_v13  ;;  %2797 = vmatmul.msk.f32.gmra.mxu3 %vm773_vm4, %v4235_v13  ;;  %v1202_v13 = vpop.f32.mrf.mxu0 }
 0x1dc   : > { %2803 = vmatmul.msk.f32.gmra.mxu0 %vm773_vm4, %v1703_v37  ;;  %2810 = vmatmul.msk.f32.gmra.mxu1 %vm773_vm4, %v1703_v37 }
 0x1de   : > { %v1053_v6 = vpop.f32.mrf.mxu2  ;;  %v1091_v43 = vpop.f32.mrf.mxu3 }
 0x1df   : > { %v1108_v39 = vadd.f32 %v1053_v6, %v4372_v19  ;;  %v1109_v44 = vadd.f32 %v1091_v43, %v4375_v24  ;;  %v1253_v6 = vadd.f32 %v4520_v26, %v4530_v45 }
 0x1e1   : > { %v4542_v50 = vadd.f32 %v1199_v38, %v1108_v39  ;;  %v4544_v53 = vadd.f32 %v1237_v41, %v1109_v44 }
 0x1e3   : > { %2815 = vmatmul.msk.f32.vlgmr.msrb.gmra.mxu2 %vm773_vm4, %v1879_v49  ;;  %2819 = vmatmul.msk.f32.vlgmr.msrb.gmra.mxu3 %vm773_vm4, %v1873_v23  ;;  %v1205_v9 = vpop.f32.mrf.mxu0 }
 0x1e4   : > { %2804 = vmatmul.msk.f32.gmra.mxu0 %vm773_vm4, %v1704_v63  ;;  %2811 = vmatmul.msk.f32.gmra.mxu1 %vm773_vm4, %v1704_v63 }
 0x1e6   : > { %v1056_v19 = vpop.f32.mrf.mxu2  ;;  %v1094_v55 = vpop.f32.mrf.mxu3 }
 0x1e7   : > { %v1110_v24 = vadd.f32 %v1056_v19, %v4402_v32  ;;  %v1111_v56 = vadd.f32 %v1094_v55, %v4405_v12  ;;  %v1883_v12 = vpop.permute.xlu1 %1882 }
 0x1e9   : > { %v4552_v59 = vadd.f32 %v1202_v13, %v1110_v24  ;;  %v4554_v0 = vadd.f32 %v1240_v52, %v1111_v56 }
 0x1eb   : > { %2816 = vmatmul.msk.f32.gmra.mxu2 %vm773_vm4, %v1881_v57  ;;  %2820 = vmatmul.msk.f32.gmra.mxu3 %vm773_vm4, %v1875_v42 }
 0x1ec   : > { %2812 = vmatmul.msk.f32.vlgmr.msra.gmra.mxu1 %vm773_vm4, %v1873_v23 }
 0x1ee   : > { %v1059_v30 = vpop.f32.mrf.mxu2  ;;  %v1097_v3 = vpop.f32.mrf.mxu3 }
 0x1ef   : > { %v1112_v2 = vadd.f32 %v1059_v30, %v4440_v46  ;;  %v1113_v32 = vadd.f32 %v1097_v3, %v4443_v47 }
 0x1f1   : > { %v4561_v8 = vadd.f32 %v1205_v9, %v1112_v2  ;;  %v4563_v5 = vadd.f32 %v1243_v1, %v1113_v32 }
 0x1f3   : > { %2817 = vmatmul.msk.f32.gmra.mxu2 %vm773_vm4, %v1883_v12  ;;  %2821 = vmatmul.msk.f32.gmra.mxu3 %vm773_vm4, %v1877_v54 }
 0x1f4   : > { %2813 = vmatmul.msk.f32.gmra.mxu1 %vm773_vm4, %v1875_v42 }
 0x1f6   : > { %v1333_v46 = vpop.f32.mrf.mxu2  ;;  %v1371_v18 = vpop.f32.mrf.mxu3 }
 0x1f7   : > { %v1392_v47 = vadd.f32 %v1333_v46, %v1246_v11  ;;  %v1393_v25 = vadd.f32 %v1371_v18, %v1247_v28 }
 0x1f9   : > { %v1479_v34 = vpop.f32.mrf.mxu0  ;;  %v1517_v15 = vpop.f32.mrf.mxu1 }
 0x1fa   : > { %v4574_v29 = vadd.f32 %v1479_v34, %v1392_v47  ;;  %v4576_v7 = vadd.f32 %v1517_v15, %v1393_v25  ;;  %v2121_v47 = vld [vmem:[%s5362_s5 + $0x148] sm:$0xff]  ;;  %v2310_v34 = vld [vmem:[%s5362_s5 + $0x318] sm:$0xff] }
 0x1fb   : > { %2818 = vmatmul.msk.f32.gmra.mxu2 %vm773_vm4, %v1885_v21  ;;  %2822 = vmatmul.msk.f32.gmra.mxu3 %vm773_vm4, %v1879_v49  ;;  %v2119_v15 = vld [vmem:[%s5362_s5 + $0x138] sm:$0xff] }
 0x1fc   : > { %2814 = vmatmul.msk.f32.gmra.mxu1 %vm773_vm4, %v1877_v54  ;;  %2326 = vmatpush.msra.mxu3 %v2310_v34  ;;  %v2128_v34 = vld [vmem:[%s5362_s5 + $0x180] sm:$0xff] }
 0x1fe   : > { %v1336_v58 = vpop.f32.mrf.mxu2  ;;  %v1374_v60 = vpop.f32.mrf.mxu3 }
 0x1ff   : > { %v1394_v48 = vadd.f32 %v1336_v58, %v1248_v35  ;;  %v1395_v4 = vadd.f32 %v1374_v60, %v1249_v36  ;;  %v2308_v35 = vld [vmem:[%s5362_s5 + $0x308] sm:$0xff] }
 0x200   : > { %v2117_v60 = vld [vmem:[%s5362_s5 + $0x128] sm:$0xff] }
 0x201   : > { %v1482_v33 = vpop.f32.mrf.mxu0  ;;  %v1520_v20 = vpop.f32.mrf.mxu1 }
 0x202   : > { %v4584_v23 = vadd.f32 %v1482_v33, %v1394_v48  ;;  %v4586_v61 = vadd.f32 %v1520_v20, %v1395_v4  ;;  %v2307_v48 = vld [vmem:[%s5362_s5 + $0x300] sm:$0xff]  ;;  %v2135_v20 = vld [vmem:[%s5362_s5 + $0x1b8] sm:$0xff] }
 0x203   : > { %2823 = vmatmul.msk.f32.gmra.mxu3 %vm773_vm4, %v1881_v57  ;;  %v2116_v33 = vld [vmem:[%s5362_s5 + $0x120] sm:$0xff]  ;;  %2164 = vmatpush.msrb.mxu1 %v2135_v20  ;;  %v2126_v20 = vld [vmem:[%s5362_s5 + $0x170] sm:$0xff] }
 0x206   : > { %v1339_v14 = vpop.f32.mrf.mxu2  ;;  %v1377_v62 = vpop.f32.mrf.mxu3 }
 0x207   : > { %v1396_v37 = vadd.f32 %v1339_v14, %v4522_v31  ;;  %v1397_v51 = vadd.f32 %v1377_v62, %v1251_v27  ;;  %v2306_v27 = vld [vmem:[%s5362_s5 + $0x2f8] sm:$0xff]  ;;  %v2134_v62 = vld [vmem:[%s5362_s5 + $0x1b0] sm:$0xff] }
 0x208   : > { %v2115_v14 = vld [vmem:[%s5362_s5 + $0x118] sm:$0xff]  ;;  %2165 = vmatpush.msrb.mxu1 %v2134_v62 }
 0x209   : > { %v1485_v17 = vpop.f32.mrf.mxu0  ;;  %v1523_v38 = vpop.f32.mrf.mxu1 }
 0x20a   : > { %v4592_v41 = vadd.f32 %v1485_v17, %v1396_v37  ;;  %v4594_v42 = vadd.f32 %v1523_v38, %v1397_v51  ;;  %v2238_v37 = vld [vmem:[%s5362_s5 + $0x238] sm:$0xff]  ;;  %v2305_v51 = vld [vmem:[%s5362_s5 + $0x2f0] sm:$0xff]  ;;  %v2133_v38 = vld [vmem:[%s5362_s5 + $0x1a8] sm:$0xff] }
 0x20b   : > { %2824 = vmatmul.msk.f32.gmra.mxu3 %vm773_vm4, %v1883_v12  ;;  %2254 = vmatpush.msra.mxu2 %v2238_v37  ;;  %v2114_v17 = vld [vmem:[%s5362_s5 + $0x110] sm:$0xff] }
 0x20c   : > { %2166 = vmatpush.msrb.mxu1 %v2133_v38  ;;  %v2125_v38 = vld [vmem:[%s5362_s5 + $0x168] sm:$0xff] }
 0x20e   : > { %v1342_v43 = vpop.f32.mrf.mxu2  ;;  %v1380_v39 = vpop.f32.mrf.mxu3 }
 0x20f   : > { %v4600_v10 = vadd.f32 %v1342_v43, %v4532_v16  ;;  %v1399_v22 = vadd.f32 %v1380_v39, %v1253_v6  ;;  %v2237_v6 = vld [vmem:[%s5362_s5 + $0x230] sm:$0xff]  ;;  %v2304_v43 = vld [vmem:[%s5362_s5 + $0x2e8] sm:$0xff] }
 0x210   : > { %2255 = vmatpush.msra.mxu2 %v2237_v6  ;;  %v2229_v6 = vld [vmem:[%s5362_s5 + $0x1f0] sm:$0xff] }
 0x211   : > { %v4602_v44 = vpop.f32.mrf.mxu0  ;;  %v1526_v31 = vpop.f32.mrf.mxu1 }
 0x212   : > { %v4604_v49 = vadd.f32 %v1526_v31, %v1399_v22 }
 0x213   : > { %2825 = vmatmul.msk.f32.gmra.mxu3 %vm773_vm4, %v1885_v21 }
 0x216   : > { %v1345_v63 = vpop.f32.mrf.mxu2  ;;  %v1383_v13 = vpop.f32.mrf.mxu3 }
 0x217   : > { %v1400_v52 = vadd.f32 %v1345_v63, %v4542_v50  ;;  %v1401_v54 = vadd.f32 %v1383_v13, %v4544_v53  ;;  %v2113_v13 = vld [vmem:[%s5362_s5 + $0x108] sm:$0xff] }
 0x219   : > { %v1491_v26 = vpop.f32.mrf.mxu0  ;;  %v1529_v45 = vpop.f32.mrf.mxu1 }
 0x21a   : > { %v4609_v19 = vadd.f32 %v1491_v26, %v1400_v52  ;;  %v4611_v16 = vadd.f32 %v1529_v45, %v1401_v54  ;;  %v2132_v52 = vld [vmem:[%s5362_s5 + $0x1a0] sm:$0xff]  ;;  %v2236_v54 = vld [vmem:[%s5362_s5 + $0x228] sm:$0xff] }
 0x21b   : > { %2256 = vmatpush.msra.mxu2 %v2236_v54  ;;  %2167 = vmatpush.msrb.mxu1 %v2132_v52  ;;  %v2295_v52 = vld [vmem:[%s5362_s5 + $0x2a0] sm:$0xff] }
 0x21c   : > { %v2092_v54 = vld [vmem:[%s5362_s5 + $0x60] sm:$0xff] }
 0x21e   : > { %v1348_v55 = vpop.f32.mrf.mxu2  ;;  %v1386_v24 = vpop.f32.mrf.mxu3 }
 0x21f   : > { %v4614_v56 = vadd.f32 %v1348_v55, %v4552_v59  ;;  %v1403_v57 = vadd.f32 %v1386_v24, %v4554_v0  ;;  %v2123_v59 = vld [vmem:[%s5362_s5 + $0x158] sm:$0xff]  ;;  %v2122_v0 = vld [vmem:[%s5362_s5 + $0x150] sm:$0xff]  ;;  %v2112_v55 = vld [vmem:[%s5362_s5 + $0x100] sm:$0xff] }
 0x220   : > { %2140 = vmatpush.msra.mxu0 %v2123_v59  ;;  %v2131_v24 = vld [vmem:[%s5362_s5 + $0x198] sm:$0xff]  ;;  %v2233_v59 = vld [vmem:[%s5362_s5 + $0x210] sm:$0xff] }
 0x221   : > { %v4617_v9 = vpop.f32.mrf.mxu0  ;;  %v1532_v1 = vpop.f32.mrf.mxu1  ;;  %2168 = vmatpush.msrb.mxu1 %v2131_v24  ;;  %v2227_v24 = vld [vmem:[%s5362_s5 + $0x1e0] sm:$0xff] }
 0x222   : > { %v4619_v30 = vadd.f32 %v1532_v1, %v1403_v57  ;;  %2141 = vmatpush.msra.mxu0 %v2122_v0  ;;  %v2235_v57 = vld [vmem:[%s5362_s5 + $0x220] sm:$0xff]  ;;  %v2302_v1 = vld [vmem:[%s5362_s5 + $0x2d8] sm:$0xff]  ;;  %v2300_v0 = vld [vmem:[%s5362_s5 + $0x2c8] sm:$0xff] }
 0x223   : > { %2257 = vmatpush.msra.mxu2 %v2235_v57  ;;  %v2091_v57 = vld [vmem:[%s5362_s5 + $0x58] sm:$0xff] }
 0x224   : > { %2142 = vmatpush.msra.mxu0 %v2121_v47 }
 0x226   : > { %v1351_v50 = vpop.f32.mrf.mxu2  ;;  %v1389_v53 = vpop.f32.mrf.mxu3  ;;  %2143 = vmatpush.msra.mxu0 %v2120_v40  ;;  %v2109_v40 = vld [vmem:[%s5362_s5 + $0xe8] sm:$0xff] }
 0x227   : > { %v1404_v3 = vadd.f32 %v1351_v50, %v4561_v8  ;;  %v1405_v2 = vadd.f32 %v1389_v53, %v4563_v5  ;;  %v2111_v50 = vld [vmem:[%s5362_s5 + $0xf8] sm:$0xff]  ;;  %v2130_v53 = vld [vmem:[%s5362_s5 + $0x190] sm:$0xff] }
 0x228   : > { %2144 = vmatpush.msra.mxu0 %v2119_v15  ;;  %2169 = vmatpush.msrb.mxu1 %v2130_v53  ;;  %v2232_v15 = vld [vmem:[%s5362_s5 + $0x208] sm:$0xff]  ;;  %v2226_v53 = vld [vmem:[%s5362_s5 + $0x1d8] sm:$0xff] }
 0x229   : > { %v1497_v32 = vpop.f32.mrf.mxu0  ;;  %v1535_v12 = vpop.f32.mrf.mxu1 }
 0x22a   : > { %v4623_v11 = vadd.f32 %v1497_v32, %v1404_v3  ;;  %v4625_v28 = vadd.f32 %v1535_v12, %v1405_v2  ;;  %v2234_v3 = vld [vmem:[%s5362_s5 + $0x218] sm:$0xff]  ;;  %v2301_v2 = vld [vmem:[%s5362_s5 + $0x2d0] sm:$0xff]  ;;  %v2129_v12 = vld [vmem:[%s5362_s5 + $0x188] sm:$0xff] }
 0x22b   : > { %v2110_v32 = vld [vmem:[%s5362_s5 + $0xf0] sm:$0xff]  ;;  %2258 = vmatpush.msra.mxu2 %v2234_v3  ;;  %2170 = vmatpush.msrb.mxu1 %v2129_v12  ;;  %v2105_v12 = vld [vmem:[%s5362_s5 + $0xc8] sm:$0xff] }
 0x22d   : > { %2259 = vmatpush.msra.mxu2 %v2233_v59  ;;  %2171 = vmatpush.msrb.mxu1 %v2128_v34  ;;  %v2452_v59 = vld [vmem:[%s5362_s5 + $0x4c8] sm:$0xff] }
 0x22e   : > { %v1625_v46 = vpop.f32.mrf.mxu2  ;;  %v1663_v8 = vpop.f32.mrf.mxu3  ;;  %v2224_v34 = vld [vmem:[%s5362_s5 + $0x1c8] sm:$0xff] }
 0x22f   : > { %v4634_v5 = vadd.f32 %v1625_v46, %v4574_v29  ;;  %v1685_v18 = vadd.f32 %v1663_v8, %v4576_v7  ;;  %v2309_v29 = vld [vmem:[%s5362_s5 + $0x310] sm:$0xff]  ;;  %2260 = vmatpush.msra.mxu2 %v2232_v15 }
 0x230   : > { %v2118_v7 = vld [vmem:[%s5362_s5 + $0x130] sm:$0xff]  ;;  %2327 = vmatpush.msra.mxu3 %v2309_v29  ;;  %v2299_v29 = vld [vmem:[%s5362_s5 + $0x2c0] sm:$0xff] }
 0x231   : > { %v1809_v25 = vpop.f32.mrf.mxu1  ;;  %2145 = vmatpush.msra.mxu0 %v2118_v7  ;;  %v4707_v31 = vpop.f32.mrf.mxu0  ;;  %v2108_v7 = vld [vmem:[%s5362_s5 + $0xe0] sm:$0xff] }
 0x232   : > { %v4640_v21 = vadd.f32 %v1809_v25, %v1685_v18  ;;  %2328 = vmatpush.msra.mxu3 %v2308_v35  ;;  %v2127_v35 = vld [vmem:[%s5362_s5 + $0x178] sm:$0xff] }
 0x233   : > { %2146 = vmatpush.msra.mxu0 %v2117_v60  ;;  %v2231_v60 = vld [vmem:[%s5362_s5 + $0x200] sm:$0xff]  ;;  %2172 = vmatpush.msrb.mxu1 %v2127_v35  ;;  %v2450_v35 = vld [vmem:[%s5362_s5 + $0x4b8] sm:$0xff] }
 0x234   : > { %2329 = vmatpush.msra.mxu3 %v2307_v48  ;;  %v2298_v48 = vld [vmem:[%s5362_s5 + $0x2b8] sm:$0xff]  ;;  %2261 = vmatpush.msra.mxu2 %v2231_v60  ;;  %v2223_v60 = vld [vmem:[%s5362_s5 + $0x1c0] sm:$0xff] }
 0x235   : > { %2147 = vmatpush.msra.mxu0 %v2116_v33  ;;  %v2095_v33 = vld [vmem:[%s5362_s5 + $0x78] sm:$0xff]  ;;  %2173 = vmatpush.msrb.mxu1 %v2126_v20 }
 0x236   : > { %v4660_v36 = vpop.f32.mrf.mxu2  ;;  %v4662_v58 = vpop.f32.mrf.mxu3  ;;  %2330 = vmatpush.msra.mxu3 %v2306_v27  ;;  %v2230_v27 = vld [vmem:[%s5362_s5 + $0x1f8] sm:$0xff] }
 0x237   : > { %2148 = vmatpush.msra.mxu0 %v2115_v14  ;;  %v2297_v14 = vld [vmem:[%s5362_s5 + $0x2b0] sm:$0xff]  ;;  %2262 = vmatpush.msra.mxu2 %v2230_v27  ;;  %v2394_v20 = vld [vmem:[%s5362_s5 + $0x458] sm:$0xff] }
 0x238   : > { %2331 = vmatpush.msra.mxu3 %v2305_v51  ;;  %v2094_v51 = vld [vmem:[%s5362_s5 + $0x70] sm:$0xff]  ;;  %2174 = vmatpush.msrb.mxu1 %v2125_v38 }
 0x239   : > { %v4670_v4 = vpop.f32.mrf.mxu1  ;;  %2149 = vmatpush.msra.mxu0 %v2114_v17  ;;  %v4763_v47 = vpop.f32.mrf.mxu0  ;;  %2263 = vmatpush.msra.mxu2 %v2229_v6  ;;  %v2086_v38 = vld [vmem:[%s5362_s5 + $0x30] sm:$0xff]  ;;  %v2101_v6 = vld [vmem:[%s5362_s5 + $0xa8] sm:$0xff] }
 0x23a   : > { %2332 = vmatpush.msra.mxu3 %v2304_v43  ;;  %v2296_v43 = vld [vmem:[%s5362_s5 + $0x2a8] sm:$0xff] }
 0x23b   : > { %2150 = vmatpush.msra.mxu0 %v2113_v13  ;;  %v2228_v13 = vld [vmem:[%s5362_s5 + $0x1e8] sm:$0xff] }
 0x23c   : > { %2264 = vmatpush.msra.mxu2 %v2228_v13  ;;  %v2448_v13 = vld [vmem:[%s5362_s5 + $0x4a8] sm:$0xff] }
 0x23d   : > { %2151 = vmatpush.msra.mxu0 %v2112_v55 }
 0x23e   : > { %v4705_v39 = vpop.f32.mrf.mxu2  ;;  %v1669_v22 = vpop.f32.mrf.mxu3  ;;  %2265 = vmatpush.msra.mxu2 %v2227_v24 }
 0x23f   : > { %v1689_v63 = vadd.f32 %v1669_v22, %v4594_v42  ;;  %v2303_v42 = vld [vmem:[%s5362_s5 + $0x2e0] sm:$0xff]  ;;  %2152 = vmatpush.msra.mxu0 %v2111_v50  ;;  %v2453_v50 = vld [vmem:[%s5362_s5 + $0x4d0] sm:$0xff] }
 0x240   : > { %2333 = vmatpush.msra.mxu3 %v2303_v42  ;;  %v2107_v42 = vld [vmem:[%s5362_s5 + $0xd8] sm:$0xff]  ;;  %2266 = vmatpush.msra.mxu2 %v2226_v53 }
 0x241   : > { %v1815_v26 = vpop.f32.mrf.mxu1  ;;  %2153 = vmatpush.msra.mxu0 %v2110_v32  ;;  %v4843_v55 = vpop.f32.mrf.mxu0  ;;  %v2090_v32 = vld [vmem:[%s5362_s5 + $0x50] sm:$0xff]  ;;  %v2083_v53 = vld [vmem:[%s5362_s5 + $0x18] sm:$0xff] }
 0x242   : > { %v4722_v45 = vadd.f32 %v1815_v26, %v1689_v63  ;;  %2334 = vmatpush.msra.mxu3 %v2302_v1  ;;  %v2124_v63 = vld [vmem:[%s5362_s5 + $0x160] sm:$0xff]  ;;  %v2454_v26 = vld [vmem:[%s5362_s5 + $0x4d8] sm:$0xff]  ;;  %v2106_v1 = vld [vmem:[%s5362_s5 + $0xd0] sm:$0xff] }
 0x243   : > { %2154 = vmatpush.msra.mxu0 %v2109_v40  ;;  %2175 = vmatpush.msrb.mxu1 %v2124_v63 }
 0x244   : > { %2335 = vmatpush.msra.mxu3 %v2301_v2 }
 0x245   : > { %2155 = vmatpush.msra.mxu0 %v2108_v7  ;;  %2207 = vmatpush.msra.mxu1 %v2107_v42  ;;  %v2103_v7 = vld [vmem:[%s5362_s5 + $0xb8] sm:$0xff]  ;;  %v1990_v42 = vld [vmem:[%s5361_s4] sm:$0x3] }
 0x246   : > { %v4760_v46 = vpop.f32.mrf.mxu2  ;;  %v1672_v8 = vpop.f32.mrf.mxu3  ;;  %2336 = vmatpush.msra.mxu3 %v2300_v0 }
 0x247   : > { %v1691_v18 = vadd.f32 %v1672_v8, %v4604_v49  ;;  %2183 = vmatpush.msrb.mxu0 %v2095_v33  ;;  %2208 = vmatpush.msra.mxu1 %v2106_v1  ;;  %v2225_v8 = vld [vmem:[%s5362_s5 + $0x1d0] sm:$0xff]  ;;  %v2391_v1 = vld [vmem:[%s5362_s5 + $0x440] sm:$0xff] }
 0x248   : > { %2337 = vmatpush.msra.mxu3 %v2299_v29  ;;  %2267 = vmatpush.msra.mxu2 %v2225_v8  ;;  %v2088_v29 = vld [vmem:[%s5362_s5 + $0x40] sm:$0xff]  ;;  %v2102_v33 = vld [vmem:[%s5362_s5 + $0xb0] sm:$0xff] }
 0x249   : > { %v1818_v25 = vpop.f32.mrf.mxu1  ;;  %2184 = vmatpush.msrb.mxu0 %v2094_v51  ;;  %2209 = vmatpush.msra.mxu1 %v2105_v12  ;;  %v1780_v27 = vpop.f32.mrf.mxu0 }
 0x24a   : > { %v4774_v49 = vadd.f32 %v1818_v25, %v1691_v18  ;;  %2338 = vmatpush.msra.mxu3 %v2298_v48  ;;  %v2089_v18 = vld [vmem:[%s5362_s5 + $0x48] sm:$0xff]  ;;  %v2104_v25 = vld [vmem:[%s5362_s5 + $0xc0] sm:$0xff]  ;;  %2268 = vmatpush.msra.mxu2 %v2224_v34  ;;  %v2087_v48 = vld [vmem:[%s5362_s5 + $0x38] sm:$0xff] }
 0x24b   : > { %2210 = vmatpush.msra.mxu1 %v2104_v25  ;;  %v2082_v25 = vld [vmem:[%s5362_s5 + $0x10] sm:$0xff] }
 0x24c   : > { %2339 = vmatpush.msra.mxu3 %v2297_v14  ;;  %2269 = vmatpush.msra.mxu2 %v2223_v60  ;;  %v2449_v14 = vld [vmem:[%s5362_s5 + $0x4b0] sm:$0xff]  ;;  %v2081_v60 = vld [vmem:[%s5362_s5 + $0x8] sm:$0xff] }
 0x24d   : > { %2211 = vmatpush.msra.mxu1 %v2103_v7  ;;  %v1687_v7 = vadd.f32 %v4662_v58, %v4586_v61  ;;  %v2443_v61 = vld [vmem:[%s5362_s5 + $0x480] sm:$0xff] }
 0x24e   : > { %v1637_v62 = vpop.f32.mrf.mxu2  ;;  %v4803_v37 = vpop.f32.mrf.mxu3  ;;  %2340 = vmatpush.msra.mxu3 %v2296_v43  ;;  %v2393_v43 = vld [vmem:[%s5362_s5 + $0x450] sm:$0xff]  ;;  %2422 = vmatpush.msrb.mxu2 %v2394_v20 }
 0x24f   : > { %v4809_v17 = vadd.f32 %v1637_v62, %v4609_v19  ;;  %v2093_v19 = vld [vmem:[%s5362_s5 + $0x68] sm:$0xff]  ;;  %2212 = vmatpush.msra.mxu1 %v2102_v33 }
 0x250   : > { %2185 = vmatpush.msrb.mxu0 %v2093_v19  ;;  %2341 = vmatpush.msra.mxu3 %v2295_v52  ;;  %v1544_v19 = vadd.f32 %v4602_v44, %v4600_v10  ;;  %v2085_v52 = vld [vmem:[%s5362_s5 + $0x28] sm:$0xff] }
 0x251   : > { %v4823_v22 = vpop.f32.mrf.mxu1  ;;  %2213 = vmatpush.msra.mxu1 %v2101_v6  ;;  %v2392_v10 = vld [vmem:[%s5362_s5 + $0x448] sm:$0xff]  ;;  %2423 = vmatpush.msrb.mxu2 %v2393_v43  ;;  %v1686_v6 = vadd.f32 %v4660_v36, %v4584_v23  ;;  %v1833_v43 = vadd.f32 %v4670_v4, %v1687_v7  ;;  %v2441_v23 = vld [vmem:[%s5362_s5 + $0x470] sm:$0xff]  ;;  %v1548_v36 = vadd.f32 %v4617_v9, %v4614_v56 }
 0x252   : > { %2186 = vmatpush.msrb.mxu0 %v2092_v54  ;;  %2470 = vmatpush.msrb.mxu3 %v2454_v26  ;;  %v2100_v54 = vld [vmem:[%s5362_s5 + $0xa0] sm:$0xff]  ;;  %v1690_v44 = vadd.f32 %v4760_v46, %v1544_v19  ;;  %v2099_v46 = vld [vmem:[%s5362_s5 + $0x98] sm:$0xff]  ;;  %v2388_v33 = vld [vmem:[%s5362_s5 + $0x428] sm:$0xff]  ;;  %v1830_v4 = vadd.f32 %v4707_v31, %v4634_v5 }
 0x253   : > { %v2447_v26 = vld [vmem:[%s5362_s5 + $0x4a0] sm:$0xff]  ;;  %2214 = vmatpush.msra.mxu1 %v2100_v54  ;;  %2424 = vmatpush.msrb.mxu2 %v2392_v10  ;;  %v2386_v54 = vld [vmem:[%s5362_s5 + $0x418] sm:$0xff]  ;;  %v1832_v56 = vadd.f32 %v4763_v47, %v1686_v6 }
 0x254   : > { %2187 = vmatpush.msrb.mxu0 %v2091_v57  ;;  %2471 = vmatpush.msrb.mxu3 %v2453_v50  ;;  %v2084_v57 = vld [vmem:[%s5362_s5 + $0x20] sm:$0xff]  ;;  %v2446_v50 = vld [vmem:[%s5362_s5 + $0x498] sm:$0xff]  ;;  %v1836_v12 = vadd.f32 %v1780_v27, %v1690_v44 }
 0x255   : > { %2215 = vmatpush.msra.mxu1 %v2099_v46  ;;  %2425 = vmatpush.msrb.mxu2 %v2391_v1  ;;  %v2384_v1 = vld [vmem:[%s5362_s5 + $0x408] sm:$0xff]  ;;  %v2439_v47 = vld [vmem:[%s5362_s5 + $0x460] sm:$0xff] }
 0x256   : > { %v4860_v3 = vpop.f32.mrf.mxu2  ;;  %v1678_v2 = vpop.f32.mrf.mxu3  ;;  %2188 = vmatpush.msrb.mxu0 %v2090_v32  ;;  %2472 = vmatpush.msrb.mxu3 %v2452_v59  ;;  %v2390_v32 = vld [vmem:[%s5362_s5 + $0x438] sm:$0xff]  ;;  %v4969_v59 = vperm.slane %v1990_v42, 0 }
 0x257   : > { %v1695_v0 = vadd.f32 %v1678_v2, %v4619_v30  ;;  %v2451_v30 = vld [vmem:[%s5362_s5 + $0x4c0] sm:$0xff]  ;;  %v2098_v2 = vld [vmem:[%s5362_s5 + $0x90] sm:$0xff]  ;;  %2426 = vmatpush.msrb.mxu2 %v2390_v32  ;;  %v1694_v9 = vadd.f32 %v4860_v3, %v1548_v36  ;;  %v1688_v32 = vadd.f32 %v4705_v39, %v4592_v41 }
 0x258   : > { %2189 = vmatpush.msrb.mxu0 %v2089_v18  ;;  %2473 = vmatpush.msrb.mxu3 %v2451_v30  ;;  %v2097_v30 = vld [vmem:[%s5362_s5 + $0x88] sm:$0xff] }
 0x259   : > { %v1824_v40 = vpop.f32.mrf.mxu1  ;;  %2216 = vmatpush.msra.mxu1 %v2098_v2  ;;  %v2383_v2 = vld [vmem:[%s5362_s5 + $0x400] sm:$0xff] }
 0x25a   : > { %v4887_v15 = vadd.f32 %v1824_v40, %v1695_v0  ;;  %2190 = vmatpush.msrb.mxu0 %v2088_v29  ;;  %2474 = vmatpush.msrb.mxu3 %v2450_v35  ;;  %v2445_v0 = vld [vmem:[%s5362_s5 + $0x490] sm:$0xff]  ;;  %v2444_v29 = vld [vmem:[%s5362_s5 + $0x488] sm:$0xff]  ;;  %v1783_v35 = vpop.f32.mrf.mxu0 }
 0x25b   : > { %v2389_v40 = vld [vmem:[%s5362_s5 + $0x430] sm:$0xff]  ;;  %2217 = vmatpush.msra.mxu1 %v2097_v30  ;;  %v1838_v19 = vadd.f32 %v1783_v35, %v4809_v17 }
 0x25c   : > { %2191 = vmatpush.msrb.mxu0 %v2087_v48  ;;  %2475 = vmatpush.msrb.mxu3 %v2449_v14  ;;  %v2096_v48 = vld [vmem:[%s5362_s5 + $0x80] sm:$0xff] }
 0x25d   : > { %2427 = vmatpush.msrb.mxu2 %v2389_v40  ;;  %2218 = vmatpush.msra.mxu1 %v2096_v48  ;;  %v2080_v14 = vld [vmem:[%s5362_s5] sm:$0xff] }
 0x25e   : > { %v4913_v62 = vpop.f32.mrf.mxu2  ;;  %v1681_v51 = vpop.f32.mrf.mxu3  ;;  %2192 = vmatpush.msrb.mxu0 %v2086_v38  ;;  %2476 = vmatpush.msrb.mxu3 %v2448_v13  ;;  %v2442_v38 = vld [vmem:[%s5362_s5 + $0x478] sm:$0xff] }
 0x25f   : > { %v1697_v63 = vadd.f32 %v1681_v51, %v4625_v28  ;;  %2428 = vmatpush.msrb.mxu2 %v2388_v33  ;;  %v2387_v51 = vld [vmem:[%s5362_s5 + $0x420] sm:$0xff] }
 0x260   : > { %2193 = vmatpush.msrb.mxu0 %v2085_v52  ;;  %2477 = vmatpush.msrb.mxu3 %v2447_v26  ;;  %v5015_v52 = vperm.slane %v1990_v42, 1  ;;  %v2440_v42 = vld [vmem:[%s5362_s5 + $0x468] sm:$0xff] }
 0x261   : > { %v1827_v28 = vpop.f32.mrf.mxu1  ;;  %2429 = vmatpush.msrb.mxu2 %v2387_v51 }
 0x262   : > { %v4946_v24 = vadd.f32 %v1827_v28, %v1697_v63  ;;  %2194 = vmatpush.msrb.mxu0 %v2084_v57  ;;  %2478 = vmatpush.msrb.mxu3 %v2446_v50  ;;  %v2385_v28 = vld [vmem:[%s5362_s5 + $0x410] sm:$0xff]  ;;  %v1786_v3 = vpop.f32.mrf.mxu0 }
 0x263   : > { %2430 = vmatpush.msrb.mxu2 %v2386_v54  ;;  %v1693_v54 = vadd.f32 %v4803_v37, %v4611_v16 }
 0x264   : > { %2195 = vmatpush.msrb.mxu0 %v2083_v53  ;;  %2479 = vmatpush.msrb.mxu3 %v2445_v0 }
 0x265   : > { %2431 = vmatpush.msrb.mxu2 %v2385_v28 }
 0x266   : > { %v1926_v8 = vpop.f32.mrf.mxu2  ;;  %v1955_v18 = vpop.f32.mrf.mxu3  ;;  %2196 = vmatpush.msrb.mxu0 %v2082_v25  ;;  %2480 = vmatpush.msrb.mxu3 %v2444_v29 }
 0x267   : > { %v1982_v34 = vadd.f32 %v1926_v8, %v1836_v12  ;;  %v1977_v13 = vadd.f32 %v1955_v18, %v4640_v21  ;;  %2432 = vmatpush.msrb.mxu2 %v2384_v1  ;;  %v1840_v18 = vadd.f32 %v1786_v3, %v1694_v9  ;;  %v2249_v3 = vld [vmem:[%s5362_s5 + $0x290] sm:$0xff] }
 0x268   : > { %2197 = vmatpush.msrb.mxu0 %v2081_v60  ;;  %2481 = vmatpush.msrb.mxu3 %v2443_v61  ;;  %v1834_v60 = vadd.f32 %v4843_v55, %v1688_v32  ;;  %v1696_v32 = vadd.f32 %v4913_v62, %v4623_v11  ;;  %v2247_v11 = vld [vmem:[%s5362_s5 + $0x280] sm:$0xff]  ;;  %v2320_v62 = vld [vmem:[%s5362_s5 + $0x368] sm:$0xff] }
 0x269   : > { %v2002_v20 = vadd.f32 %v4969_v59, %v1982_v34  ;;  %v1917_v27 = vpop.f32.mrf.mxu1  ;;  %v1997_v31 = vadd.f32 %v5015_v52, %v1977_v13  ;;  %2433 = vmatpush.msrb.mxu2 %v2383_v2 }
 0x26a   : > { %2198 = vmatpush.msrb.mxu0 %v2080_v14  ;;  %2482 = vmatpush.msrb.mxu3 %v2442_v38  ;;  %v1976_v5 = vadd.f32 %v1917_v27, %v1830_v4 }
 0x26b   : > { %v2016_v58 = vsub.f32 0.0, %v2002_v20  ;;  %v2011_v25 = vsub.f32 0.0, %v1997_v31  ;;  %v2250_v31 = vld [vmem:[%s5362_s5 + $0x298] sm:$0xff] }
 0x26c   : > { %2483 = vmatpush.msrb.mxu3 %v2441_v23  ;;  %v1996_v12 = vadd.f32 %v4969_v59, %v1976_v5 }
 0x26d   : > { %v2036_v63 = vmul.f32 1.442695, %v2016_v58  ;;  %v2026_v41 = vmul.f32 1.442695, %v2011_v25 }
 0x26e   : > { %v1929_v17 = vpop.f32.mrf.mxu2  ;;  %v1958_v21 = vpop.f32.mrf.mxu3  ;;  %2484 = vmatpush.msrb.mxu3 %v2440_v42  ;;  %v2010_v48 = vsub.f32 0.0, %v1996_v12 }
 0x26f   : > { %3006 = vpow2.f32 %v2036_v63  ;;  %v1984_v10 = vadd.f32 %v1929_v17, %v1838_v19  ;;  %v1979_v44 = vadd.f32 %v1958_v21, %v1833_v43 }
 0x270   : > { %2485 = vmatpush.msrb.mxu3 %v2439_v47  ;;  %v2024_v58 = vmul.f32 1.442695, %v2010_v48 }
 0x271   : > { %v5037_v26 = vadd.f32 %v4969_v59, %v1984_v10  ;;  %v1999_v57 = vadd.f32 %v5015_v52, %v1979_v44  ;;  %v1920_v46 = vpop.f32.mrf.mxu1  ;;  %v1839_v44 = vadd.f32 %v4823_v22, %v1693_v54 }
 0x272   : > { %v1978_v50 = vadd.f32 %v1920_v46, %v1832_v56 }
 0x273   : > { %v2013_v53 = vsub.f32 0.0, %v1999_v57 }
 0x274   : > { %v1998_v0 = vadd.f32 %v4969_v59, %v1978_v50  ;;  %v2322_v50 = vld [vmem:[%s5362_s5 + $0x378] sm:$0xff] }
 0x275   : > { %v3007_v8 = vpop.eup %3006  ;;  %v2030_v40 = vmul.f32 1.442695, %v2013_v53 }
 0x276   : > { %v2058_v30 = vadd.f32 1.0, %v3007_v8  ;;  %v2012_v34 = vsub.f32 0.0, %v1998_v0  ;;  %v1932_v29 = vpop.f32.mrf.mxu2  ;;  %v1961_v7 = vpop.f32.mrf.mxu3  ;;  %v2248_v0 = vld [vmem:[%s5362_s5 + $0x288] sm:$0xff]  ;;  %v2321_v8 = vld [vmem:[%s5362_s5 + $0x370] sm:$0xff] }
 0x277   : > { %v1986_v35 = vadd.f32 %v1932_v29, %v1840_v18  ;;  %v1981_v6 = vadd.f32 %v1961_v7, %v4722_v45  ;;  %v1789_v18 = vpop.f32.mrf.mxu0 }
 0x278   : > { %3008 = vrcp.f32 %v2058_v30  ;;  %v2028_v33 = vmul.f32 1.442695, %v2012_v34  ;;  %v1842_v7 = vadd.f32 %v1789_v18, %v1696_v32  ;;  %v2018_v18 = vsub.f32 0.0, %v5037_v26  ;;  %v2378_v26 = vld [vmem:[%s5362_s5 + $0x3d8] sm:$0xff] }
 0x279   : > { %v2006_v39 = vadd.f32 %v4969_v59, %v1986_v35  ;;  %v1923_v20 = vpop.f32.mrf.mxu1  ;;  %3010 = vpow2.f32 %v2030_v40  ;;  %v2001_v4 = vadd.f32 %v5015_v52, %v1981_v6  ;;  %v2246_v35 = vld [vmem:[%s5362_s5 + $0x278] sm:$0xff]  ;;  %v2524_v6 = vld [vmem:[%s5362_s5 + $0x5a8] sm:$0xff] }
 0x27a   : > { %v1980_v27 = vadd.f32 %v1923_v20, %v1834_v60  ;;  %3012 = vpow2.f32 %v2028_v33  ;;  %v2319_v60 = vld [vmem:[%s5362_s5 + $0x360] sm:$0xff]  ;;  %v2526_v33 = vld [vmem:[%s5362_s5 + $0x5b8] sm:$0xff] }
 0x27b   : > { %v2020_v61 = vsub.f32 0.0, %v2006_v39  ;;  %3014 = vpow2.f32 %v2026_v41  ;;  %v2015_v56 = vsub.f32 0.0, %v2001_v4  ;;  %v2245_v39 = vld [vmem:[%s5362_s5 + $0x270] sm:$0xff]  ;;  %v2318_v20 = vld [vmem:[%s5362_s5 + $0x358] sm:$0xff] }
 0x27c   : > { %v2000_v14 = vadd.f32 %v4969_v59, %v1980_v27 }
 0x27d   : > { %v2044_v51 = vmul.f32 1.442695, %v2020_v61  ;;  %v2034_v47 = vmul.f32 1.442695, %v2015_v56  ;;  %v2525_v61 = vld [vmem:[%s5362_s5 + $0x5b0] sm:$0xff]  ;;  %v2240_v56 = vld [vmem:[%s5362_s5 + $0x248] sm:$0xff] }
 0x27e   : > { %v3009_v38 = vpop.eup %3008  ;;  %v2014_v55 = vsub.f32 0.0, %v2000_v14  ;;  %v1964_v43 = vpop.f32.mrf.mxu3  ;;  %v2244_v14 = vld [vmem:[%s5362_s5 + $0x268] sm:$0xff] }
 0x27f   : > { %3016 = vpow2.f32 %v2044_v51  ;;  %2342 = vmatmul.f32.vlgmr.msra.gmra.mxu3 %v3009_v38  ;;  %v3011_v19 = vpop.eup %3010  ;;  %v1983_v13 = vadd.f32 %v1964_v43, %v4774_v49  ;;  %v1935_v34 = vpop.f32.mrf.mxu2  ;;  %v2317_v51 = vld [vmem:[%s5362_s5 + $0x350] sm:$0xff] }
 0x280   : > { %3018 = vpow2.f32 %v2024_v58  ;;  %v2032_v63 = vmul.f32 1.442695, %v2014_v55  ;;  %v2055_v23 = vadd.f32 1.0, %v3011_v19  ;;  %v3013_v36 = vpop.eup %3012  ;;  %v1988_v41 = vadd.f32 %v1935_v34, %v1842_v7  ;;  %v2515_v34 = vld [vmem:[%s5362_s5 + $0x560] sm:$0xff]  ;;  %v2377_v7 = vld [vmem:[%s5362_s5 + $0x3d0] sm:$0xff] }
 0x281   : > { %v3015_v17 = vpop.eup %3014  ;;  %v2054_v45 = vadd.f32 1.0, %v3013_v36  ;;  %v2003_v21 = vadd.f32 %v5015_v52, %v1983_v13  ;;  %v2316_v13 = vld [vmem:[%s5362_s5 + $0x348] sm:$0xff] }
 0x282   : > { %3020 = vpow2.f32 %v2032_v63  ;;  %v2053_v42 = vadd.f32 1.0, %v3015_v17  ;;  %v2008_v43 = vadd.f32 %v4969_v59, %v1988_v41  ;;  %v2243_v63 = vld [vmem:[%s5362_s5 + $0x260] sm:$0xff]  ;;  %v2242_v17 = vld [vmem:[%s5362_s5 + $0x258] sm:$0xff]  ;;  %v2461_v41 = vld [vmem:[%s5362_s5 + $0x510] sm:$0xff] }
 0x283   : > { %3022 = vrcp.f32 %v2055_v23  ;;  %v2017_v5 = vsub.f32 0.0, %v2003_v21  ;;  %v2523_v59 = vld [vmem:[%s5362_s5 + $0x5a0] sm:$0xff] }
 0x284   : > { %3024 = vrcp.f32 %v2054_v45  ;;  %v2315_v45 = vld [vmem:[%s5362_s5 + $0x340] sm:$0xff] }
 0x285   : > { %v3017_v10 = vpop.eup %3016  ;;  %v2038_v12 = vmul.f32 1.442695, %v2017_v5  ;;  %v2312_v5 = vld [vmem:[%s5362_s5 + $0x328] sm:$0xff] }
 0x286   : > { %v3019_v28 = vpop.eup %3018  ;;  %v2062_v49 = vadd.f32 1.0, %v3017_v10  ;;  %v1967_v9 = vpop.f32.mrf.mxu3  ;;  %v2022_v10 = vsub.f32 0.0, %v2008_v43  ;;  %v2458_v43 = vld [vmem:[%s5362_s5 + $0x4f8] sm:$0xff] }
 0x287   : > { %v1985_v16 = vadd.f32 %v1967_v9, %v1839_v44  ;;  %v2052_v46 = vadd.f32 1.0, %v3019_v28  ;;  %v2241_v44 = vld [vmem:[%s5362_s5 + $0x250] sm:$0xff]  ;;  %v2314_v28 = vld [vmem:[%s5362_s5 + $0x338] sm:$0xff] }
 0x288   : > { %v3021_v37 = vpop.eup %3020  ;;  %3026 = vrcp.f32 %v2062_v49  ;;  %v2313_v9 = vld [vmem:[%s5362_s5 + $0x330] sm:$0xff] }
 0x289   : > { %v3023_v57 = vpop.eup %3022  ;;  %v2056_v1 = vadd.f32 1.0, %v3021_v37  ;;  %v2005_v22 = vadd.f32 %v5015_v52, %v1985_v16  ;;  %3028 = vrcp.f32 %v2053_v42  ;;  %v2521_v42 = vld [vmem:[%s5362_s5 + $0x590] sm:$0xff]  ;;  %v2520_v16 = vld [vmem:[%s5362_s5 + $0x588] sm:$0xff]  ;;  %v2048_v37 = vmul.f32 1.442695, %v2022_v10 }
 0x28a   : > { %2826 = vmatmul.msk.f32.vlgmr.msrb.gmra.mxu1 %vm2136_vm5, %v3023_v57  ;;  %v3025_v53 = vpop.eup %3024 }
 0x28b   : > { %3030 = vrcp.f32 %v2056_v1  ;;  %v2019_v2 = vsub.f32 0.0, %v2005_v22  ;;  %2278 = vmatpush.msrb.mxu1 %v2250_v31  ;;  %2156 = vmatmul.f32.vlgmr.msra.gmra.mxu0 %v3025_v53  ;;  %v2311_v1 = vld [vmem:[%s5362_s5 + $0x320] sm:$0xff] }
 0x28c   : > { %3032 = vrcp.f32 %v2052_v46  ;;  %2350 = vmatpush.msra.mxu0 %v2322_v50  ;;  %v2382_v46 = vld [vmem:[%s5362_s5 + $0x3f8] sm:$0xff] }
 0x28d   : > { %v2042_v25 = vmul.f32 1.442695, %v2019_v2  ;;  %2279 = vmatpush.msrb.mxu1 %v2249_v3  ;;  %3034 = vpow2.f32 %v2034_v47  ;;  %v2519_v47 = vld [vmem:[%s5362_s5 + $0x580] sm:$0xff]  ;;  %v2381_v3 = vld [vmem:[%s5362_s5 + $0x3f0] sm:$0xff]  ;;  %v2466_v50 = vld [vmem:[%s5362_s5 + $0x538] sm:$0xff] }
 0x28e   : > { %v3027_v30 = vpop.eup %3026  ;;  %v1970_v40 = vpop.f32.mrf.mxu3  ;;  %2351 = vmatpush.msra.mxu0 %v2321_v8  ;;  %v2518_v2 = vld [vmem:[%s5362_s5 + $0x578] sm:$0xff]  ;;  %v2517_v8 = vld [vmem:[%s5362_s5 + $0x570] sm:$0xff] }
 0x28f   : > { %3036 = vpow2.f32 %v2042_v25  ;;  %2280 = vmatpush.msrb.mxu1 %v2248_v0  ;;  %v3029_v29 = vpop.eup %3028  ;;  %2486 = vmatmul.f32.vlgmr.msrb.gmra.mxu3 %v3027_v30  ;;  %v1987_v4 = vadd.f32 %v1970_v40, %v4887_v15  ;;  %v2522_v15 = vld [vmem:[%s5362_s5 + $0x598] sm:$0xff]  ;;  %v2465_v0 = vld [vmem:[%s5362_s5 + $0x530] sm:$0xff]  ;;  %v2379_v25 = vld [vmem:[%s5362_s5 + $0x3e0] sm:$0xff] }
 0x290   : > { %3038 = vpow2.f32 %v2038_v12  ;;  %2352 = vmatpush.msra.mxu0 %v2320_v62  ;;  %v2380_v12 = vld [vmem:[%s5362_s5 + $0x3e8] sm:$0xff]  ;;  %v2463_v40 = vld [vmem:[%s5362_s5 + $0x520] sm:$0xff] }
 0x291   : > { %v3031_v48 = vpop.eup %3030  ;;  %2281 = vmatpush.msrb.mxu1 %v2247_v11  ;;  %v2007_v49 = vadd.f32 %v5015_v52, %v1987_v4  ;;  %v2464_v30 = vld [vmem:[%s5362_s5 + $0x528] sm:$0xff] }
 0x292   : > { %2827 = vmatmul.msk.f32.vlgmr.msra.gmra.mxu1 %vm2136_vm5, %v3029_v29  ;;  %2270 = vmatmul.f32.vlgmr.msra.gmra.mxu2 %v3031_v48  ;;  %v3033_v27 = vpop.eup %3032  ;;  %v2516_v11 = vld [vmem:[%s5362_s5 + $0x568] sm:$0xff]  ;;  %v2040_v29 = vmul.f32 1.442695, %v2018_v18  ;;  %v2514_v48 = vld [vmem:[%s5362_s5 + $0x558] sm:$0xff] }
 0x293   : > { %2282 = vmatpush.msrb.mxu1 %v2246_v35  ;;  %2353 = vmatpush.msra.mxu0 %v2319_v60  ;;  %v3035_v58 = vpop.eup %3034  ;;  %v2021_v57 = vsub.f32 0.0, %v2007_v49  ;;  %v2462_v35 = vld [vmem:[%s5362_s5 + $0x518] sm:$0xff]  ;;  %v2367_v49 = vld [vmem:[%s5362_s5 + $0x380] sm:$0xff] }
 0x294   : > { %2199 = vmatmul.f32.vlgmr.msrb.gmra.mxu0 %v3033_v27  ;;  %2542 = vmatpush.msra.mxu2 %v2526_v33  ;;  %v2057_v23 = vadd.f32 1.0, %v3035_v58  ;;  %v2376_v33 = vld [vmem:[%s5362_s5 + $0x3c8] sm:$0xff]  ;;  %v2375_v27 = vld [vmem:[%s5362_s5 + $0x3c0] sm:$0xff] }
 0x295   : > { %v3037_v38 = vpop.eup %3036  ;;  %2283 = vmatpush.msrb.mxu1 %v2245_v39  ;;  %2354 = vmatpush.msra.mxu0 %v2318_v20  ;;  %v2046_v32 = vmul.f32 1.442695, %v2021_v57  ;;  %v2513_v39 = vld [vmem:[%s5362_s5 + $0x550] sm:$0xff]  ;;  %v2512_v58 = vld [vmem:[%s5362_s5 + $0x548] sm:$0xff] }
 0x296   : > { %v3039_v55 = vpop.eup %3038  ;;  %v2061_v19 = vadd.f32 1.0, %v3037_v38  ;;  %2543 = vmatpush.msra.mxu2 %v2525_v61  ;;  %v1973_v54 = vpop.f32.mrf.mxu3  ;;  %v2460_v61 = vld [vmem:[%s5362_s5 + $0x508] sm:$0xff] }
 0x297   : > { %2284 = vmatpush.msrb.mxu1 %v2244_v14  ;;  %2355 = vmatpush.msra.mxu0 %v2317_v51  ;;  %v1989_v36 = vadd.f32 %v1973_v54, %v4946_v24  ;;  %v2059_v21 = vadd.f32 1.0, %v3039_v55  ;;  %v2374_v14 = vld [vmem:[%s5362_s5 + $0x3b8] sm:$0xff]  ;;  %v2459_v51 = vld [vmem:[%s5362_s5 + $0x500] sm:$0xff]  ;;  %v2373_v55 = vld [vmem:[%s5362_s5 + $0x3b0] sm:$0xff] }
 0x298   : > { %2544 = vmatpush.msra.mxu2 %v2524_v6  ;;  %3040 = vrcp.f32 %v2061_v19  ;;  %v2511_v6 = vld [vmem:[%s5362_s5 + $0x540] sm:$0xff] }
 0x299   : > { %2285 = vmatpush.msrb.mxu1 %v2243_v63  ;;  %2356 = vmatpush.msra.mxu0 %v2316_v13  ;;  %v5135_v24 = vadd.f32 %v5015_v52, %v1989_v36  ;;  %3042 = vrcp.f32 %v2057_v23  ;;  %v2239_v52 = vld [vmem:[%s5362_s5 + $0x240] sm:$0xff]  ;;  %v2372_v63 = vld [vmem:[%s5362_s5 + $0x3a8] sm:$0xff]  ;;  %v2457_v13 = vld [vmem:[%s5362_s5 + $0x4f0] sm:$0xff] }
 0x29a   : > { %2545 = vmatpush.msra.mxu2 %v2523_v59  ;;  %3044 = vrcp.f32 %v2059_v21  ;;  %v2371_v23 = vld [vmem:[%s5362_s5 + $0x3a0] sm:$0xff]  ;;  %v2456_v36 = vld [vmem:[%s5362_s5 + $0x4e8] sm:$0xff]  ;;  %v2538_v21 = vld [vmem:[%s5362_s5 + $0x618] sm:$0xff] }
 0x29b   : > { %2286 = vmatpush.msrb.mxu1 %v2242_v17  ;;  %2357 = vmatpush.msra.mxu0 %v2315_v45  ;;  %3046 = vpow2.f32 %v2048_v37  ;;  %v2023_v4 = vsub.f32 0.0, %v5135_v24  ;;  %v2370_v17 = vld [vmem:[%s5362_s5 + $0x398] sm:$0xff]  ;;  %v2455_v45 = vld [vmem:[%s5362_s5 + $0x4e0] sm:$0xff]  ;;  %v2533_v37 = vld [vmem:[%s5362_s5 + $0x5f0] sm:$0xff] }
 0x29c   : > { %2546 = vmatpush.msra.mxu2 %v2522_v15  ;;  %3048 = vpow2.f32 %v2046_v32  ;;  %v2369_v15 = vld [vmem:[%s5362_s5 + $0x390] sm:$0xff] }
 0x29d   : > { %2287 = vmatpush.msrb.mxu1 %v2241_v44  ;;  %2358 = vmatpush.msra.mxu0 %v2314_v28  ;;  %3050 = vpow2.f32 %v2040_v29  ;;  %v2050_v24 = vmul.f32 1.442695, %v2023_v4  ;;  %v2537_v44 = vld [vmem:[%s5362_s5 + $0x610] sm:$0xff]  ;;  %v2368_v28 = vld [vmem:[%s5362_s5 + $0x388] sm:$0xff] }
 0x29e   : > { %2547 = vmatpush.msra.mxu2 %v2521_v42  ;;  %v3041_v31 = vpop.eup %3040  ;;  %v2536_v42 = vld [vmem:[%s5362_s5 + $0x608] sm:$0xff] }
 0x29f   : > { %2288 = vmatpush.msrb.mxu1 %v2240_v56  ;;  %2359 = vmatpush.msra.mxu0 %v2313_v9  ;;  %v3043_v22 = vpop.eup %3042  ;;  %v2535_v56 = vld [vmem:[%s5362_s5 + $0x600] sm:$0xff] }
 0x2a0   : > { %2548 = vmatpush.msra.mxu2 %v2520_v16  ;;  %v3045_v53 = vpop.eup %3044  ;;  %v2534_v16 = vld [vmem:[%s5362_s5 + $0x5f8] sm:$0xff] }
 0x2a1   : > { %2289 = vmatpush.msrb.mxu1 %v2239_v52  ;;  %2360 = vmatpush.msra.mxu0 %v2312_v5  ;;  %v3047_v62 = vpop.eup %3046  ;;  %v2532_v5 = vld [vmem:[%s5362_s5 + $0x5e8] sm:$0xff] }
 0x2a2   : > { %2828 = vmatmul.msk.f32.vlgmr.msrb.gmra.mxu1 %vm2136_vm5, %v3043_v22  ;;  %2830 = vmatmul.msk.f32.vlgmr.msrb.gmra.mxu2 %vm2136_vm5, %v3041_v31  ;;  %v2064_v60 = vadd.f32 1.0, %v3047_v62  ;;  %v3049_v20 = vpop.eup %3048  ;;  %v2531_v31 = vld [vmem:[%s5362_s5 + $0x5e0] sm:$0xff]  ;;  %v2528_v22 = vld [vmem:[%s5362_s5 + $0x5c8] sm:$0xff] }
 0x2a3   : > { %2398 = vmatpush.msra.mxu1 %v2382_v46  ;;  %2361 = vmatpush.msra.mxu0 %v2311_v1  ;;  %v2063_v38 = vadd.f32 1.0, %v3049_v20  ;;  %v3051_v19 = vpop.eup %3050  ;;  %v2530_v46 = vld [vmem:[%s5362_s5 + $0x5d8] sm:$0xff]  ;;  %v2529_v1 = vld [vmem:[%s5362_s5 + $0x5d0] sm:$0xff] }
 0x2a4   : > { %2549 = vmatpush.msra.mxu2 %v2519_v47  ;;  %2829 = vmatmul.msk.f32.vlgmr.msra.gmra.mxu0 %vm2136_vm5, %v3045_v53  ;;  %3052 = vrcp.f32 %v2064_v60  ;;  %v2060_v59 = vadd.f32 1.0, %v3051_v19  ;;  %v2527_v47 = vld [vmem:[%s5362_s5 + $0x5c0] sm:$0xff] }
 0x2a5   : > { %2399 = vmatpush.msra.mxu1 %v2381_v3  ;;  %2494 = vmatpush.msrb.mxu0 %v2466_v50  ;;  %3054 = vrcp.f32 %v2063_v38 }
 0x2a6   : > { %2550 = vmatpush.msra.mxu2 %v2518_v2  ;;  %3056 = vrcp.f32 %v2060_v59 }
 0x2a7   : > { %2400 = vmatpush.msra.mxu1 %v2380_v12  ;;  %2495 = vmatpush.msrb.mxu0 %v2465_v0  ;;  %3058 = vpow2.f32 %v2050_v24 }
 0x2a8   : > { %2551 = vmatpush.msra.mxu2 %v2517_v8 }
 0x2a9   : > { %2401 = vmatpush.msra.mxu1 %v2379_v25  ;;  %2496 = vmatpush.msrb.mxu0 %v2464_v30 }
 0x2aa   : > { %2552 = vmatpush.msra.mxu2 %v2516_v11  ;;  %v3053_v54 = vpop.eup %3052 }
 0x2ab   : > { %2402 = vmatpush.msra.mxu1 %v2378_v26  ;;  %2497 = vmatpush.msrb.mxu0 %v2463_v40  ;;  %v3055_v10 = vpop.eup %3054 }
 0x2ac   : > { %2553 = vmatpush.msra.mxu2 %v2515_v34  ;;  %v3057_v9 = vpop.eup %3056 }
 0x2ad   : > { %2403 = vmatpush.msra.mxu1 %v2377_v7  ;;  %2498 = vmatpush.msrb.mxu0 %v2462_v35  ;;  %v3059_v52 = vpop.eup %3058 }
 0x2ae   : > { %2554 = vmatpush.msra.mxu2 %v2514_v48  ;;  %v2065_v57 = vadd.f32 1.0, %v3059_v52 }
 0x2af   : > { %2404 = vmatpush.msra.mxu1 %v2376_v33  ;;  %2499 = vmatpush.msrb.mxu0 %v2461_v41 }
 0x2b0   : > { %2555 = vmatpush.msra.mxu2 %v2513_v39  ;;  %3060 = vrcp.f32 %v2065_v57 }
 0x2b1   : > { %2405 = vmatpush.msra.mxu1 %v2375_v27  ;;  %2500 = vmatpush.msrb.mxu0 %v2460_v61 }
 0x2b2   : > { %2556 = vmatpush.msra.mxu2 %v2512_v58  ;;  %v2893_v58 = vld [vmem:[%s5363_s6] ss:$0 sm:$0xff] }
 0x2b3   : > { %2406 = vmatpush.msra.mxu1 %v2374_v14  ;;  %2501 = vmatpush.msrb.mxu0 %v2459_v51 }
 0x2b4   : > { %2557 = vmatpush.msra.mxu2 %v2511_v6 }
 0x2b5   : > { %2407 = vmatpush.msra.mxu1 %v2373_v55  ;;  %2502 = vmatpush.msrb.mxu0 %v2458_v43 }
 0x2b6   : > { %2558 = vmatmul.f32.vlgmr.msra.gmra.mxu2 %v3053_v54  ;;  %v3061_v3 = vpop.eup %3060 }
 0x2b7   : > { %2408 = vmatpush.msra.mxu1 %v2372_v63  ;;  %2503 = vmatpush.msrb.mxu0 %v2457_v13 }
 0x2b9   : > { %2409 = vmatpush.msra.mxu1 %v2371_v23  ;;  %2504 = vmatpush.msrb.mxu0 %v2456_v36 }
 0x2bb   : > { %2410 = vmatpush.msra.mxu1 %v2370_v17  ;;  %2505 = vmatpush.msrb.mxu0 %v2455_v45 }
 0x2bc   : > { %2831 = vmatmul.msk.f32.vlgmr.msrb.gmra.mxu0 %vm2136_vm5, %v3055_v10 }
 0x2bd   : > { %2566 = vmatpush.msra.mxu0 %v2538_v21  ;;  %2411 = vmatpush.msra.mxu1 %v2369_v15 }
 0x2bf   : > { %2567 = vmatpush.msra.mxu0 %v2537_v44  ;;  %2412 = vmatpush.msra.mxu1 %v2368_v28 }
 0x2c1   : > { %2568 = vmatpush.msra.mxu0 %v2536_v42  ;;  %2413 = vmatpush.msra.mxu1 %v2367_v49 }
 0x2c2   : > { %2414 = vmatmul.f32.vlgmr.msra.gmra.mxu1 %v3057_v9 }
 0x2c3   : > { %2569 = vmatpush.msra.mxu0 %v2535_v56 }
 0x2c5   : > { %2570 = vmatpush.msra.mxu0 %v2534_v16 }
 0x2c7   : > { %2571 = vmatpush.msra.mxu0 %v2533_v37 }
 0x2c9   : > { %2572 = vmatpush.msra.mxu0 %v2532_v5 }
 0x2cb   : > { %2573 = vmatpush.msra.mxu0 %v2531_v31 }
 0x2cd   : > { %2574 = vmatpush.msra.mxu0 %v2530_v46 }
 0x2cf   : > { %2575 = vmatpush.msra.mxu0 %v2529_v1 }
 0x2d1   : > { %2576 = vmatpush.msra.mxu0 %v2528_v22 }
 0x2d3   : > { %2577 = vmatpush.msra.mxu0 %v2527_v47 }
 0x2d4   : > { %2832 = vmatmul.msk.f32.vlgmr.msra.gmra.mxu0 %vm2136_vm5, %v3061_v3 }
 0x302   : > { %v2343_v62 = vpop.f32.mrf.mxu3 }
 0x307   : > { %v2177_v50 = vpop.f32.mrf.mxu1 }
 0x308   : > { %v2157_v53 = vpop.f32.mrf.mxu0 }
 0x309   : > { %v2178_v0 = vadd.f32 %v2177_v50, %v2157_v53 }
 0x30f   : > { %v2220_v2 = vpop.f32.mrf.mxu1 }
 0x311   : > { %v2200_v32 = vpop.f32.mrf.mxu0 }
 0x312   : > { %v2201_v25 = vadd.f32 %v2200_v32, %v2178_v0  ;;  %v2487_v33 = vpop.f32.mrf.mxu3 }
 0x314   : > { %v2221_v11 = vadd.f32 %v2220_v2, %v2201_v25 }
 0x315   : > { %v2271_v8 = vpop.f32.mrf.mxu2 }
 0x31f   : > { %v2291_v12 = vpop.f32.mrf.mxu1 }
 0x320   : > { %v2292_v30 = vadd.f32 %v2291_v12, %v2271_v8 }
 0x321   : > { %v2363_v18 = vpop.f32.mrf.mxu0 }
 0x322   : > { %v2294_v40 = vadd.f32 %v2292_v30, %v2221_v11  ;;  %v2364_v34 = vadd.f32 %v2363_v18, %v2343_v62 }
 0x324   : > { %v2366_v60 = vadd.f32 %v2364_v34, %v2294_v40 }
 0x325   : > { %v2435_v29 = vpop.f32.mrf.mxu2 }
 0x339   : > { %v2507_v7 = vpop.f32.mrf.mxu0  ;;  %v2559_v39 = vpop.f32.mrf.mxu2 }
 0x33a   : > { %v2508_v41 = vadd.f32 %v2507_v7, %v2487_v33 }
 0x33f   : > { %v2415_v26 = vpop.f32.mrf.mxu1 }
 0x340   : > { %v2436_v35 = vadd.f32 %v2435_v29, %v2415_v26 }
 0x342   : > { %v2438_v48 = vadd.f32 %v2436_v35, %v2366_v60 }
 0x344   : > { %v2510_v27 = vadd.f32 %v2508_v41, %v2438_v48 }
 0x351   : > { %v2579_v20 = vpop.f32.mrf.mxu0 }
 0x352   : > { %v2580_v61 = vadd.f32 %v2579_v20, %v2559_v39 }
 0x354   : > { %v2582_v14 = vadd.f32 %v2580_v61, %v2510_v27 }
 0x356   : > { %v2587_v51 = vadd.f32 %v2893_v58, %v2582_v14 }
 0x358   : > { %2588 = vst [vmem:[%s271_s8] sm:$0xff] %v2587_v51 }
 0x359   : > { %3094 = shalt.err (!%p3091_p3)
}
 0x35a   : > { %2852 = dma.vmem_to_hbm [thread:$0]  (%p3211_p5), %s2603_s29, 128, %s2605_s13, %s2590_s28  }
 0x35b PF: > { %p2858_p4 = scmp.ge.s32.totalorder %s3129_s27, 2  ;;  %s2616_s17 = sand.u32 1, %s3117_s24  }
 0x35c   : > { %s2617_s22 = scalar_lea.sflag [#allocation4], %s2616_s17 }
 0x35d   : > { %p2855_p7 = pnand %p2858_p4, %p3215_p6 }
 0x35f   : > { %p2856_p8 = pneg %p2855_p7 }
 0x361   : > { %3112 = dma.done.wait (%p2856_p8), %s2617_s22, 128  }
 0x362   : > { %3114 = vsyncadd (%p2856_p8), %s2617_s22, 4294967168  ;;  %p17_p9 = scmp.ge.s32.totalorder %s3198_s30, 4   ;;  %s5367_s24 = smov %s3121_s25 }
 0x363   : > { %s5368_s25 = smov %s3125_s26  ;;  %s5369_s26 = smov %s3209_s10 }
 0x364   : > { %s5370_s27 = smov %s3198_s30  ;;  %19 = sbr.rel (!%p17_p9) target bundleno = 3 (0x3), region = 83 }
 0x369   :  { %2623 = vsyncpa [#allocation4], 1 }
 0x36a   :  { %2625 = vsyncpa [#allocation4 + $0x1], 1 }

</bundles_post_ra>
